<compile_context>
chip_gen: v7x
topology: tpu7x:2x2x1
jax: 0.10.0
libtpu: 0.0.40
codegen_flags: <defaults>
</compile_context>

<pallas_src>
import functools

import jax
import jax.numpy as jnp
from jax.experimental import pallas as pl
from jax.experimental.pallas import tpu as pltpu

_TARGET_BLOCK_BYTES = 2 * 1024 * 1024  # ~2 MiB per input block (x2 inputs x2 buffers)


def _haar_l1_kernel(pred_ref, tgt_ref, out_ref, *, n_rows, width):
    """One grid step: partial sum of |Haar(pred) - Haar(target)| over a row tile.

    pred_ref / tgt_ref: (TR, 2*width) tiles of the (B*C*H//2, 2*W) row-pair
    view.  Lane c in [0, W) is the even image row, lane W + c the odd row.
    """
    W = width
    L = 2 * W
    TR = pred_ref.shape[0]

    p = pred_ref[...].astype(jnp.float32)
    t = tgt_ref[...].astype(jnp.float32)
    e = p - t                                      # (TR, 2W) coefficient diff source

    # Neighbouring lane (circular).  Which lane parity holds a true intra-block
    # column pair is resolved below with a rolled lane-index probe, so the math
    # is independent of the rotate direction convention.
    e_nb = pltpu.roll(e, shift=L - 1, axis=1)

    cs = e + e_nb        # column-pair sums  (a+b on even rows, c+d on odd rows)
    cd = e - e_nb        # column-pair diffs (sign irrelevant: abs below)

    cs_lo, cs_hi = cs[:, :W], cs[:, W:]
    cd_lo, cd_hi = cd[:, :W], cd[:, W:]

    # Per 2x2 block [[a,b],[c,d]] of the diff:
    #   |LL|+|LH|+|HL|+|HH| = max(|a+b|,|c+d|) + max(|a-b|,|c-d|)
    q = (jnp.maximum(jnp.abs(cs_lo), jnp.abs(cs_hi))
         + jnp.maximum(jnp.abs(cd_lo), jnp.abs(cd_hi)))        # (TR, W)

    # Column-pair validity mask (direction-agnostic): lane c is valid iff the
    # rolled partner of lane c is lane c ^ 1 (i.e. they form an intra-block
    # column pair); the wrap-around lane is automatically excluded.
    lanes = jax.lax.broadcasted_iota(jnp.int32, (8, L), 1)
    partner = pltpu.roll(lanes, shift=L - 1, axis=1)
    pair_ok = jnp.where(partner[0:1, :W] == (lanes[0:1, :W] ^ 1), 1.0, 0.0)  # (1, W)

    # Ragged last tile: rows >= n_rows are uninitialized padding -> drop them.
    rows = (pl.program_id(0) * TR
            + jax.lax.broadcasted_iota(jnp.int32, (TR, 1), 0))
    row_ok = jnp.where(rows < n_rows, 1.0, 0.0)                # (TR, 1)

    keep = row_ok * pair_ok                                    # (TR, W)
    q = jnp.where(keep > 0.5, q, 0.0)

    out_ref[...] = jnp.full(out_ref.shape, jnp.sum(q), dtype=out_ref.dtype)


def _choose_block_rows(n_rows, row_bytes):
    rows = _TARGET_BLOCK_BYTES // max(int(row_bytes), 1)
    rows = max(8, (rows // 8) * 8)
    if rows >= n_rows:
        return n_rows      # single full-extent block (always a legal block dim)
    return rows


def wavelet_domain_loss(pred, target, loss_weight=1.0, reduction='mean'):
    """JAX/Pallas equivalent of WaveletDomainLoss.forward (wavelet='haar')."""
    assert pred.shape == target.shape and pred.ndim == 4
    B, C, H, W = pred.shape
    assert H % 2 == 0 and W % 2 == 0, "Haar DWT (level 1) needs even H and W"

    n_rows = B * C * (H // 2)
    L = 2 * W

    # Zero-copy row-pair views: row r = (b, c, h//2); lanes [0, W) hold the even
    # image row, lanes [W, 2W) the odd image row.  Native dtype is preserved.
    p2 = pred.reshape(n_rows, L)
    t2 = target.reshape(n_rows, L)

    tr = _choose_block_rows(n_rows, L * p2.dtype.itemsize)
    num_blocks = pl.cdiv(n_rows, tr)

    kernel = functools.partial(_haar_l1_kernel, n_rows=n_rows, width=W)

    partials = pl.pallas_call(
        kernel,
        out_shape=jax.ShapeDtypeStruct((num_blocks, 1, 128), jnp.float32),
        grid_spec=pltpu.PrefetchScalarGridSpec(
            num_scalar_prefetch=0,
            grid=(num_blocks,),
            in_specs=[pl.BlockSpec((tr, L), lambda i: (i, 0)),
                      pl.BlockSpec((tr, L), lambda i: (i, 0))],
            out_specs=pl.BlockSpec((1, 1, 128), lambda i: (i, 0, 0)),
        ),
        compiler_params=pltpu.CompilerParams(
            dimension_semantics=("parallel",),
            vmem_limit_bytes=48 * 1024 * 1024),
    )(p2, t2)

    total = jnp.sum(partials[:, 0, 0])

    n_coeff = B * C * H * W      # == B * (4*C) * (H//2) * (W//2)
    if reduction == 'mean':
        loss = total / jnp.float32(n_coeff)
    elif reduction == 'sum':
        loss = total
    else:
        # TODO(synk): reduction='none' would require returning the full
        # (B, 4C, H//2, W//2) |coeff diff| tensor; not implemented here.
        raise NotImplementedError("reduction='none' not supported")
    return jnp.float32(loss_weight) * loss


def _ref_loss(pred, target, loss_weight=1.0):
    """Pure-JAX reference matching the PyTorch module (reduction='mean')."""
    def coeffs(x):
        a = x[:, :, 0::2, 0::2]
        b = x[:, :, 0::2, 1::2]
        c = x[:, :, 1::2, 0::2]
        d = x[:, :, 1::2, 1::2]
        return jnp.stack([0.5 * (a + b + c + d),
                          0.5 * (a + b - c - d),
                          0.5 * (a - b + c - d),
                          0.5 * (a - b - c + d)], axis=2)  # (B, C, 4, H/2, W/2)
    return loss_weight * jnp.mean(jnp.abs(coeffs(pred) - coeffs(target)))


if __name__ == "__main__":
    key = jax.random.PRNGKey(0)
    k1, k2 = jax.random.split(key)
    # C=6 per the module docstring; spatial 128 keeps the kernel's lane axis
    # (2*W = 256) vreg-aligned.  Data in [-1, 1] as documented.
    B, C, H, W = 2, 6, 128, 128
    pred = jax.random.uniform(k1, (B, C, H, W), jnp.float32, minval=-1.0, maxval=1.0)
    target = jax.random.uniform(k2, (B, C, H, W), jnp.float32, minval=-1.0, maxval=1.0)

    loss = wavelet_domain_loss(pred, target, loss_weight=1.0, reduction='mean')
    loss = jax.block_until_ready(loss)

    ref = _ref_loss(pred, target, loss_weight=1.0)
    assert jnp.allclose(loss, ref, rtol=1e-5, atol=1e-6), (loss, ref)
    print("KERNEL_OK")
</pallas_src>

<mosaic_0001>
module attributes {stable_mosaic.version = 11 : i64} {
  func.func @_haar_l1_kernel(%arg0: i32, %arg1: memref<768x256xf32, #tpu.memory_space<vmem>>, %arg2: memref<768x256xf32, #tpu.memory_space<vmem>>, %arg3: memref<1x1x128xf32, #tpu.memory_space<vmem>>) attributes {dimension_semantics = [#tpu.dimension_semantics<parallel>], iteration_bounds = array<i64: 1>, scalar_prefetch = 0 : i64, scratch_operands = 0 : i64, tpu.core_type = #tpu.core_type<tc>, window_params = [{transform_indices = @transform_0, window_bounds = array<i64: 768, 256>}, {transform_indices = @transform_1, window_bounds = array<i64: 768, 256>}, {transform_indices = @transform_2, window_bounds = array<i64: 1, 1, 128>}]} {
    %c0 = arith.constant 0 : index
    %c0_0 = arith.constant 0 : index
    %0 = vector.load %arg1[%c0, %c0_0] : memref<768x256xf32, #tpu.memory_space<vmem>>, vector<768x256xf32>
    %c0_1 = arith.constant 0 : index
    %c0_2 = arith.constant 0 : index
    %1 = vector.load %arg2[%c0_1, %c0_2] : memref<768x256xf32, #tpu.memory_space<vmem>>, vector<768x256xf32>
    %2 = arith.subf %0, %1 : vector<768x256xf32>
    %c255_i32 = arith.constant 255 : i32
    %3 = tpu.dynamic_rotate %2 by %c255_i32 dim 1 : vector<768x256xf32>, i32 -> vector<768x256xf32>
    %4 = arith.addf %2, %3 : vector<768x256xf32>
    %5 = arith.subf %2, %3 : vector<768x256xf32>
    %6 = vector.extract_strided_slice %4 {offsets = [0, 0], sizes = [768, 128], strides = [1, 1]} : vector<768x256xf32> to vector<768x128xf32>
    %7 = vector.extract_strided_slice %4 {offsets = [0, 128], sizes = [768, 128], strides = [1, 1]} : vector<768x256xf32> to vector<768x128xf32>
    %8 = vector.extract_strided_slice %5 {offsets = [0, 0], sizes = [768, 128], strides = [1, 1]} : vector<768x256xf32> to vector<768x128xf32>
    %9 = vector.extract_strided_slice %5 {offsets = [0, 128], sizes = [768, 128], strides = [1, 1]} : vector<768x256xf32> to vector<768x128xf32>
    %10 = math.absf %6 : vector<768x128xf32>
    %11 = math.absf %7 : vector<768x128xf32>
    %12 = arith.maximumf %10, %11 : vector<768x128xf32>
    %13 = math.absf %8 : vector<768x128xf32>
    %14 = math.absf %9 : vector<768x128xf32>
    %15 = arith.maximumf %13, %14 : vector<768x128xf32>
    %16 = arith.addf %12, %15 : vector<768x128xf32>
    %17 = tpu.iota {dimensions = array<i32: 1>} : vector<8x256xi32>
    %c255_i32_3 = arith.constant 255 : i32
    %18 = tpu.dynamic_rotate %17 by %c255_i32_3 dim 1 : vector<8x256xi32>, i32 -> vector<8x256xi32>
    %19 = vector.extract_strided_slice %18 {offsets = [0, 0], sizes = [1, 128], strides = [1, 1]} : vector<8x256xi32> to vector<1x128xi32>
    %20 = vector.extract_strided_slice %17 {offsets = [0, 0], sizes = [1, 128], strides = [1, 1]} : vector<8x256xi32> to vector<1x128xi32>
    %c1_i32 = arith.constant 1 : i32
    %21 = vector.broadcast %c1_i32 : i32 to vector<1x128xi32>
    %22 = arith.xori %20, %21 : vector<1x128xi32>
    %23 = arith.cmpi eq, %19, %22 : vector<1x128xi32>
    %cst = arith.constant 1.000000e+00 : f32
    %cst_4 = arith.constant 0.000000e+00 : f32
    %24 = vector.broadcast %cst : f32 to vector<1x128xf32>
    %25 = vector.broadcast %cst_4 : f32 to vector<1x128xf32>
    %26 = arith.select %23, %24, %25 : vector<1x128xi1>, vector<1x128xf32>
    %c768_i32 = arith.constant 768 : i32
    %27 = arith.muli %arg0, %c768_i32 : i32
    %28 = tpu.iota {dimensions = array<i32: 0>} : vector<768x1xi32>
    %29 = vector.broadcast %27 : i32 to vector<768x1xi32>
    %30 = arith.addi %29, %28 : vector<768x1xi32>
    %c768_i32_5 = arith.constant 768 : i32
    %31 = vector.broadcast %c768_i32_5 : i32 to vector<768x1xi32>
    %32 = arith.cmpi slt, %30, %31 : vector<768x1xi32>
    %cst_6 = arith.constant 1.000000e+00 : f32
    %cst_7 = arith.constant 0.000000e+00 : f32
    %33 = vector.broadcast %cst_6 : f32 to vector<768x1xf32>
    %34 = vector.broadcast %cst_7 : f32 to vector<768x1xf32>
    %35 = arith.select %32, %33, %34 : vector<768x1xi1>, vector<768x1xf32>
    %36 = vector.broadcast %35 : vector<768x1xf32> to vector<768x128xf32>
    %37 = vector.broadcast %26 : vector<1x128xf32> to vector<768x128xf32>
    %38 = arith.mulf %36, %37 : vector<768x128xf32>
    %cst_8 = arith.constant 5.000000e-01 : f32
    %39 = vector.broadcast %cst_8 : f32 to vector<768x128xf32>
    %40 = arith.cmpf ogt, %38, %39 : vector<768x128xf32>
    %cst_9 = arith.constant 0.000000e+00 : f32
    %41 = vector.broadcast %cst_9 : f32 to vector<768x128xf32>
    %42 = arith.select %40, %16, %41 : vector<768x128xi1>, vector<768x128xf32>
    %43 = vector.shape_cast %42 : vector<768x128xf32> to vector<1x768x128xf32>
    %cst_10 = arith.constant dense<0.000000e+00> : vector<1xf32>
    %44 = vector.multi_reduction <add>, %43, %cst_10 [1, 2] : vector<1x768x128xf32> to vector<1xf32>
    %45 = vector.shape_cast %44 : vector<1xf32> to vector<1x1x1xf32>
    %46 = vector.extract %45[0, 0, 0] : f32 from vector<1x1x1xf32>
    %47 = vector.broadcast %46 : f32 to vector<1x1x128xf32>
    %c0_11 = arith.constant 0 : index
    %c0_12 = arith.constant 0 : index
    %c0_13 = arith.constant 0 : index
    %48 = vector.load %arg3[%c0_11, %c0_12, %c0_13] : memref<1x1x128xf32, #tpu.memory_space<vmem>>, vector<1x1x128xf32>
    tpu.vector_store %arg3[%c0_11, %c0_12, %c0_13], %47 {strides = array<i32>} : memref<1x1x128xf32, #tpu.memory_space<vmem>>, vector<1x1x128xf32>,
    return
  }
  func.func @transform_0(%arg0: i32) -> (i32, i32) {
    %c0_i32 = arith.constant 0 : i32
    %c0_i32_0 = arith.constant 0 : i32
    return %arg0, %c0_i32 : i32, i32
  }
  func.func @transform_1(%arg0: i32) -> (i32, i32) {
    %c0_i32 = arith.constant 0 : i32
    %c0_i32_0 = arith.constant 0 : i32
    return %arg0, %c0_i32 : i32, i32
  }
  func.func @transform_2(%arg0: i32) -> (i32, i32, i32) {
    %c0_i32 = arith.constant 0 : i32
    %c0_i32_0 = arith.constant 0 : i32
    %c0_i32_1 = arith.constant 0 : i32
    return %arg0, %c0_i32, %c0_i32_0 : i32, i32, i32
  }
}

</mosaic_0001>

<bundles_post_ra>
// kernel: tpu_custom_call.1
= control target key start
LH: loop header
LB: loop body
LE: loop exit
PB: predicated region body
PF: predicated region fallthrough
CT: control target
= control target key end

     0   :  { %7 = vsyncpa [#allocation3], 0  ;;  %s4970_s0 = inlined_call_operand.hbm [shape: f32[768,256], index: 0, kind: input, shape index: {}]   ;;  %s4971_s1 = inlined_call_operand.hbm [shape: f32[768,256], index: 1, kind: input, shape index: {}]   ;;  %s4972_s2 = inlined_call_operand.hbm [shape: f32[1,1,128], index: 2, kind: output, shape index: {}]  }
   0x1   :  { %8 = vsyncpa [#allocation6], 0 }
   0x2   :  { %9 = vsyncpa [#allocation4], 0  ;;  %s3142_s9 = smov [#allocation2]   ;;  %s3070_s13 = scalar_lea.hbm %s4970_s0, 24576 }
   0x3   :  { %s15_s10 = sshll.u32 %s3142_s9, 4  ;;  %p3071_p0 = scmp.ne.s32.totalorder %s4970_s0, %s3070_s13  ;;  %s16_s10 = int_to_ptr.vmem [resolvable:$true] %s15_s10 }
   0x4   :  { %p3074_p1 = scmp.lt.u32.totalorder %s3070_s13, %s4970_s0 }
   0x6   :  { %p3076_p2 = pnand %p3074_p1, %p3071_p0 }
   0x8   :  { %3079 = shalt.err (!%p3076_p2)
}
   0x9   :  { %s3080_s18 = scalar_lea.vmem %s16_s10, 24576  ;;  %p3085_p4 = scmp.lt.s32.totalorder %s16_s10, %s16_s10 }
   0xa   :  { %p3081_p3 = scmp.ne.s32.totalorder %s16_s10, %s3080_s18  ;;  %p3086_p5 = scmp.lt.s32.totalorder %s3080_s18, %s3080_s18 }
   0xc   :  { %p3087_p6 = por %p3086_p5, %p3085_p4 }
   0xe   :  { %p3088_p7 = pnand %p3087_p6, %p3081_p3 }
  0x10   :  { %3091 = shalt.err (!%p3088_p7)
}
  0x11   :  { %s3143_s19 = smov 256   ;;  %s3144_s20 = smov 16  }
  0x12   :  { %21 = dma.hbm_to_vmem [thread:$0]  %s4970_s0, 24576, %s16_s10, [#allocation3], %s3143_s19, %s3143_s19, %s3144_s20  }
  0x13   :  { %s3145_s23 = smov [#allocation5]   ;;  %s3092_s27 = scalar_lea.hbm %s4971_s1, 24576 }
  0x14   :  { %s27_s24 = sshll.u32 %s3145_s23, 4  ;;  %p3093_p8 = scmp.ne.s32.totalorder %s4971_s1, %s3092_s27  ;;  %s28_s24 = int_to_ptr.vmem [resolvable:$true] %s27_s24 }
  0x15   :  { %p3096_p9 = scmp.lt.u32.totalorder %s3092_s27, %s4971_s1 }
  0x17   :  { %p3098_p10 = pnand %p3096_p9, %p3093_p8 }
  0x19   :  { %3101 = shalt.err (!%p3098_p10)
}
  0x1a   :  { %s3102_s4 = scalar_lea.vmem %s28_s24, 24576  ;;  %p3107_p12 = scmp.lt.s32.totalorder %s28_s24, %s28_s24 }
  0x1b   :  { %p3103_p11 = scmp.ne.s32.totalorder %s28_s24, %s3102_s4  ;;  %p3108_p13 = scmp.lt.s32.totalorder %s3102_s4, %s3102_s4 }
  0x1d   :  { %p3109_p0 = por %p3108_p13, %p3107_p12 }
  0x1f   :  { %p3110_p1 = pnand %p3109_p0, %p3103_p11 }
  0x21   :  { %3113 = shalt.err (!%p3110_p1)
}
  0x22   :  { %33 = dma.hbm_to_vmem [thread:$0]  %s4971_s1, 24576, %s28_s24, [#allocation6], %s3143_s19, %s3143_s19, %s3144_s20  }
  0x23   :  { %3136 = dma.done.wait [#allocation3], 24576  }
  0x24   :  { %3137 = vsyncadd [#allocation3], 4294942720 }
  0x25   :  { %3138 = dma.done.wait [#allocation6], 24576  }
  0x26   :  { %3139 = vsyncadd [#allocation6], 4294942720  ;;  %v44_v0 = vld [vmem:[#allocation2 + $0x20] sm:$0xff]  ;;  %v46_v5 = vld [vmem:[#allocation2 + $0x30] sm:$0xff]  ;;  %s3146_s6 = smov 127   ;;  %v4973_v17 = vlaneseq  ;;  %s3148_s1 = smov [#allocation7]  }
  0x27   :  { %v236_v1 = vld [vmem:[#allocation5 + $0x20] sm:$0xff]  ;;  %v238_v6 = vld [vmem:[#allocation5 + $0x30] sm:$0xff]  ;;  %v41_v12 = vld [vmem:[#allocation2 + $0x8] sm:$0xff]  ;;  %s3051_s7 = sshll.u32 %s3148_s1, 4  ;;  %s3052_s7 = int_to_ptr.vmem [resolvable:$true] %s3051_s7 }
  0x28   :  { %v40_v2 = vld [vmem:[#allocation2] sm:$0xff]  ;;  %v3188_v3 = vsub.f32 %v44_v0, %v236_v1  ;;  %v42_v8 = vld [vmem:[#allocation2 + $0x10] sm:$0xff]  ;;  %v3194_v10 = vsub.f32 %v46_v5, %v238_v6  ;;  %v233_v13 = vld [vmem:[#allocation5 + $0x8] sm:$0xff]  ;;  %v3213_v24 = vand.u32 127, %v4973_v17  ;;  %s3114_s9 = scalar_lea.vmem %s3052_s7, 16  ;;  %s3118_s10 = scalar_lea.vmem %s3052_s7, 32 }
  0x29   :  { %v232_v4 = vld [vmem:[#allocation5] sm:$0xff]  ;;  %v234_v9 = vld [vmem:[#allocation5 + $0x10] sm:$0xff]  ;;  %v3202_v16 = vsub.f32 %v41_v12, %v233_v13  ;;  %v45_v19 = vld [vmem:[#allocation2 + $0x28] sm:$0xff]  ;;  %p3115_p2 = scmp.ne.s32.totalorder %s3052_s7, %s3114_s9  ;;  %p3119_p3 = scmp.lt.s32.totalorder %s3052_s7, %s3052_s7 }
  0x2a   :  { %5210 = vst [vmem:[#allocation11_spill] sm:$0xff] %v3188_v3  ;;  %v3190_v7 = vsub.f32 %v40_v2, %v232_v4  ;;  %620 = vrot.lane.b32.xlu1 %v3188_v3, %s3146_s6  ;;  %5211 = vst [vmem:[#allocation12_spill] sm:$0xff] %v3194_v10  ;;  %v3198_v11 = vsub.f32 %v42_v8, %v234_v9  ;;  %v48_v14 = vld [vmem:[#allocation2 + $0x40] sm:$0xff]  ;;  %v237_v20 = vld [vmem:[#allocation5 + $0x28] sm:$0xff]  ;;  %v2251_v26 = vadd.s32 128, %v3213_v24  ;;  %vm1002_vm0 = vcmp.lt.s32.totalorder %v3213_v24, 127  ;;  %p3120_p4 = scmp.lt.s32.totalorder %s3118_s10, %s3114_s9 }
  0x2b   :  { %v240_v15 = vld [vmem:[#allocation5 + $0x40] sm:$0xff]  ;;  %v43_v21 = vld [vmem:[#allocation2 + $0x18] sm:$0xff]  ;;  %v3210_v23 = vsub.f32 %v45_v19, %v237_v20  ;;  %v49_v27 = vld [vmem:[#allocation2 + $0x48] sm:$0xff] }
  0x2c   :  { %616 = vrot.lane.b32.xlu0 %v3190_v7, %s3146_s6  ;;  %5212 = vst [vmem:[#allocation13_spill] sm:$0xff] %v3198_v11  ;;  %v3206_v18 = vsub.f32 %v48_v14, %v240_v15  ;;  %v235_v22 = vld [vmem:[#allocation5 + $0x18] sm:$0xff]  ;;  %v241_v28 = vld [vmem:[#allocation5 + $0x48] sm:$0xff]  ;;  %v50_v35 = vld [vmem:[#allocation2 + $0x50] sm:$0xff]  ;;  %p3121_p5 = por %p3120_p4, %p3119_p3 }
  0x2d   :  { %5214 = vst [vmem:[#allocation15_spill] sm:$0xff] %v3210_v23  ;;  %v3217_v25 = vsub.f32 %v43_v21, %v235_v22  ;;  %v47_v29 = vld [vmem:[#allocation2 + $0x38] sm:$0xff]  ;;  %v3225_v31 = vsub.f32 %v49_v27, %v241_v28  ;;  %v242_v36 = vld [vmem:[#allocation5 + $0x50] sm:$0xff]  ;;  %v53_v39 = vld [vmem:[#allocation2 + $0x68] sm:$0xff] }
  0x2e   :  { %622 = vrot.lane.b32.xlu1 %v3194_v10, %s3146_s6  ;;  %5213 = vst [vmem:[#allocation14_spill] sm:$0xff] %v3206_v18  ;;  %v239_v30 = vld [vmem:[#allocation5 + $0x38] sm:$0xff]  ;;  %v3237_v38 = vsub.f32 %v50_v35, %v242_v36  ;;  %v245_v40 = vld [vmem:[#allocation5 + $0x68] sm:$0xff]  ;;  %v52_v41 = vld [vmem:[#allocation2 + $0x60] sm:$0xff]  ;;  %p3122_p6 = pnand %p3121_p5, %p3115_p2 }
  0x2f   :  { %5215 = vst [vmem:[#allocation16_spill] sm:$0xff] %v3217_v25  ;;  %5216 = vst [vmem:[#allocation17_spill] sm:$0xff] %v3225_v31  ;;  %v3229_v32 = vsub.f32 %v47_v29, %v239_v30  ;;  %v51_v33 = vld [vmem:[#allocation2 + $0x58] sm:$0xff]  ;;  %v244_v42 = vld [vmem:[#allocation5 + $0x60] sm:$0xff]  ;;  %v3241_v43 = vsub.f32 %v53_v39, %v245_v40 }
  0x30   :  { %618 = vrot.lane.b32.xlu0 %v3198_v11, %s3146_s6  ;;  %v243_v34 = vld [vmem:[#allocation5 + $0x58] sm:$0xff]  ;;  %5219 = vst [vmem:[#allocation20_spill] sm:$0xff] %v3237_v38  ;;  %v3245_v44 = vsub.f32 %v52_v41, %v244_v42  ;;  %v54_v47 = vld [vmem:[#allocation2 + $0x70] sm:$0xff]  ;;  %v57_v51 = vld [vmem:[#allocation2 + $0x88] sm:$0xff] }
  0x31   :  { %5217 = vst [vmem:[#allocation18_spill] sm:$0xff] %v3229_v32  ;;  %v3233_v37 = vsub.f32 %v51_v33, %v243_v34  ;;  %5220 = vst [vmem:[#allocation21_spill] sm:$0xff] %v3241_v43  ;;  %v55_v45 = vld [vmem:[#allocation2 + $0x78] sm:$0xff]  ;;  %v246_v48 = vld [vmem:[#allocation5 + $0x70] sm:$0xff] }
  0x32   :  { %808 = vrot.lane.b32.xlu1 %v3202_v16, %s3146_s6  ;;  %5221 = vst [vmem:[#allocation22_spill] sm:$0xff] %v3245_v44  ;;  %v247_v46 = vld [vmem:[#allocation5 + $0x78] sm:$0xff]  ;;  %v3253_v50 = vsub.f32 %v54_v47, %v246_v48  ;;  %v249_v52 = vld [vmem:[#allocation5 + $0x88] sm:$0xff]  ;;  %v56_v53 = vld [vmem:[#allocation2 + $0x80] sm:$0xff] }
  0x33   :  { %5218 = vst [vmem:[#allocation19_spill] sm:$0xff] %v3233_v37  ;;  %v3249_v49 = vsub.f32 %v55_v45, %v247_v46  ;;  %v248_v54 = vld [vmem:[#allocation5 + $0x80] sm:$0xff]  ;;  %v3257_v55 = vsub.f32 %v57_v51, %v249_v52  ;;  %v59_v57 = vld [vmem:[#allocation2 + $0x98] sm:$0xff]  ;;  %v58_v59 = vld [vmem:[#allocation2 + $0x90] sm:$0xff] }
  0x34   :  { %624 = vrot.lane.b32.xlu0 %v3206_v18, %s3146_s6  ;;  %5223 = vst [vmem:[#allocation24_spill] sm:$0xff] %v3253_v50  ;;  %v3261_v56 = vsub.f32 %v56_v53, %v248_v54  ;;  %v251_v58 = vld [vmem:[#allocation5 + $0x98] sm:$0xff]  ;;  %v250_v60 = vld [vmem:[#allocation5 + $0x90] sm:$0xff]  ;;  %v61_v63 = vld [vmem:[#allocation2 + $0xa8] sm:$0xff] }
  0x35   :  { %5222 = vst [vmem:[#allocation23_spill] sm:$0xff] %v3249_v49  ;;  %5224 = vst [vmem:[#allocation25_spill] sm:$0xff] %v3257_v55  ;;  %v3265_v61 = vsub.f32 %v59_v57, %v251_v58  ;;  %v3269_v62 = vsub.f32 %v58_v59, %v250_v60  ;;  %v253_v0 = vld [vmem:[#allocation5 + $0xa8] sm:$0xff]  ;;  %v60_v1 = vld [vmem:[#allocation2 + $0xa0] sm:$0xff] }
  0x36   :  { %812 = vrot.lane.b32.xlu1 %v3210_v23, %s3146_s6  ;;  %5225 = vst [vmem:[#allocation26_spill] sm:$0xff] %v3261_v56  ;;  %v252_v2 = vld [vmem:[#allocation5 + $0xa0] sm:$0xff]  ;;  %v3273_v4 = vsub.f32 %v61_v63, %v253_v0  ;;  %v63_v6 = vld [vmem:[#allocation2 + $0xb8] sm:$0xff]  ;;  %v62_v9 = vld [vmem:[#allocation2 + $0xb0] sm:$0xff] }
  0x37   :  { %5226 = vst [vmem:[#allocation27_spill] sm:$0xff] %v3265_v61  ;;  %5227 = vst [vmem:[#allocation28_spill] sm:$0xff] %v3269_v62  ;;  %v3277_v5 = vsub.f32 %v60_v1, %v252_v2  ;;  %v255_v8 = vld [vmem:[#allocation5 + $0xb8] sm:$0xff]  ;;  %v254_v12 = vld [vmem:[#allocation5 + $0xb0] sm:$0xff] }
  0x38   :  { %810 = vrot.lane.b32.xlu0 %v3217_v25, %s3146_s6  ;;  %5228 = vst [vmem:[#allocation29_spill] sm:$0xff] %v3273_v4  ;;  %v3281_v13 = vsub.f32 %v63_v6, %v255_v8  ;;  %v3285_v14 = vsub.f32 %v62_v9, %v254_v12  ;;  %v65_v15 = vld [vmem:[#allocation2 + $0xc8] sm:$0xff]  ;;  %v64_v20 = vld [vmem:[#allocation2 + $0xc0] sm:$0xff]  ;;  %v67_v27 = vld [vmem:[#allocation2 + $0xd8] sm:$0xff] }
  0x39   :  { %5229 = vst [vmem:[#allocation30_spill] sm:$0xff] %v3277_v5  ;;  %v257_v19 = vld [vmem:[#allocation5 + $0xc8] sm:$0xff]  ;;  %v256_v21 = vld [vmem:[#allocation5 + $0xc0] sm:$0xff]  ;;  %v259_v28 = vld [vmem:[#allocation5 + $0xd8] sm:$0xff] }
  0x3a   :  { %2254 = vrot.lane.b32.xlu1 %v2251_v26, %s3146_s6  ;;  %5230 = vst [vmem:[#allocation31_spill] sm:$0xff] %v3281_v13  ;;  %5231 = vst [vmem:[#allocation32_spill] sm:$0xff] %v3285_v14  ;;  %v3289_v22 = vsub.f32 %v65_v15, %v257_v19  ;;  %v3293_v26 = vsub.f32 %v64_v20, %v256_v21  ;;  %v66_v29 = vld [vmem:[#allocation2 + $0xd0] sm:$0xff]  ;;  %v3297_v33 = vsub.f32 %v67_v27, %v259_v28  ;;  %v69_v35 = vld [vmem:[#allocation2 + $0xe8] sm:$0xff] }
  0x3b   :  { %v258_v30 = vld [vmem:[#allocation5 + $0xd0] sm:$0xff]  ;;  %v261_v36 = vld [vmem:[#allocation5 + $0xe8] sm:$0xff]  ;;  %v68_v39 = vld [vmem:[#allocation2 + $0xe0] sm:$0xff] }
  0x3c   :  { %2252 = vrot.lane.b32.xlu0 %v3213_v24, %s3146_s6  ;;  %5232 = vst [vmem:[#allocation33_spill] sm:$0xff] %v3289_v22  ;;  %5233 = vst [vmem:[#allocation34_spill] sm:$0xff] %v3293_v26  ;;  %v3301_v34 = vsub.f32 %v66_v29, %v258_v30  ;;  %v260_v40 = vld [vmem:[#allocation5 + $0xe0] sm:$0xff]  ;;  %v3305_v41 = vsub.f32 %v69_v35, %v261_v36  ;;  %v71_v45 = vld [vmem:[#allocation2 + $0xf8] sm:$0xff] }
  0x3d   :  { %5234 = vst [vmem:[#allocation35_spill] sm:$0xff] %v3297_v33  ;;  %v3309_v42 = vsub.f32 %v68_v39, %v260_v40  ;;  %v263_v46 = vld [vmem:[#allocation5 + $0xf8] sm:$0xff]  ;;  %v70_v47 = vld [vmem:[#allocation2 + $0xf0] sm:$0xff]  ;;  %v73_v53 = vld [vmem:[#allocation2 + $0x108] sm:$0xff] }
  0x3e   :  { %816 = vrot.lane.b32.xlu1 %v3225_v31, %s3146_s6  ;;  %5235 = vst [vmem:[#allocation36_spill] sm:$0xff] %v3301_v34  ;;  %5236 = vst [vmem:[#allocation37_spill] sm:$0xff] %v3305_v41  ;;  %v262_v48 = vld [vmem:[#allocation5 + $0xf0] sm:$0xff]  ;;  %v3313_v51 = vsub.f32 %v71_v45, %v263_v46  ;;  %v265_v54 = vld [vmem:[#allocation5 + $0x108] sm:$0xff] }
  0x3f   :  { %5237 = vst [vmem:[#allocation38_spill] sm:$0xff] %v3309_v42  ;;  %v3317_v52 = vsub.f32 %v70_v47, %v262_v48  ;;  %v72_v57 = vld [vmem:[#allocation2 + $0x100] sm:$0xff]  ;;  %v3321_v59 = vsub.f32 %v73_v53, %v265_v54  ;;  %v75_v63 = vld [vmem:[#allocation2 + $0x118] sm:$0xff]  ;;  %v74_v1 = vld [vmem:[#allocation2 + $0x110] sm:$0xff] }
  0x40   :  { %814 = vrot.lane.b32.xlu0 %v3229_v32, %s3146_s6  ;;  %5238 = vst [vmem:[#allocation39_spill] sm:$0xff] %v3313_v51  ;;  %v264_v58 = vld [vmem:[#allocation5 + $0x100] sm:$0xff]  ;;  %v267_v0 = vld [vmem:[#allocation5 + $0x118] sm:$0xff]  ;;  %v266_v2 = vld [vmem:[#allocation5 + $0x110] sm:$0xff] }
  0x41   :  { %5239 = vst [vmem:[#allocation40_spill] sm:$0xff] %v3317_v52  ;;  %5240 = vst [vmem:[#allocation41_spill] sm:$0xff] %v3321_v59  ;;  %v3325_v60 = vsub.f32 %v72_v57, %v264_v58  ;;  %v3329_v6 = vsub.f32 %v75_v63, %v267_v0  ;;  %v3333_v8 = vsub.f32 %v74_v1, %v266_v2  ;;  %v77_v9 = vld [vmem:[#allocation2 + $0x128] sm:$0xff]  ;;  %v76_v15 = vld [vmem:[#allocation2 + $0x120] sm:$0xff] }
  0x42   :  { %818 = vrot.lane.b32.xlu1 %v3233_v37, %s3146_s6  ;;  %v269_v12 = vld [vmem:[#allocation5 + $0x128] sm:$0xff]  ;;  %v268_v19 = vld [vmem:[#allocation5 + $0x120] sm:$0xff]  ;;  %v79_v27 = vld [vmem:[#allocation2 + $0x138] sm:$0xff] }
  0x43   :  { %5241 = vst [vmem:[#allocation42_spill] sm:$0xff] %v3325_v60  ;;  %5242 = vst [vmem:[#allocation43_spill] sm:$0xff] %v3329_v6  ;;  %v3337_v20 = vsub.f32 %v77_v9, %v269_v12  ;;  %v3341_v21 = vsub.f32 %v76_v15, %v268_v19  ;;  %v271_v28 = vld [vmem:[#allocation5 + $0x138] sm:$0xff]  ;;  %v78_v29 = vld [vmem:[#allocation2 + $0x130] sm:$0xff] }
  0x44   :  { %626 = vrot.lane.b32.xlu0 %v3237_v38, %s3146_s6  ;;  %5243 = vst [vmem:[#allocation44_spill] sm:$0xff] %v3333_v8  ;;  %v270_v30 = vld [vmem:[#allocation5 + $0x130] sm:$0xff]  ;;  %v3345_v35 = vsub.f32 %v79_v27, %v271_v28  ;;  %v81_v39 = vld [vmem:[#allocation2 + $0x148] sm:$0xff]  ;;  %v80_v45 = vld [vmem:[#allocation2 + $0x140] sm:$0xff] }
  0x45   :  { %5244 = vst [vmem:[#allocation45_spill] sm:$0xff] %v3337_v20  ;;  %5245 = vst [vmem:[#allocation46_spill] sm:$0xff] %v3341_v21  ;;  %v3349_v36 = vsub.f32 %v78_v29, %v270_v30  ;;  %v273_v40 = vld [vmem:[#allocation5 + $0x148] sm:$0xff]  ;;  %v272_v46 = vld [vmem:[#allocation5 + $0x140] sm:$0xff] }
  0x46   :  { %820 = vrot.lane.b32.xlu1 %v3241_v43, %s3146_s6  ;;  %5246 = vst [vmem:[#allocation47_spill] sm:$0xff] %v3345_v35  ;;  %v3353_v47 = vsub.f32 %v81_v39, %v273_v40  ;;  %v3357_v48 = vsub.f32 %v80_v45, %v272_v46  ;;  %v83_v53 = vld [vmem:[#allocation2 + $0x158] sm:$0xff]  ;;  %v82_v57 = vld [vmem:[#allocation2 + $0x150] sm:$0xff]  ;;  %v85_v1 = vld [vmem:[#allocation2 + $0x168] sm:$0xff] }
  0x47   :  { %5247 = vst [vmem:[#allocation48_spill] sm:$0xff] %v3349_v36  ;;  %v275_v54 = vld [vmem:[#allocation5 + $0x158] sm:$0xff]  ;;  %v274_v58 = vld [vmem:[#allocation5 + $0x150] sm:$0xff]  ;;  %v277_v2 = vld [vmem:[#allocation5 + $0x168] sm:$0xff] }
  0x48   :  { %628 = vrot.lane.b32.xlu0 %v3245_v44, %s3146_s6  ;;  %5248 = vst [vmem:[#allocation49_spill] sm:$0xff] %v3353_v47  ;;  %5249 = vst [vmem:[#allocation50_spill] sm:$0xff] %v3357_v48  ;;  %v3361_v63 = vsub.f32 %v83_v53, %v275_v54  ;;  %v3365_v0 = vsub.f32 %v82_v57, %v274_v58  ;;  %v84_v9 = vld [vmem:[#allocation2 + $0x160] sm:$0xff]  ;;  %v3369_v15 = vsub.f32 %v85_v1, %v277_v2  ;;  %v87_v27 = vld [vmem:[#allocation2 + $0x178] sm:$0xff] }
  0x49   :  { %v276_v12 = vld [vmem:[#allocation5 + $0x160] sm:$0xff]  ;;  %v279_v28 = vld [vmem:[#allocation5 + $0x178] sm:$0xff]  ;;  %v86_v29 = vld [vmem:[#allocation2 + $0x170] sm:$0xff] }
  0x4a   :  { %822 = vrot.lane.b32.xlu1 %v3249_v49, %s3146_s6  ;;  %5250 = vst [vmem:[#allocation51_spill] sm:$0xff] %v3361_v63  ;;  %5251 = vst [vmem:[#allocation52_spill] sm:$0xff] %v3365_v0  ;;  %v3373_v19 = vsub.f32 %v84_v9, %v276_v12  ;;  %v278_v30 = vld [vmem:[#allocation5 + $0x170] sm:$0xff]  ;;  %v3377_v39 = vsub.f32 %v87_v27, %v279_v28  ;;  %v89_v45 = vld [vmem:[#allocation2 + $0x188] sm:$0xff] }
  0x4b   :  { %5252 = vst [vmem:[#allocation53_spill] sm:$0xff] %v3369_v15  ;;  %v3381_v40 = vsub.f32 %v86_v29, %v278_v30  ;;  %v281_v46 = vld [vmem:[#allocation5 + $0x188] sm:$0xff]  ;;  %v88_v53 = vld [vmem:[#allocation2 + $0x180] sm:$0xff]  ;;  %v91_v1 = vld [vmem:[#allocation2 + $0x198] sm:$0xff] }
  0x4c   :  { %630 = vrot.lane.b32.xlu0 %v3253_v50, %s3146_s6  ;;  %5253 = vst [vmem:[#allocation54_spill] sm:$0xff] %v3373_v19  ;;  %5254 = vst [vmem:[#allocation55_spill] sm:$0xff] %v3377_v39  ;;  %v280_v54 = vld [vmem:[#allocation5 + $0x180] sm:$0xff]  ;;  %v3385_v57 = vsub.f32 %v89_v45, %v281_v46  ;;  %v283_v2 = vld [vmem:[#allocation5 + $0x198] sm:$0xff] }
  0x4d   :  { %5255 = vst [vmem:[#allocation56_spill] sm:$0xff] %v3381_v40  ;;  %v3389_v58 = vsub.f32 %v88_v53, %v280_v54  ;;  %v90_v9 = vld [vmem:[#allocation2 + $0x190] sm:$0xff]  ;;  %v3393_v27 = vsub.f32 %v91_v1, %v283_v2  ;;  %v93_v28 = vld [vmem:[#allocation2 + $0x1a8] sm:$0xff]  ;;  %v92_v45 = vld [vmem:[#allocation2 + $0x1a0] sm:$0xff] }
  0x4e   :  { %824 = vrot.lane.b32.xlu1 %v3257_v55, %s3146_s6  ;;  %5256 = vst [vmem:[#allocation57_spill] sm:$0xff] %v3385_v57  ;;  %v282_v12 = vld [vmem:[#allocation5 + $0x190] sm:$0xff]  ;;  %v285_v30 = vld [vmem:[#allocation5 + $0x1a8] sm:$0xff]  ;;  %v284_v46 = vld [vmem:[#allocation5 + $0x1a0] sm:$0xff] }
  0x4f   :  { %5257 = vst [vmem:[#allocation58_spill] sm:$0xff] %v3389_v58  ;;  %5258 = vst [vmem:[#allocation59_spill] sm:$0xff] %v3393_v27  ;;  %v3397_v29 = vsub.f32 %v90_v9, %v282_v12  ;;  %v95_v53 = vld [vmem:[#allocation2 + $0x1b8] sm:$0xff]  ;;  %v94_v17 = vld [vmem:[#allocation2 + $0x1b0] sm:$0xff]  ;;  %v3404_v9 = vsub.f32 %v93_v28, %v285_v30 }
  0x50   :  { %632 = vrot.lane.b32.xlu0 %v3261_v56, %s3146_s6  ;;  %v287_v54 = vld [vmem:[#allocation5 + $0x1b8] sm:$0xff]  ;;  %v98_v2 = vld [vmem:[#allocation2 + $0x1d0] sm:$0xff]  ;;  %v101_v12 = vld [vmem:[#allocation2 + $0x1e8] sm:$0xff] }
  0x51   :  { %5259 = vst [vmem:[#allocation60_spill] sm:$0xff] %v3397_v29  ;;  %v291_v1 = vld [vmem:[#allocation5 + $0x1d8] sm:$0xff]  ;;  %5262 = vst [vmem:[#allocation62_spill] sm:$0xff] %v3404_v9  ;;  %v106_v30 = vld [vmem:[#allocation2 + $0x210] sm:$0xff] }
  0x52   :  { %826 = vrot.lane.b32.xlu1 %v3265_v61, %s3146_s6  ;;  %v299_v28 = vld [vmem:[#allocation5 + $0x218] sm:$0xff]  ;;  %v113_v61 = vld [vmem:[#allocation2 + $0x248] sm:$0xff]  ;;  %v112_v55 = vld [vmem:[#allocation2 + $0x240] sm:$0xff] }
  0x53   :  { %v304_v56 = vld [vmem:[#allocation5 + $0x240] sm:$0xff]  ;;  %v115_v49 = vld [vmem:[#allocation2 + $0x258] sm:$0xff]  ;;  %v114_v50 = vld [vmem:[#allocation2 + $0x250] sm:$0xff] }
  0x54   :  { %634 = vrot.lane.b32.xlu0 %v3269_v62, %s3146_s6  ;;  %v305_v62 = vld [vmem:[#allocation5 + $0x248] sm:$0xff]  ;;  %v306_v43 = vld [vmem:[#allocation5 + $0x250] sm:$0xff]  ;;  %v308_v38 = vld [vmem:[#allocation5 + $0x260] sm:$0xff] }
  0x55   :  { %v119_v32 = vld [vmem:[#allocation2 + $0x278] sm:$0xff]  ;;  %v118_v31 = vld [vmem:[#allocation2 + $0x270] sm:$0xff] }
  0x56   :  { %828 = vrot.lane.b32.xlu1 %v3273_v4, %s3146_s6  ;;  %v110_v4 = vld [vmem:[#allocation2 + $0x230] sm:$0xff]  ;;  %v311_v10 = vld [vmem:[#allocation5 + $0x278] sm:$0xff] }
  0x57   :  { %v310_v18 = vld [vmem:[#allocation5 + $0x270] sm:$0xff] }
  0x58   :  { %636 = vrot.lane.b32.xlu0 %v3277_v5, %s3146_s6  ;;  %v116_v5 = vld [vmem:[#allocation2 + $0x260] sm:$0xff]  ;;  %v122_v25 = vld [vmem:[#allocation2 + $0x290] sm:$0xff] }
  0x59   :  { %v314_v11 = vld [vmem:[#allocation5 + $0x290] sm:$0xff] }
  0x5a   :  { %830 = vrot.lane.b32.xlu1 %v3281_v13, %s3146_s6  ;;  %v111_v13 = vld [vmem:[#allocation2 + $0x238] sm:$0xff] }
  0x5c   :  { %638 = vrot.lane.b32.xlu0 %v3285_v14, %s3146_s6  ;;  %v303_v14 = vld [vmem:[#allocation5 + $0x238] sm:$0xff] }
  0x5e   :  { %832 = vrot.lane.b32.xlu1 %v3289_v22, %s3146_s6  ;;  %v108_v22 = vld [vmem:[#allocation2 + $0x220] sm:$0xff] }
  0x60   :  { %640 = vrot.lane.b32.xlu0 %v3293_v26, %s3146_s6  ;;  %v300_v26 = vld [vmem:[#allocation5 + $0x220] sm:$0xff] }
  0x62   :  { %834 = vrot.lane.b32.xlu1 %v3297_v33, %s3146_s6  ;;  %v109_v33 = vld [vmem:[#allocation2 + $0x228] sm:$0xff] }
  0x64   :  { %642 = vrot.lane.b32.xlu0 %v3301_v34, %s3146_s6  ;;  %v301_v34 = vld [vmem:[#allocation5 + $0x228] sm:$0xff] }
  0x66   :  { %836 = vrot.lane.b32.xlu1 %v3305_v41, %s3146_s6  ;;  %v298_v41 = vld [vmem:[#allocation5 + $0x210] sm:$0xff] }
  0x68   :  { %644 = vrot.lane.b32.xlu0 %v3309_v42, %s3146_s6  ;;  %v307_v42 = vld [vmem:[#allocation5 + $0x258] sm:$0xff] }
  0x6a   :  { %838 = vrot.lane.b32.xlu1 %v3313_v51, %s3146_s6  ;;  %v104_v51 = vld [vmem:[#allocation2 + $0x200] sm:$0xff] }
  0x6c   :  { %646 = vrot.lane.b32.xlu0 %v3317_v52, %s3146_s6  ;;  %v296_v52 = vld [vmem:[#allocation5 + $0x200] sm:$0xff] }
  0x6d   :  { %v3438_v3 = vsub.f32 %v104_v51, %v296_v52  ;;  %v129_v52 = vld [vmem:[#allocation2 + $0x2c8] sm:$0xff] }
  0x6e   :  { %840 = vrot.lane.b32.xlu1 %v3321_v59, %s3146_s6  ;;  %v3408_v59 = vsub.f32 %v92_v45, %v284_v46  ;;  %v3411_v45 = vsub.f32 %v95_v53, %v287_v54  ;;  %v309_v54 = vld [vmem:[#allocation5 + $0x268] sm:$0xff] }
  0x6f   :  { %5272 = vst [vmem:[#allocation72_spill] sm:$0xff] %v3438_v3 }
  0x70   :  { %648 = vrot.lane.b32.xlu0 %v3325_v60, %s3146_s6  ;;  %5263 = vst [vmem:[#allocation63_spill] sm:$0xff] %v3408_v59  ;;  %v297_v60 = vld [vmem:[#allocation5 + $0x208] sm:$0xff]  ;;  %5264 = vst [vmem:[#allocation64_spill] sm:$0xff] %v3411_v45 }
  0x72   :  { %842 = vrot.lane.b32.xlu1 %v3329_v6, %s3146_s6  ;;  %v102_v6 = vld [vmem:[#allocation2 + $0x1f0] sm:$0xff] }
  0x74   :  { %650 = vrot.lane.b32.xlu0 %v3333_v8, %s3146_s6  ;;  %v294_v8 = vld [vmem:[#allocation5 + $0x1f0] sm:$0xff] }
  0x76   :  { %844 = vrot.lane.b32.xlu1 %v3337_v20, %s3146_s6  ;;  %v103_v20 = vld [vmem:[#allocation2 + $0x1f8] sm:$0xff] }
  0x78   :  { %652 = vrot.lane.b32.xlu0 %v3341_v21, %s3146_s6  ;;  %v295_v21 = vld [vmem:[#allocation5 + $0x1f8] sm:$0xff] }
  0x7a   :  { %846 = vrot.lane.b32.xlu1 %v3345_v35, %s3146_s6  ;;  %v100_v35 = vld [vmem:[#allocation2 + $0x1e0] sm:$0xff] }
  0x7c   :  { %654 = vrot.lane.b32.xlu0 %v3349_v36, %s3146_s6  ;;  %v292_v36 = vld [vmem:[#allocation5 + $0x1e0] sm:$0xff] }
  0x7e   :  { %848 = vrot.lane.b32.xlu1 %v3353_v47, %s3146_s6  ;;  %v5260_v47 = vlaneseq }
  0x80   :  { %656 = vrot.lane.b32.xlu0 %v3357_v48, %s3146_s6  ;;  %v3400_v48 = vshrl.u32 %v5260_v47, 7  ;;  %v105_v47 = vld [vmem:[#allocation2 + $0x208] sm:$0xff] }
  0x81   :  { %v3436_v23 = vsub.f32 %v105_v47, %v297_v60  ;;  %v3448_v60 = vsub.f32 %v111_v13, %v303_v14  ;;  %v320_v47 = vld [vmem:[#allocation5 + $0x2c0] sm:$0xff]  ;;  %v3459_v13 = vsub.f32 %v115_v49, %v307_v42  ;;  %v133_v14 = vld [vmem:[#allocation2 + $0x2e8] sm:$0xff]  ;;  %v3471_v49 = vsub.f32 %v118_v31, %v310_v18  ;;  %v139_v42 = vld [vmem:[#allocation2 + $0x318] sm:$0xff] }
  0x82   :  { %850 = vrot.lane.b32.xlu1 %v3361_v63, %s3146_s6  ;;  %v288_v63 = vld [vmem:[#allocation5 + $0x1c0] sm:$0xff]  ;;  %5261 = vst [vmem:[#allocation61_spill] sm:$0xff] %v3400_v48  ;;  %v315_v48 = vld [vmem:[#allocation5 + $0x298] sm:$0xff]  ;;  %v141_v18 = vld [vmem:[#allocation2 + $0x328] sm:$0xff] }
  0x83   :  { %5271 = vst [vmem:[#allocation71_spill] sm:$0xff] %v3436_v23  ;;  %5277 = vst [vmem:[#allocation77_spill] sm:$0xff] %v3448_v60  ;;  %v327_v60 = vld [vmem:[#allocation5 + $0x2f8] sm:$0xff]  ;;  %v333_v31 = vld [vmem:[#allocation5 + $0x328] sm:$0xff] }
  0x84   :  { %658 = vrot.lane.b32.xlu0 %v3365_v0, %s3146_s6  ;;  %v290_v0 = vld [vmem:[#allocation5 + $0x1d0] sm:$0xff]  ;;  %5281 = vst [vmem:[#allocation81_spill] sm:$0xff] %v3459_v13  ;;  %5286 = vst [vmem:[#allocation86_spill] sm:$0xff] %v3471_v49 }
  0x85   :  { %v138_v13 = vld [vmem:[#allocation2 + $0x310] sm:$0xff] }
  0x86   :  { %852 = vrot.lane.b32.xlu1 %v3369_v15, %s3146_s6  ;;  %v289_v15 = vld [vmem:[#allocation5 + $0x1c8] sm:$0xff]  ;;  %v142_v49 = vld [vmem:[#allocation2 + $0x330] sm:$0xff] }
  0x88   :  { %660 = vrot.lane.b32.xlu0 %v3373_v19, %s3146_s6  ;;  %v96_v19 = vld [vmem:[#allocation2 + $0x1c0] sm:$0xff] }
  0x89   :  { %v3420_v37 = vsub.f32 %v96_v19, %v288_v63  ;;  %v3432_v63 = vsub.f32 %v103_v20, %v295_v21  ;;  %v3434_v19 = vsub.f32 %v102_v6, %v294_v8  ;;  %v125_v20 = vld [vmem:[#allocation2 + $0x2a8] sm:$0xff]  ;;  %v124_v6 = vld [vmem:[#allocation2 + $0x2a0] sm:$0xff] }
  0x8a   :  { %854 = vrot.lane.b32.xlu1 %v3377_v39, %s3146_s6  ;;  %v286_v39 = vld [vmem:[#allocation5 + $0x1b0] sm:$0xff]  ;;  %v317_v21 = vld [vmem:[#allocation5 + $0x2a8] sm:$0xff]  ;;  %v316_v8 = vld [vmem:[#allocation5 + $0x2a0] sm:$0xff] }
  0x8b   :  { %v3413_v46 = vsub.f32 %v94_v17, %v286_v39  ;;  %5267 = vst [vmem:[#allocation67_spill] sm:$0xff] %v3420_v37  ;;  %v3424_v17 = vsub.f32 %v98_v2, %v290_v0  ;;  %v117_v39 = vld [vmem:[#allocation2 + $0x268] sm:$0xff]  ;;  %5269 = vst [vmem:[#allocation69_spill] sm:$0xff] %v3432_v63  ;;  %v123_v2 = vld [vmem:[#allocation2 + $0x298] sm:$0xff]  ;;  %v3444_v63 = vsub.f32 %v109_v33, %v301_v34 }
  0x8c   :  { %662 = vrot.lane.b32.xlu0 %v3381_v40, %s3146_s6  ;;  %v97_v40 = vld [vmem:[#allocation2 + $0x1c8] sm:$0xff]  ;;  %5270 = vst [vmem:[#allocation70_spill] sm:$0xff] %v3434_v19  ;;  %v318_v19 = vld [vmem:[#allocation5 + $0x2b0] sm:$0xff]  ;;  %v3455_v33 = vsub.f32 %v113_v61, %v305_v62  ;;  %v132_v34 = vld [vmem:[#allocation2 + $0x2e0] sm:$0xff]  ;;  %v3467_v61 = vsub.f32 %v116_v5, %v308_v38  ;;  %v3479_v38 = vsub.f32 %v123_v2, %v315_v48 }
  0x8d   :  { %5265 = vst [vmem:[#allocation65_spill] sm:$0xff] %v3413_v46  ;;  %v3418_v44 = vsub.f32 %v97_v40, %v289_v15  ;;  %v3430_v15 = vsub.f32 %v100_v35, %v292_v36  ;;  %v121_v0 = vld [vmem:[#allocation2 + $0x288] sm:$0xff]  ;;  %v3442_v35 = vsub.f32 %v106_v30, %v298_v41  ;;  %v127_v36 = vld [vmem:[#allocation2 + $0x2b8] sm:$0xff]  ;;  %5275 = vst [vmem:[#allocation75_spill] sm:$0xff] %v3444_v63 }
  0x8e   :  { %856 = vrot.lane.b32.xlu1 %v3385_v57, %s3146_s6  ;;  %v99_v57 = vld [vmem:[#allocation2 + $0x1d8] sm:$0xff]  ;;  %v313_v40 = vld [vmem:[#allocation5 + $0x288] sm:$0xff]  ;;  %v128_v41 = vld [vmem:[#allocation2 + $0x2c0] sm:$0xff]  ;;  %5279 = vst [vmem:[#allocation79_spill] sm:$0xff] %v3455_v33 }
  0x8f   :  { %5266 = vst [vmem:[#allocation66_spill] sm:$0xff] %v3418_v44  ;;  %v3422_v53 = vsub.f32 %v99_v57, %v291_v1  ;;  %5268 = vst [vmem:[#allocation68_spill] sm:$0xff] %v3430_v15  ;;  %v120_v57 = vld [vmem:[#allocation2 + $0x280] sm:$0xff]  ;;  %v3446_v15 = vsub.f32 %v108_v22, %v300_v26  ;;  %v323_v30 = vld [vmem:[#allocation5 + $0x2d8] sm:$0xff]  ;;  %v3457_v22 = vsub.f32 %v112_v55, %v304_v56 }
  0x90   :  { %664 = vrot.lane.b32.xlu0 %v3389_v58, %s3146_s6  ;;  %v293_v58 = vld [vmem:[#allocation5 + $0x1e8] sm:$0xff]  ;;  %v312_v1 = vld [vmem:[#allocation5 + $0x280] sm:$0xff]  ;;  %5274 = vst [vmem:[#allocation74_spill] sm:$0xff] %v3442_v35  ;;  %v130_v35 = vld [vmem:[#allocation2 + $0x2d0] sm:$0xff]  ;;  %v3469_v55 = vsub.f32 %v119_v32, %v311_v10  ;;  %v3475_v3 = vsub.f32 %v121_v0, %v313_v40  ;;  %v3481_v10 = vsub.f32 %v122_v25, %v314_v11 }
  0x91   :  { %5276 = vst [vmem:[#allocation76_spill] sm:$0xff] %v3446_v15  ;;  %5280 = vst [vmem:[#allocation80_spill] sm:$0xff] %v3457_v22  ;;  %v325_v26 = vld [vmem:[#allocation5 + $0x2e8] sm:$0xff]  ;;  %v134_v15 = vld [vmem:[#allocation2 + $0x2f0] sm:$0xff]  ;;  %v3487_v0 = vsub.f32 %v124_v6, %v316_v8 }
  0x92   :  { %858 = vrot.lane.b32.xlu1 %v3393_v27, %s3146_s6  ;;  %v107_v27 = vld [vmem:[#allocation2 + $0x218] sm:$0xff]  ;;  %v326_v63 = vld [vmem:[#allocation5 + $0x2f0] sm:$0xff]  ;;  %5284 = vst [vmem:[#allocation84_spill] sm:$0xff] %v3467_v61  ;;  %5285 = vst [vmem:[#allocation85_spill] sm:$0xff] %v3469_v55 }
  0x93   :  { %v136_v56 = vld [vmem:[#allocation2 + $0x300] sm:$0xff]  ;;  %v330_v22 = vld [vmem:[#allocation5 + $0x310] sm:$0xff]  ;;  %5287 = vst [vmem:[#allocation87_spill] sm:$0xff] %v3475_v3  ;;  %5289 = vst [vmem:[#allocation89_spill] sm:$0xff] %v3479_v38 }
  0x94   :  { %666 = vrot.lane.b32.xlu0 %v3397_v29, %s3146_s6  ;;  %v302_v29 = vld [vmem:[#allocation5 + $0x230] sm:$0xff]  ;;  %v328_v62 = vld [vmem:[#allocation5 + $0x300] sm:$0xff]  ;;  %5290 = vst [vmem:[#allocation90_spill] sm:$0xff] %v3481_v10  ;;  %5292 = vst [vmem:[#allocation92_spill] sm:$0xff] %v3487_v0 }
  0x95   :  { %v3450_v51 = vsub.f32 %v110_v4, %v302_v29  ;;  %v3461_v4 = vsub.f32 %v114_v50, %v306_v43  ;;  %v324_v29 = vld [vmem:[#allocation5 + $0x2e0] sm:$0xff]  ;;  %v137_v43 = vld [vmem:[#allocation2 + $0x308] sm:$0xff]  ;;  %v334_v55 = vld [vmem:[#allocation5 + $0x330] sm:$0xff] }
  0x96   :  { %860 = vrot.lane.b32.xlu1 %v3404_v9, %s3146_s6  ;;  %v3428_v9 = vsub.f32 %v101_v12, %v293_v58  ;;  %v3440_v58 = vsub.f32 %v107_v27, %v299_v28  ;;  %v319_v12 = vld [vmem:[#allocation5 + $0x2b8] sm:$0xff]  ;;  %v321_v27 = vld [vmem:[#allocation5 + $0x2c8] sm:$0xff]  ;;  %v140_v32 = vld [vmem:[#allocation2 + $0x320] sm:$0xff] }
  0x97   :  { %5278 = vst [vmem:[#allocation78_spill] sm:$0xff] %v3450_v51  ;;  %v131_v28 = vld [vmem:[#allocation2 + $0x2d8] sm:$0xff]  ;;  %5282 = vst [vmem:[#allocation82_spill] sm:$0xff] %v3461_v4  ;;  %v329_v50 = vld [vmem:[#allocation5 + $0x308] sm:$0xff]  ;;  %v3489_v40 = vsub.f32 %v127_v36, %v319_v12  ;;  %v3495_v3 = vsub.f32 %v129_v52, %v321_v27  ;;  %v3507_v52 = vsub.f32 %v132_v34, %v324_v29 }
  0x98   :  { %668 = vrot.lane.b32.xlu0 %v3408_v59, %s3146_s6  ;;  %5273 = vst [vmem:[#allocation73_spill] sm:$0xff] %v3440_v58  ;;  %v126_v59 = vld [vmem:[#allocation2 + $0x2b0] sm:$0xff]  ;;  %v135_v51 = vld [vmem:[#allocation2 + $0x2f8] sm:$0xff]  ;;  %v332_v5 = vld [vmem:[#allocation5 + $0x320] sm:$0xff] }
  0x99   :  { %v322_v58 = vld [vmem:[#allocation5 + $0x2d0] sm:$0xff]  ;;  %v331_v4 = vld [vmem:[#allocation5 + $0x318] sm:$0xff]  ;;  %5293 = vst [vmem:[#allocation93_spill] sm:$0xff] %v3489_v40  ;;  %v3491_v48 = vsub.f32 %v126_v59, %v318_v19  ;;  %v145_v11 = vld [vmem:[#allocation2 + $0x348] sm:$0xff]  ;;  %v3509_v27 = vsub.f32 %v135_v51, %v327_v60  ;;  %v3527_v34 = vsub.f32 %v140_v32, %v332_v5 }
  0x9a   :  { %862 = vrot.lane.b32.xlu1 %v3411_v45, %s3146_s6  ;;  %v3465_v45 = vsub.f32 %v117_v39, %v309_v54  ;;  %v3477_v39 = vsub.f32 %v120_v57, %v312_v1  ;;  %v143_v54 = vld [vmem:[#allocation2 + $0x338] sm:$0xff]  ;;  %v337_v25 = vld [vmem:[#allocation5 + $0x348] sm:$0xff]  ;;  %v144_v57 = vld [vmem:[#allocation2 + $0x340] sm:$0xff]  ;;  %5295 = vst [vmem:[#allocation95_spill] sm:$0xff] %v3495_v3  ;;  %v3501_v6 = vsub.f32 %v130_v35, %v322_v58 }
  0x9b   :  { %5294 = vst [vmem:[#allocation94_spill] sm:$0xff] %v3491_v48  ;;  %v336_v1 = vld [vmem:[#allocation5 + $0x340] sm:$0xff]  ;;  %v147_v2 = vld [vmem:[#allocation2 + $0x358] sm:$0xff]  ;;  %v146_v38 = vld [vmem:[#allocation2 + $0x350] sm:$0xff] }
  0x9c   :  { %670 = vrot.lane.b32.xlu0 %v3413_v46, %s3146_s6  ;;  %5283 = vst [vmem:[#allocation83_spill] sm:$0xff] %v3465_v45  ;;  %v3473_v33 = vpop.permute.xlu1 %620  ;;  %5288 = vst [vmem:[#allocation88_spill] sm:$0xff] %v3477_v39  ;;  %v335_v46 = vld [vmem:[#allocation5 + $0x338] sm:$0xff]  ;;  %v3485_v45 = vsub.f32 %v125_v20, %v317_v21  ;;  %v338_v39 = vld [vmem:[#allocation5 + $0x350] sm:$0xff]  ;;  %v3497_v20 = vsub.f32 %v128_v41, %v320_v47  ;;  %v3499_v21 = vsub.f32 %v131_v28, %v323_v30 }
  0x9d   :  { %v339_v10 = vld [vmem:[#allocation5 + $0x358] sm:$0xff]  ;;  %5298 = vst [vmem:[#allocation98_spill] sm:$0xff] %v3501_v6  ;;  %v149_v59 = vld [vmem:[#allocation2 + $0x368] sm:$0xff]  ;;  %v148_v8 = vld [vmem:[#allocation2 + $0x360] sm:$0xff]  ;;  %v3511_v41 = vsub.f32 %v134_v15, %v326_v63  ;;  %v3525_v63 = vsub.f32 %v141_v18, %v333_v31  ;;  %v3529_v29 = vsub.f32 %v143_v54, %v335_v46 }
  0x9e   :  { %v3483_v61 = vpop.permute.xlu0 %616  ;;  %5291 = vst [vmem:[#allocation91_spill] sm:$0xff] %v3485_v45  ;;  %864 = vrot.lane.b32.xlu1 %v3418_v44, %s3146_s6  ;;  %5296 = vst [vmem:[#allocation96_spill] sm:$0xff] %v3497_v20  ;;  %v341_v19 = vld [vmem:[#allocation5 + $0x368] sm:$0xff]  ;;  %v340_v36 = vld [vmem:[#allocation5 + $0x360] sm:$0xff]  ;;  %v3505_v44 = vsub.f32 %v133_v14, %v325_v26  ;;  %v3517_v20 = vsub.f32 %v136_v56, %v328_v62  ;;  %v3521_v14 = vsub.f32 %v138_v13, %v330_v22 }
  0x9f   :  { %5297 = vst [vmem:[#allocation97_spill] sm:$0xff] %v3499_v21  ;;  %v151_v12 = vld [vmem:[#allocation2 + $0x378] sm:$0xff]  ;;  %v150_v40 = vld [vmem:[#allocation2 + $0x370] sm:$0xff]  ;;  %5299 = vst [vmem:[#allocation99_spill] sm:$0xff] %v3509_v27  ;;  %v3515_v21 = vsub.f32 %v137_v43, %v329_v50  ;;  %v3535_v22 = vsub.f32 %v145_v11, %v337_v25  ;;  %v3537_v13 = vsub.f32 %v144_v57, %v336_v1 }
  0xa0   :  { %v343_v48 = vld [vmem:[#allocation5 + $0x378] sm:$0xff]  ;;  %v342_v0 = vld [vmem:[#allocation5 + $0x370] sm:$0xff]  ;;  %672 = vrot.lane.b32.xlu0 %v3420_v37, %s3146_s6  ;;  %5300 = vst [vmem:[#allocation100_spill] sm:$0xff] %v3511_v41  ;;  %v153_v58 = vld [vmem:[#allocation2 + $0x388] sm:$0xff]  ;;  %v3513_v6 = vpop.permute.xlu1 %622  ;;  %v3519_v37 = vsub.f32 %v139_v42, %v331_v4  ;;  %v3531_v41 = vsub.f32 %v142_v49, %v334_v55  ;;  %v3539_v4 = vsub.f32 %v147_v2, %v339_v10 }
  0xa1   :  { %v345_v35 = vld [vmem:[#allocation5 + $0x388] sm:$0xff]  ;;  %v152_v47 = vld [vmem:[#allocation2 + $0x380] sm:$0xff]  ;;  %v155_v30 = vld [vmem:[#allocation2 + $0x398] sm:$0xff]  ;;  %5301 = vst [vmem:[#allocation101_spill] sm:$0xff] %v3515_v21  ;;  %v3541_v62 = vsub.f32 %v146_v38, %v338_v39  ;;  %v3545_v55 = vsub.f32 %v149_v59, %v341_v19  ;;  %v3547_v49 = vsub.f32 %v148_v8, %v340_v36  ;;  %v3549_v31 = vsub.f32 %v151_v12, %v343_v48 }
  0xa2   :  { %v344_v28 = vld [vmem:[#allocation5 + $0x380] sm:$0xff]  ;;  %5302 = vst [vmem:[#allocation102_spill] sm:$0xff] %v3519_v37  ;;  %v347_v26 = vld [vmem:[#allocation5 + $0x398] sm:$0xff]  ;;  %v154_v60 = vld [vmem:[#allocation2 + $0x390] sm:$0xff]  ;;  %v3523_v15 = vpop.permute.xlu0 %618  ;;  %866 = vrot.lane.b32.xlu1 %v3422_v53, %s3146_s6  ;;  %v3551_v32 = vsub.f32 %v150_v40, %v342_v0  ;;  %v3553_v39 = vsub.f32 %v153_v58, %v345_v35 }
  0xa3   :  { %v346_v51 = vld [vmem:[#allocation5 + $0x390] sm:$0xff]  ;;  %5303 = vst [vmem:[#allocation103_spill] sm:$0xff] %v3525_v63  ;;  %5304 = vst [vmem:[#allocation104_spill] sm:$0xff] %v3529_v29  ;;  %v157_v43 = vld [vmem:[#allocation2 + $0x3a8] sm:$0xff]  ;;  %v3555_v38 = vsub.f32 %v152_v47, %v344_v28  ;;  %v3557_v25 = vsub.f32 %v155_v30, %v347_v26 }
  0xa4   :  { %v349_v50 = vld [vmem:[#allocation5 + $0x3a8] sm:$0xff]  ;;  %v156_v56 = vld [vmem:[#allocation2 + $0x3a0] sm:$0xff]  ;;  %5305 = vst [vmem:[#allocation105_spill] sm:$0xff] %v3535_v22  ;;  %5306 = vst [vmem:[#allocation106_spill] sm:$0xff] %v3539_v4  ;;  %674 = vrot.lane.b32.xlu0 %v3424_v17, %s3146_s6  ;;  %v809_v11 = vpop.permute.xlu1 %808  ;;  %v3559_v57 = vsub.f32 %v154_v60, %v346_v51 }
  0xa5   :  { %v348_v42 = vld [vmem:[#allocation5 + $0x3a0] sm:$0xff]  ;;  %v159_v18 = vld [vmem:[#allocation2 + $0x3b8] sm:$0xff]  ;;  %5307 = vst [vmem:[#allocation107_spill] sm:$0xff] %v3545_v55  ;;  %5308 = vst [vmem:[#allocation108_spill] sm:$0xff] %v3549_v31  ;;  %v1003_v0 = vsel %vm1002_vm0, %v3483_v61, %v809_v11  ;;  %v1099_v40 = vsel %vm1002_vm0, %v809_v11, %v3483_v61  ;;  %v3569_v19 = vsub.f32 %v157_v43, %v349_v50 }
  0xa6   :  { %v351_v46 = vld [vmem:[#allocation5 + $0x3b8] sm:$0xff]  ;;  %v158_v5 = vld [vmem:[#allocation2 + $0x3b0] sm:$0xff]  ;;  %v161_v10 = vld [vmem:[#allocation2 + $0x3c8] sm:$0xff]  ;;  %5309 = vst [vmem:[#allocation109_spill] sm:$0xff] %v3553_v39  ;;  %v3567_v48 = vpop.permute.xlu0 %624  ;;  %v3571_v8 = vsub.f32 %v156_v56, %v348_v42  ;;  %v1195_v58 = vadd.f32 %v1003_v0, %v3190_v7  ;;  %v1196_v35 = vadd.f32 %v1099_v40, %v3202_v16  ;;  %v1387_v47 = vsub.f32 %v3190_v7, %v1003_v0 }
  0xa7   :  { %v350_v54 = vld [vmem:[#allocation5 + $0x3b0] sm:$0xff]  ;;  %5310 = vst [vmem:[#allocation110_spill] sm:$0xff] %v3557_v25  ;;  %v353_v1 = vld [vmem:[#allocation5 + $0x3c8] sm:$0xff]  ;;  %v160_v2 = vld [vmem:[#allocation2 + $0x3c0] sm:$0xff]  ;;  %v1388_v28 = vsub.f32 %v3202_v16, %v1099_v40  ;;  %868 = vrot.lane.b32.xlu1 %v3428_v9, %s3146_s6  ;;  %v3581_v60 = vsub.f32 %v159_v18, %v351_v46 }
  0xa8   :  { %v352_v59 = vld [vmem:[#allocation5 + $0x3c0] sm:$0xff]  ;;  %v163_v36 = vld [vmem:[#allocation2 + $0x3d8] sm:$0xff]  ;;  %v162_v61 = vld [vmem:[#allocation2 + $0x3d0] sm:$0xff]  ;;  %v3583_v51 = vsub.f32 %v158_v5, %v350_v54  ;;  %v3585_v43 = vsub.f32 %v161_v10, %v353_v1  ;;  %v1579_v56 = vand.u32 2147483647, %v1195_v58  ;;  %v813_v16 = vpop.permute.xlu1 %812 }
  0xa9   :  { %v355_v12 = vld [vmem:[#allocation5 + $0x3d8] sm:$0xff]  ;;  %v354_v30 = vld [vmem:[#allocation5 + $0x3d0] sm:$0xff]  ;;  %v3587_v50 = vsub.f32 %v160_v2, %v352_v59  ;;  %v1675_v7 = vand.u32 2147483647, %v1196_v35  ;;  %v1867_v42 = vand.u32 2147483647, %v1387_v47  ;;  %v1005_v40 = vsel %vm1002_vm0, %v3473_v33, %v813_v16 }
  0xaa   :  { %v5311_v26 = vld [vmem:[#allocation68_spill] sm:$0xff]  ;;  %5313 = vst [vmem:[#allocation111_spill] sm:$0xff] %v3585_v43  ;;  %v3589_v11 = vsub.f32 %v163_v36, %v355_v12  ;;  %v1963_v0 = vand.u32 2147483647, %v1388_v28  ;;  %v1101_v18 = vsel %vm1002_vm0, %v813_v16, %v3473_v33  ;;  %v811_v46 = vpop.permute.xlu0 %810  ;;  %v3597_v5 = vsub.f32 %v162_v61, %v354_v30  ;;  %v5317_v10 = vld [vmem:[#allocation11_spill] sm:$0xff]  ;;  %v5319_v12 = vld [vmem:[#allocation69_spill] sm:$0xff] }
  0xab   :  { %676 = vrot.lane.b32.xlu0 %v5311_v26, %s3146_s6  ;;  %5312 = vst [vmem:[#allocation68_spill] sm:$0xff] %v3581_v60  ;;  %5314 = vst [vmem:[#allocation112_spill] sm:$0xff] %v3587_v50  ;;  %v1771_v54 = vmax.f32.f32 %v1579_v56, %v1675_v7  ;;  %v1199_v1 = vadd.f32 %v1005_v40, %v5317_v10  ;;  %v5318_v2 = vld [vmem:[#allocation15_spill] sm:$0xff]  ;;  %v1391_v36 = vsub.f32 %v5317_v10, %v1005_v40  ;;  %v5320_v28 = vld [vmem:[#allocation70_spill] sm:$0xff] }
  0xac   :  { %5315 = vst [vmem:[#allocation113_spill] sm:$0xff] %v3589_v11  ;;  %5316 = vst [vmem:[#allocation114_spill] sm:$0xff] %v3597_v5  ;;  %v1200_v59 = vadd.f32 %v1101_v18, %v5318_v2  ;;  %870 = vrot.lane.b32.xlu1 %v5319_v12, %s3146_s6  ;;  %v2059_v58 = vmax.f32.f32 %v1867_v42, %v1963_v0  ;;  %v1392_v35 = vsub.f32 %v5318_v2, %v1101_v18  ;;  %v165_v61 = vld [vmem:[#allocation2 + $0x3e8] sm:$0xff]  ;;  %v5321_v16 = vld [vmem:[#allocation13_spill] sm:$0xff]  ;;  %v2255_v42 = vpop.permute.xlu1 %2254 }
  0xad   :  { %v1004_v33 = vsel %vm1002_vm0, %v3523_v15, %v811_v46  ;;  %v1100_v47 = vsel %vm1002_vm0, %v811_v46, %v3523_v15  ;;  %v1581_v30 = vand.u32 2147483647, %v1199_v1  ;;  %v1869_v7 = vand.u32 2147483647, %v1391_v36  ;;  %v5322_v10 = vld [vmem:[#allocation16_spill] sm:$0xff]  ;;  %v164_v50 = vld [vmem:[#allocation2 + $0x3e0] sm:$0xff] }
  0xae   :  { %v1677_v56 = vand.u32 2147483647, %v1200_v59  ;;  %v1197_v40 = vadd.f32 %v1004_v33, %v5321_v16  ;;  %v2155_v0 = vadd.f32 %v2059_v58, %v1771_v54  ;;  %v1965_v18 = vand.u32 2147483647, %v1392_v35  ;;  %v2253_v11 = vpop.permute.xlu0 %2252  ;;  %v357_v12 = vld [vmem:[#allocation5 + $0x3e8] sm:$0xff]  ;;  %v356_v15 = vld [vmem:[#allocation5 + $0x3e0] sm:$0xff] }
  0xaf   :  { %678 = vrot.lane.b32.xlu0 %v5320_v28, %s3146_s6  ;;  %v1198_v2 = vadd.f32 %v1100_v47, %v5322_v10  ;;  %v1389_v5 = vsub.f32 %v5321_v16, %v1004_v33  ;;  %v1390_v28 = vsub.f32 %v5322_v10, %v1100_v47  ;;  %v2256_v1 = vsel %vm1002_vm0, %v2253_v11, %v2255_v42  ;;  %v5324_v35 = vld [vmem:[#allocation72_spill] sm:$0xff]  ;;  %v5327_v10 = vld [vmem:[#allocation61_spill] sm:$0xff] }
  0xb0   :  { %v1773_v46 = vmax.f32.f32 %v1581_v30, %v1677_v56  ;;  %v1580_v43 = vand.u32 2147483647, %v1197_v40  ;;  %872 = vrot.lane.b32.xlu1 %v3436_v23, %s3146_s6  ;;  %v2061_v54 = vmax.f32.f32 %v1869_v7, %v1965_v18  ;;  %v5323_v58 = vxor.u32 1, %v3213_v24  ;;  %v817_v47 = vpop.permute.xlu1 %816 }
  0xb1   :  { %v1676_v59 = vand.u32 2147483647, %v1198_v2  ;;  %v1868_v36 = vand.u32 2147483647, %v1389_v5  ;;  %v1964_v33 = vand.u32 2147483647, %v1390_v28  ;;  %v3625_v16 = vsub.f32 %v165_v61, %v357_v12 }
  0xb2   :  { %vm2258_vm1 = vcmp.eq.s32.totalorder %v2256_v1, %v5323_v58  ;;  %v3147_v30 = vmov 0.0   ;;  %v3627_v40 = vsub.f32 %v164_v50, %v356_v15  ;;  %v2157_v11 = vadd.f32 %v2061_v54, %v1773_v46  ;;  %v815_v2 = vpop.permute.xlu0 %814  ;;  %v5329_v12 = vld [vmem:[#allocation14_spill] sm:$0xff]  ;;  %v5331_v15 = vld [vmem:[#allocation17_spill] sm:$0xff] }
  0xb3   :  { %680 = vrot.lane.b32.xlu0 %v5324_v35, %s3146_s6  ;;  %v2259_v56 = vsel %vm2258_vm1, 1.0, %v3147_v30  ;;  %5325 = vst [vmem:[#allocation11_spill] sm:$0xff] %v3625_v16  ;;  %v1772_v42 = vmax.f32.f32 %v1580_v43, %v1676_v59  ;;  %v5328_v7 = vsub.s32 0, %v5327_v10  ;;  %v1007_v5 = vsel %vm1002_vm0, %v3567_v48, %v817_v47  ;;  %v5330_v43 = vld [vmem:[#allocation73_spill] sm:$0xff] }
  0xb4   :  { %5326 = vst [vmem:[#allocation15_spill] sm:$0xff] %v3627_v40  ;;  %v2060_v1 = vmax.f32.f32 %v1868_v36, %v1964_v33  ;;  %v1103_v28 = vsel %vm1002_vm0, %v817_v47, %v3567_v48  ;;  %v1203_v61 = vadd.f32 %v1007_v5, %v5329_v12  ;;  %v1395_v50 = vsub.f32 %v5329_v12, %v1007_v5  ;;  %v5332_v36 = vld [vmem:[#allocation74_spill] sm:$0xff] }
  0xb5   :  { %v3631_v18 = vrot.slane %v2259_v56, %v5328_v7  ;;  %874 = vrot.lane.b32.xlu1 %v5330_v43, %s3146_s6  ;;  %v1204_v46 = vadd.f32 %v1103_v28, %v5331_v15  ;;  %v1396_v54 = vsub.f32 %v5331_v15, %v1103_v28  ;;  %v1006_v59 = vsel %vm1002_vm0, %v3513_v6, %v815_v2  ;;  %v819_v56 = vpop.permute.xlu1 %818  ;;  %v5334_v15 = vld [vmem:[#allocation18_spill] sm:$0xff] }
  0xb6   :  { %v2156_v48 = vadd.f32 %v2060_v1, %v1772_v42  ;;  %v1583_v30 = vand.u32 2147483647, %v1203_v61  ;;  %v1871_v10 = vand.u32 2147483647, %v1395_v50  ;;  %v1102_v5 = vsel %vm1002_vm0, %v815_v2, %v3513_v6  ;;  %v627_v28 = vpop.permute.xlu0 %626  ;;  %v5333_v42 = vld [vmem:[#allocation12_spill] sm:$0xff] }
  0xb7   :  { %vm2747_vm2 = vcmp.gt.f32.partialorder %v3631_v18, 0.5  ;;  %682 = vrot.lane.b32.xlu0 %v5332_v36, %s3146_s6  ;;  %v1679_v47 = vand.u32 2147483647, %v1204_v46  ;;  %v1967_v7 = vand.u32 2147483647, %v1396_v54  ;;  %v1201_v1 = vadd.f32 %v1006_v59, %v5333_v42  ;;  %v5336_v6 = vld [vmem:[#allocation76_spill] sm:$0xff] }
  0xb8   :  { %v2843_v58 = vsel %vm2747_vm2, %v2155_v0, 0.0  ;;  %v2845_v33 = vsel %vm2747_vm2, %v2157_v11, 0.0  ;;  %v2844_v12 = vsel %vm2747_vm2, %v2156_v48, 0.0  ;;  %v1202_v0 = vadd.f32 %v1102_v5, %v5334_v15  ;;  %v5335_v11 = vld [vmem:[#allocation75_spill] sm:$0xff] }
  0xb9   :  { %v1393_v43 = vsub.f32 %v5333_v42, %v1006_v59  ;;  %876 = vrot.lane.b32.xlu1 %v5335_v11, %s3146_s6  ;;  %v2939_v61 = vadd.f32 %v2844_v12, %v2843_v58  ;;  %v1775_v50 = vmax.f32.f32 %v1583_v30, %v1679_v47  ;;  %v2063_v46 = vmax.f32.f32 %v1871_v10, %v1967_v7  ;;  %v821_v16 = vpop.permute.xlu1 %820  ;;  %v5337_v10 = vld [vmem:[#allocation20_spill] sm:$0xff] }
  0xba   :  { %v1394_v54 = vsub.f32 %v5334_v15, %v1102_v5  ;;  %v1582_v2 = vand.u32 2147483647, %v1201_v1  ;;  %v1678_v36 = vand.u32 2147483647, %v1202_v0  ;;  %v1008_v40 = vsel %vm1002_vm0, %v627_v28, %v819_v56  ;;  %v629_v30 = vpop.permute.xlu0 %628  ;;  %v5338_v5 = vld [vmem:[#allocation19_spill] sm:$0xff] }
  0xbb   :  { %684 = vrot.lane.b32.xlu0 %v5336_v6, %s3146_s6  ;;  %v1870_v48 = vand.u32 2147483647, %v1393_v43  ;;  %v2940_v23 = vadd.f32 %v2939_v61, %v2845_v33  ;;  %v2159_v59 = vadd.f32 %v2063_v46, %v1775_v50  ;;  %v1104_v58 = vsel %vm1002_vm0, %v819_v56, %v627_v28  ;;  %v5339_v43 = vld [vmem:[#allocation77_spill] sm:$0xff]  ;;  %v5346_v6 = vld [vmem:[#allocation23_spill] sm:$0xff] }
  0xbc   :  { %v1966_v42 = vand.u32 2147483647, %v1394_v54  ;;  %v1774_v47 = vmax.f32.f32 %v1582_v2, %v1678_v36  ;;  %v1205_v7 = vadd.f32 %v1008_v40, %v5337_v10  ;;  %v1206_v12 = vadd.f32 %v1104_v58, %v5338_v5  ;;  %v5340_v36 = vld [vmem:[#allocation78_spill] sm:$0xff] }
  0xbd   :  { %v1397_v1 = vsub.f32 %v5337_v10, %v1008_v40  ;;  %878 = vrot.lane.b32.xlu1 %v5339_v43, %s3146_s6  ;;  %v2847_v15 = vsel %vm2747_vm2, %v2159_v59, 0.0  ;;  %v1398_v0 = vsub.f32 %v5338_v5, %v1104_v58  ;;  %v1009_v56 = vsel %vm1002_vm0, %v629_v30, %v821_v16  ;;  %v823_v46 = vpop.permute.xlu1 %822  ;;  %v5341_v10 = vld [vmem:[#allocation22_spill] sm:$0xff] }
  0xbe   :  { %v2062_v33 = vmax.f32.f32 %v1870_v48, %v1966_v42  ;;  %v1584_v28 = vand.u32 2147483647, %v1205_v7  ;;  %v1680_v61 = vand.u32 2147483647, %v1206_v12  ;;  %v1105_v40 = vsel %vm1002_vm0, %v821_v16, %v629_v30  ;;  %v5342_v48 = vld [vmem:[#allocation21_spill] sm:$0xff]  ;;  %v631_v58 = vpop.permute.xlu0 %630  ;;  %v5343_v12 = vld [vmem:[#allocation79_spill] sm:$0xff] }
  0xbf   :  { %686 = vrot.lane.b32.xlu0 %v5340_v36, %s3146_s6  ;;  %v1872_v50 = vand.u32 2147483647, %v1397_v1  ;;  %v1968_v2 = vand.u32 2147483647, %v1398_v0  ;;  %v1207_v59 = vadd.f32 %v1009_v56, %v5341_v10  ;;  %v1208_v42 = vadd.f32 %v1105_v40, %v5342_v48  ;;  %v5345_v36 = vld [vmem:[#allocation24_spill] sm:$0xff] }
  0xc0   :  { %v2158_v54 = vadd.f32 %v2062_v33, %v1774_v47  ;;  %v1776_v5 = vmax.f32.f32 %v1584_v28, %v1680_v61  ;;  %v1399_v43 = vsub.f32 %v5341_v10, %v1009_v56  ;;  %v1400_v11 = vsub.f32 %v5342_v48, %v1105_v40  ;;  %v5344_v33 = vld [vmem:[#allocation80_spill] sm:$0xff] }
  0xc1   :  { %v1010_v7 = vsel %vm1002_vm0, %v631_v58, %v823_v46  ;;  %880 = vrot.lane.b32.xlu1 %v5343_v12, %s3146_s6  ;;  %v2064_v30 = vmax.f32.f32 %v1872_v50, %v1968_v2  ;;  %v1585_v47 = vand.u32 2147483647, %v1207_v59  ;;  %v1681_v1 = vand.u32 2147483647, %v1208_v42  ;;  %v825_v40 = vpop.permute.xlu1 %824 }
  0xc2   :  { %v2846_v16 = vsel %vm2747_vm2, %v2158_v54, 0.0  ;;  %v1873_v28 = vand.u32 2147483647, %v1399_v43  ;;  %v1969_v56 = vand.u32 2147483647, %v1400_v11  ;;  %v1106_v61 = vsel %vm1002_vm0, %v823_v46, %v631_v58  ;;  %v633_v54 = vpop.permute.xlu0 %632 }
  0xc3   :  { %688 = vrot.lane.b32.xlu0 %v5344_v33, %s3146_s6  ;;  %v2941_v0 = vadd.f32 %v2940_v23, %v2846_v16  ;;  %v2160_v10 = vadd.f32 %v2064_v30, %v1776_v5  ;;  %v1777_v48 = vmax.f32.f32 %v1585_v47, %v1681_v1  ;;  %v1209_v12 = vadd.f32 %v1010_v7, %v5345_v36  ;;  %v5347_v23 = vld [vmem:[#allocation81_spill] sm:$0xff]  ;;  %v5348_v5 = vld [vmem:[#allocation82_spill] sm:$0xff] }
  0xc4   :  { %v1210_v35 = vadd.f32 %v1106_v61, %v5346_v6  ;;  %v2065_v2 = vmax.f32.f32 %v1873_v28, %v1969_v56  ;;  %v1401_v59 = vsub.f32 %v5345_v36, %v1010_v7  ;;  %v1402_v42 = vsub.f32 %v5346_v6, %v1106_v61  ;;  %v5349_v1 = vld [vmem:[#allocation26_spill] sm:$0xff]  ;;  %v5350_v61 = vld [vmem:[#allocation25_spill] sm:$0xff] }
  0xc5   :  { %v2942_v50 = vadd.f32 %v2941_v0, %v2847_v15  ;;  %882 = vrot.lane.b32.xlu1 %v5347_v23, %s3146_s6  ;;  %v2848_v11 = vsel %vm2747_vm2, %v2160_v10, 0.0  ;;  %v1586_v43 = vand.u32 2147483647, %v1209_v12  ;;  %v1011_v58 = vsel %vm1002_vm0, %v633_v54, %v825_v40  ;;  %v827_v7 = vpop.permute.xlu1 %826  ;;  %v169_v23 = vld [vmem:[#allocation2 + $0x408] sm:$0xff] }
  0xc6   :  { %v1682_v46 = vand.u32 2147483647, %v1210_v35  ;;  %v2161_v16 = vadd.f32 %v2065_v2, %v1777_v48  ;;  %v1874_v30 = vand.u32 2147483647, %v1401_v59  ;;  %v1970_v36 = vand.u32 2147483647, %v1402_v42  ;;  %v635_v35 = vpop.permute.xlu0 %634 }
  0xc7   :  { %690 = vrot.lane.b32.xlu0 %v5348_v5, %s3146_s6  ;;  %v2943_v15 = vadd.f32 %v2942_v50, %v2848_v11  ;;  %v1107_v47 = vsel %vm1002_vm0, %v825_v40, %v633_v54  ;;  %v1211_v0 = vadd.f32 %v1011_v58, %v5349_v1  ;;  %v1403_v12 = vsub.f32 %v5349_v1, %v1011_v58  ;;  %v5351_v50 = vld [vmem:[#allocation83_spill] sm:$0xff]  ;;  %v5352_v54 = vld [vmem:[#allocation84_spill] sm:$0xff] }
  0xc8   :  { %v1778_v6 = vmax.f32.f32 %v1586_v43, %v1682_v46  ;;  %v2849_v28 = vsel %vm2747_vm2, %v2161_v16, 0.0  ;;  %v2066_v56 = vmax.f32.f32 %v1874_v30, %v1970_v36  ;;  %v1212_v10 = vadd.f32 %v1107_v47, %v5350_v61  ;;  %v5353_v30 = vld [vmem:[#allocation28_spill] sm:$0xff] }
  0xc9   :  { %v1404_v48 = vsub.f32 %v5350_v61, %v1107_v47  ;;  %884 = vrot.lane.b32.xlu1 %v5351_v50, %s3146_s6  ;;  %v2944_v2 = vadd.f32 %v2943_v15, %v2849_v28  ;;  %v1587_v59 = vand.u32 2147483647, %v1211_v0  ;;  %v1875_v42 = vand.u32 2147483647, %v1403_v12  ;;  %v829_v16 = vpop.permute.xlu1 %828  ;;  %v5354_v47 = vld [vmem:[#allocation27_spill] sm:$0xff] }
  0xca   :  { %v1012_v40 = vsel %vm1002_vm0, %v635_v35, %v827_v7  ;;  %v2162_v11 = vadd.f32 %v2066_v56, %v1778_v6  ;;  %v1683_v43 = vand.u32 2147483647, %v1212_v10  ;;  %v1108_v58 = vsel %vm1002_vm0, %v827_v7, %v635_v35  ;;  %v637_v12 = vpop.permute.xlu0 %636  ;;  %v5355_v7 = vld [vmem:[#allocation85_spill] sm:$0xff]  ;;  %v361_v5 = vld [vmem:[#allocation5 + $0x408] sm:$0xff] }
  0xcb   :  { %692 = vrot.lane.b32.xlu0 %v5352_v54, %s3146_s6  ;;  %v1971_v46 = vand.u32 2147483647, %v1404_v48  ;;  %v1213_v36 = vadd.f32 %v1012_v40, %v5353_v30  ;;  %v1214_v1 = vadd.f32 %v1108_v58, %v5354_v47  ;;  %v1405_v15 = vsub.f32 %v5353_v30, %v1012_v40  ;;  %v5356_v40 = vld [vmem:[#allocation86_spill] sm:$0xff] }
  0xcc   :  { %v1406_v0 = vsub.f32 %v5354_v47, %v1108_v58  ;;  %v2850_v28 = vsel %vm2747_vm2, %v2162_v11, 0.0  ;;  %v1779_v61 = vmax.f32.f32 %v1587_v59, %v1683_v43  ;;  %v1013_v56 = vsel %vm1002_vm0, %v637_v12, %v829_v16  ;;  %v5357_v59 = vld [vmem:[#allocation30_spill] sm:$0xff]  ;;  %v5358_v47 = vld [vmem:[#allocation29_spill] sm:$0xff] }
  0xcd   :  { %v2067_v6 = vmax.f32.f32 %v1875_v42, %v1971_v46  ;;  %886 = vrot.lane.b32.xlu1 %v5355_v7, %s3146_s6  ;;  %v2945_v35 = vadd.f32 %v2944_v2, %v2850_v28  ;;  %v1588_v10 = vand.u32 2147483647, %v1213_v36  ;;  %v1684_v48 = vand.u32 2147483647, %v1214_v1  ;;  %v831_v43 = vpop.permute.xlu1 %830 }
  0xce   :  { %v1876_v50 = vand.u32 2147483647, %v1405_v15  ;;  %v1972_v30 = vand.u32 2147483647, %v1406_v0  ;;  %v1109_v11 = vsel %vm1002_vm0, %v829_v16, %v637_v12  ;;  %v1215_v42 = vadd.f32 %v1013_v56, %v5357_v59  ;;  %v639_v36 = vpop.permute.xlu0 %638  ;;  %v5359_v16 = vld [vmem:[#allocation87_spill] sm:$0xff] }
  0xcf   :  { %694 = vrot.lane.b32.xlu0 %v5356_v40, %s3146_s6  ;;  %v2163_v58 = vadd.f32 %v2067_v6, %v1779_v61  ;;  %v1780_v46 = vmax.f32.f32 %v1588_v10, %v1684_v48  ;;  %v1216_v54 = vadd.f32 %v1109_v11, %v5358_v47  ;;  %v1407_v7 = vsub.f32 %v5357_v59, %v1013_v56  ;;  %v5360_v56 = vld [vmem:[#allocation88_spill] sm:$0xff]  ;;  %v5362_v40 = vld [vmem:[#allocation31_spill] sm:$0xff] }
  0xd0   :  { %v1408_v2 = vsub.f32 %v5358_v47, %v1109_v11  ;;  %v2068_v15 = vmax.f32.f32 %v1876_v50, %v1972_v30  ;;  %v1589_v28 = vand.u32 2147483647, %v1215_v42  ;;  %v1014_v0 = vsel %vm1002_vm0, %v639_v36, %v831_v43 }
  0xd1   :  { %v2851_v1 = vsel %vm2747_vm2, %v2163_v58, 0.0  ;;  %888 = vrot.lane.b32.xlu1 %v5359_v16, %s3146_s6  ;;  %v1685_v61 = vand.u32 2147483647, %v1216_v54  ;;  %v1877_v6 = vand.u32 2147483647, %v1407_v7  ;;  %v1110_v11 = vsel %vm1002_vm0, %v831_v43, %v639_v36  ;;  %v5361_v58 = vld [vmem:[#allocation32_spill] sm:$0xff]  ;;  %v833_v59 = vpop.permute.xlu1 %832 }
  0xd2   :  { %v2946_v12 = vadd.f32 %v2945_v35, %v2851_v1  ;;  %v1973_v10 = vand.u32 2147483647, %v1408_v2  ;;  %v2164_v48 = vadd.f32 %v2068_v15, %v1780_v46  ;;  %v1217_v50 = vadd.f32 %v1014_v0, %v5361_v58  ;;  %v641_v7 = vpop.permute.xlu0 %640  ;;  %v167_v35 = vld [vmem:[#allocation2 + $0x3f8] sm:$0xff] }
  0xd3   :  { %696 = vrot.lane.b32.xlu0 %v5360_v56, %s3146_s6  ;;  %v1409_v30 = vsub.f32 %v5361_v58, %v1014_v0  ;;  %v1781_v42 = vmax.f32.f32 %v1589_v28, %v1685_v61  ;;  %v1218_v16 = vadd.f32 %v1110_v11, %v5362_v40  ;;  %v1410_v54 = vsub.f32 %v5362_v40, %v1110_v11  ;;  %v359_v2 = vld [vmem:[#allocation5 + $0x3f8] sm:$0xff] }
  0xd4   :  { %v2069_v47 = vmax.f32.f32 %v1877_v6, %v1973_v10  ;;  %v2852_v46 = vsel %vm2747_vm2, %v2164_v48, 0.0  ;;  %v1590_v1 = vand.u32 2147483647, %v1217_v50  ;;  %v1015_v43 = vsel %vm1002_vm0, %v641_v7, %v833_v59  ;;  %v5363_v36 = vld [vmem:[#allocation89_spill] sm:$0xff]  ;;  %v5364_v40 = vld [vmem:[#allocation90_spill] sm:$0xff] }
  0xd5   :  { %v1878_v15 = vand.u32 2147483647, %v1409_v30  ;;  %890 = vrot.lane.b32.xlu1 %v5363_v36, %s3146_s6  ;;  %v2947_v28 = vadd.f32 %v2946_v12, %v2852_v46  ;;  %v1686_v61 = vand.u32 2147483647, %v1218_v16  ;;  %v1974_v6 = vand.u32 2147483647, %v1410_v54  ;;  %v835_v50 = vpop.permute.xlu1 %834 }
  0xd6   :  { %v2165_v0 = vadd.f32 %v2069_v47, %v1781_v42  ;;  %v1111_v10 = vsel %vm1002_vm0, %v833_v59, %v641_v7  ;;  %v5365_v11 = vld [vmem:[#allocation34_spill] sm:$0xff]  ;;  %v3772_v30 = vsub.f32 %v167_v35, %v359_v2  ;;  %v5367_v16 = vld [vmem:[#allocation33_spill] sm:$0xff]  ;;  %v643_v54 = vpop.permute.xlu0 %642 }
  0xd7   :  { %698 = vrot.lane.b32.xlu0 %v5364_v40, %s3146_s6  ;;  %v1219_v48 = vadd.f32 %v1015_v43, %v5365_v11  ;;  %v1411_v58 = vsub.f32 %v5365_v11, %v1015_v43  ;;  %v1782_v12 = vmax.f32.f32 %v1590_v1, %v1686_v61  ;;  %v2070_v42 = vmax.f32.f32 %v1878_v15, %v1974_v6  ;;  %v166_v7 = vld [vmem:[#allocation2 + $0x3f0] sm:$0xff]  ;;  %v5370_v6 = vld [vmem:[#allocation35_spill] sm:$0xff] }
  0xd8   :  { %5366 = vst [vmem:[#allocation13_spill] sm:$0xff] %v3772_v30  ;;  %v2853_v36 = vsel %vm2747_vm2, %v2165_v0, 0.0  ;;  %v1220_v47 = vadd.f32 %v1111_v10, %v5367_v16  ;;  %v1412_v40 = vsub.f32 %v5367_v16, %v1111_v10  ;;  %v358_v43 = vld [vmem:[#allocation5 + $0x3f0] sm:$0xff]  ;;  %v1016_v0 = vsel %vm1002_vm0, %v643_v54, %v835_v50 }
  0xd9   :  { %v2948_v46 = vadd.f32 %v2947_v28, %v2853_v36  ;;  %v1591_v56 = vand.u32 2147483647, %v1219_v48  ;;  %v1879_v59 = vand.u32 2147483647, %v1411_v58  ;;  %892 = vrot.lane.b32.xlu1 %v3485_v45, %s3146_s6  ;;  %v2166_v35 = vadd.f32 %v2070_v42, %v1782_v12  ;;  %v5368_v15 = vld [vmem:[#allocation92_spill] sm:$0xff]  ;;  %v837_v48 = vpop.permute.xlu1 %836 }
  0xda   :  { %v1687_v2 = vand.u32 2147483647, %v1220_v47  ;;  %v1112_v1 = vsel %vm1002_vm0, %v835_v50, %v643_v54  ;;  %v1975_v36 = vand.u32 2147483647, %v1412_v40  ;;  %v5369_v28 = vld [vmem:[#allocation36_spill] sm:$0xff]  ;;  %v645_v16 = vpop.permute.xlu0 %644  ;;  %v3792_v47 = vsub.f32 %v166_v7, %v358_v43  ;;  %v5372_v7 = vld [vmem:[#allocation94_spill] sm:$0xff] }
  0xdb   :  { %700 = vrot.lane.b32.xlu0 %v5368_v15, %s3146_s6  ;;  %v1221_v61 = vadd.f32 %v1016_v0, %v5369_v28  ;;  %v1222_v10 = vadd.f32 %v1112_v1, %v5370_v6  ;;  %v1413_v11 = vsub.f32 %v5369_v28, %v1016_v0  ;;  %v2854_v58 = vsel %vm2747_vm2, %v2166_v35, 0.0  ;;  %v5371_v15 = vld [vmem:[#allocation93_spill] sm:$0xff]  ;;  %v5373_v43 = vld [vmem:[#allocation38_spill] sm:$0xff] }
  0xdc   :  { %v1783_v12 = vmax.f32.f32 %v1591_v56, %v1687_v2  ;;  %v1414_v42 = vsub.f32 %v5370_v6, %v1112_v1  ;;  %v2949_v50 = vadd.f32 %v2948_v46, %v2854_v58  ;;  %v2071_v54 = vmax.f32.f32 %v1879_v59, %v1975_v36  ;;  %v5374_v1 = vld [vmem:[#allocation37_spill] sm:$0xff] }
  0xdd   :  { %v1592_v45 = vand.u32 2147483647, %v1221_v61  ;;  %v1688_v40 = vand.u32 2147483647, %v1222_v10  ;;  %894 = vrot.lane.b32.xlu1 %v5371_v15, %s3146_s6  ;;  %v1880_v0 = vand.u32 2147483647, %v1413_v11  ;;  %v1017_v35 = vsel %vm1002_vm0, %v645_v16, %v837_v48  ;;  %v839_v61 = vpop.permute.xlu1 %838 }
  0xde   :  { %v1976_v28 = vand.u32 2147483647, %v1414_v42  ;;  %v1113_v56 = vsel %vm1002_vm0, %v837_v48, %v645_v16  ;;  %v2167_v46 = vadd.f32 %v2071_v54, %v1783_v12  ;;  %v1223_v2 = vadd.f32 %v1017_v35, %v5373_v43  ;;  %v647_v58 = vpop.permute.xlu0 %646 }
  0xdf   :  { %702 = vrot.lane.b32.xlu0 %v5372_v7, %s3146_s6  ;;  %v1784_v59 = vmax.f32.f32 %v1592_v45, %v1688_v40  ;;  %v1224_v36 = vadd.f32 %v1113_v56, %v5374_v1  ;;  %v1415_v10 = vsub.f32 %v5373_v43, %v1017_v35  ;;  %v1416_v11 = vsub.f32 %v5374_v1, %v1113_v56  ;;  %v5377_v35 = vld [vmem:[#allocation40_spill] sm:$0xff] }
  0xe0   :  { %v2072_v6 = vmax.f32.f32 %v1880_v0, %v1976_v28  ;;  %v3806_v42 = vsub.f32 %v169_v23, %v361_v5  ;;  %v2855_v48 = vsel %vm2747_vm2, %v2167_v46, 0.0  ;;  %v1593_v16 = vand.u32 2147483647, %v1223_v2  ;;  %v5376_v28 = vld [vmem:[#allocation96_spill] sm:$0xff] }
  0xe1   :  { %v1689_v15 = vand.u32 2147483647, %v1224_v36  ;;  %v1018_v45 = vsel %vm1002_vm0, %v647_v58, %v839_v61  ;;  %896 = vrot.lane.b32.xlu1 %v3495_v3, %s3146_s6  ;;  %v2950_v12 = vadd.f32 %v2949_v50, %v2855_v48  ;;  %v1881_v40 = vand.u32 2147483647, %v1415_v10  ;;  %v841_v43 = vpop.permute.xlu1 %840  ;;  %v5378_v50 = vld [vmem:[#allocation39_spill] sm:$0xff] }
  0xe2   :  { %5375 = vst [vmem:[#allocation16_spill] sm:$0xff] %v3806_v42  ;;  %v2168_v54 = vadd.f32 %v2072_v6, %v1784_v59  ;;  %v1977_v0 = vand.u32 2147483647, %v1416_v11  ;;  %v1114_v5 = vsel %vm1002_vm0, %v839_v61, %v647_v58  ;;  %v1225_v56 = vadd.f32 %v1018_v45, %v5377_v35  ;;  %v649_v6 = vpop.permute.xlu0 %648  ;;  %v5379_v58 = vld [vmem:[#allocation97_spill] sm:$0xff]  ;;  %v168_v48 = vld [vmem:[#allocation2 + $0x400] sm:$0xff] }
  0xe3   :  { %704 = vrot.lane.b32.xlu0 %v5376_v28, %s3146_s6  ;;  %v1785_v23 = vmax.f32.f32 %v1593_v16, %v1689_v15  ;;  %v1417_v46 = vsub.f32 %v5377_v35, %v1018_v45  ;;  %v1226_v59 = vadd.f32 %v1114_v5, %v5378_v50  ;;  %v1418_v36 = vsub.f32 %v5378_v50, %v1114_v5  ;;  %v360_v16 = vld [vmem:[#allocation5 + $0x400] sm:$0xff] }
  0xe4   :  { %v2856_v2 = vsel %vm2747_vm2, %v2168_v54, 0.0  ;;  %v2073_v1 = vmax.f32.f32 %v1881_v40, %v1977_v0  ;;  %v1594_v11 = vand.u32 2147483647, %v1225_v56  ;;  %v1019_v61 = vsel %vm1002_vm0, %v649_v6, %v841_v43  ;;  %v5380_v0 = vld [vmem:[#allocation98_spill] sm:$0xff]  ;;  %v5382_v56 = vld [vmem:[#allocation41_spill] sm:$0xff] }
  0xe5   :  { %v2951_v10 = vadd.f32 %v2950_v12, %v2856_v2  ;;  %v1882_v15 = vand.u32 2147483647, %v1417_v46  ;;  %898 = vrot.lane.b32.xlu1 %v5379_v58, %s3146_s6  ;;  %v1690_v35 = vand.u32 2147483647, %v1226_v59  ;;  %v1978_v54 = vand.u32 2147483647, %v1418_v36  ;;  %v843_v58 = vpop.permute.xlu1 %842 }
  0xe6   :  { %v2169_v45 = vadd.f32 %v2073_v1, %v1785_v23  ;;  %v1115_v40 = vsel %vm1002_vm0, %v841_v43, %v649_v6  ;;  %v5381_v12 = vld [vmem:[#allocation42_spill] sm:$0xff]  ;;  %v651_v36 = vpop.permute.xlu0 %650  ;;  %v3838_v3 = vsub.f32 %v168_v48, %v360_v16  ;;  %v5383_v48 = vld [vmem:[#allocation44_spill] sm:$0xff]  ;;  %v5384_v16 = vld [vmem:[#allocation43_spill] sm:$0xff] }
  0xe7   :  { %706 = vrot.lane.b32.xlu0 %v5380_v0, %s3146_s6  ;;  %v1227_v5 = vadd.f32 %v1019_v61, %v5381_v12  ;;  %v1228_v46 = vadd.f32 %v1115_v40, %v5382_v56  ;;  %v1419_v2 = vsub.f32 %v5381_v12, %v1019_v61  ;;  %v1420_v50 = vsub.f32 %v5382_v56, %v1115_v40  ;;  %v171_v43 = vld [vmem:[#allocation2 + $0x418] sm:$0xff] }
  0xe8   :  { %v2857_v23 = vsel %vm2747_vm2, %v2169_v45, 0.0  ;;  %v1786_v1 = vmax.f32.f32 %v1594_v11, %v1690_v35  ;;  %v2074_v59 = vmax.f32.f32 %v1882_v15, %v1978_v54  ;;  %v363_v6 = vld [vmem:[#allocation5 + $0x418] sm:$0xff]  ;;  %v1020_v12 = vsel %vm1002_vm0, %v651_v36, %v843_v58 }
  0xe9   :  { %v2952_v0 = vadd.f32 %v2951_v10, %v2857_v23  ;;  %v1595_v28 = vand.u32 2147483647, %v1227_v5  ;;  %v1691_v7 = vand.u32 2147483647, %v1228_v46  ;;  %v1883_v33 = vand.u32 2147483647, %v1419_v2  ;;  %900 = vrot.lane.b32.xlu1 %v3505_v44, %s3146_s6  ;;  %v845_v54 = vpop.permute.xlu1 %844 }
  0xea   :  { %v2170_v61 = vadd.f32 %v2074_v59, %v1786_v1  ;;  %v1979_v40 = vand.u32 2147483647, %v1420_v50  ;;  %v1116_v11 = vsel %vm1002_vm0, %v843_v58, %v651_v36  ;;  %v1229_v10 = vadd.f32 %v1020_v12, %v5383_v48  ;;  %v653_v2 = vpop.permute.xlu0 %652  ;;  %v170_v58 = vld [vmem:[#allocation2 + $0x410] sm:$0xff] }
  0xeb   :  { %708 = vrot.lane.b32.xlu0 %v3507_v52, %s3146_s6  ;;  %v1787_v15 = vmax.f32.f32 %v1595_v28, %v1691_v7  ;;  %v1230_v45 = vadd.f32 %v1116_v11, %v5384_v16  ;;  %v1421_v35 = vsub.f32 %v5383_v48, %v1020_v12  ;;  %v1422_v46 = vsub.f32 %v5384_v16, %v1116_v11  ;;  %v362_v23 = vld [vmem:[#allocation5 + $0x410] sm:$0xff] }
  0xec   :  { %v2858_v5 = vsel %vm2747_vm2, %v2170_v61, 0.0  ;;  %v2075_v56 = vmax.f32.f32 %v1883_v33, %v1979_v40  ;;  %v3854_v50 = vsub.f32 %v171_v43, %v363_v6  ;;  %v1596_v7 = vand.u32 2147483647, %v1229_v10  ;;  %v5386_v43 = vld [vmem:[#allocation100_spill] sm:$0xff]  ;;  %v5387_v40 = vld [vmem:[#allocation46_spill] sm:$0xff]  ;;  %v5388_v11 = vld [vmem:[#allocation45_spill] sm:$0xff] }
  0xed   :  { %v2953_v1 = vadd.f32 %v2952_v0, %v2858_v5  ;;  %v1692_v28 = vand.u32 2147483647, %v1230_v45  ;;  %v1884_v59 = vand.u32 2147483647, %v1421_v35  ;;  %902 = vrot.lane.b32.xlu1 %v3509_v27, %s3146_s6  ;;  %v1980_v12 = vand.u32 2147483647, %v1422_v46  ;;  %v847_v16 = vpop.permute.xlu1 %846 }
  0xee   :  { %5385 = vst [vmem:[#allocation61_spill] sm:$0xff] %v3854_v50  ;;  %v2171_v36 = vadd.f32 %v2075_v56, %v1787_v15  ;;  %v1021_v61 = vsel %vm1002_vm0, %v653_v2, %v845_v54  ;;  %v1117_v33 = vsel %vm1002_vm0, %v845_v54, %v653_v2  ;;  %v655_v5 = vpop.permute.xlu0 %654  ;;  %v3870_v56 = vsub.f32 %v170_v58, %v362_v23  ;;  %v173_v54 = vld [vmem:[#allocation2 + $0x428] sm:$0xff] }
  0xef   :  { %710 = vrot.lane.b32.xlu0 %v5386_v43, %s3146_s6  ;;  %v1788_v6 = vmax.f32.f32 %v1596_v7, %v1692_v28  ;;  %v1231_v0 = vadd.f32 %v1021_v61, %v5387_v40  ;;  %v1232_v48 = vadd.f32 %v1117_v33, %v5388_v11  ;;  %v1423_v10 = vsub.f32 %v5387_v40, %v1021_v61  ;;  %v365_v46 = vld [vmem:[#allocation5 + $0x428] sm:$0xff] }
  0xf0   :  { %v2859_v15 = vsel %vm2747_vm2, %v2171_v36, 0.0  ;;  %v2076_v45 = vmax.f32.f32 %v1884_v59, %v1980_v12  ;;  %v1424_v35 = vsub.f32 %v5388_v11, %v1117_v33  ;;  %v1022_v36 = vsel %vm1002_vm0, %v655_v5, %v847_v16  ;;  %v5389_v23 = vld [vmem:[#allocation48_spill] sm:$0xff]  ;;  %v5390_v12 = vld [vmem:[#allocation47_spill] sm:$0xff] }
  0xf1   :  { %v2954_v2 = vadd.f32 %v2953_v1, %v2859_v15  ;;  %v1597_v7 = vand.u32 2147483647, %v1231_v0  ;;  %v1693_v28 = vand.u32 2147483647, %v1232_v48  ;;  %v1885_v27 = vand.u32 2147483647, %v1423_v10  ;;  %904 = vrot.lane.b32.xlu1 %v3515_v21, %s3146_s6  ;;  %v849_v11 = vpop.permute.xlu1 %848 }
  0xf2   :  { %v2172_v61 = vadd.f32 %v2076_v45, %v1788_v6  ;;  %v1981_v40 = vand.u32 2147483647, %v1424_v35  ;;  %v1118_v59 = vsel %vm1002_vm0, %v847_v16, %v655_v5  ;;  %v1233_v1 = vadd.f32 %v1022_v36, %v5389_v23  ;;  %v657_v15 = vpop.permute.xlu0 %656  ;;  %v172_v16 = vld [vmem:[#allocation2 + $0x420] sm:$0xff] }
  0xf3   :  { %712 = vrot.lane.b32.xlu0 %v3517_v20, %s3146_s6  ;;  %v1789_v58 = vmax.f32.f32 %v1597_v7, %v1693_v28  ;;  %v1234_v33 = vadd.f32 %v1118_v59, %v5390_v12  ;;  %v1425_v0 = vsub.f32 %v5389_v23, %v1022_v36  ;;  %v1426_v10 = vsub.f32 %v5390_v12, %v1118_v59  ;;  %v364_v35 = vld [vmem:[#allocation5 + $0x420] sm:$0xff] }
  0xf4   :  { %v2860_v6 = vsel %vm2747_vm2, %v2172_v61, 0.0  ;;  %v2077_v48 = vmax.f32.f32 %v1885_v27, %v1981_v40  ;;  %v3886_v45 = vsub.f32 %v173_v54, %v365_v46  ;;  %v1598_v7 = vand.u32 2147483647, %v1233_v1  ;;  %v5392_v46 = vld [vmem:[#allocation50_spill] sm:$0xff]  ;;  %v5393_v40 = vld [vmem:[#allocation49_spill] sm:$0xff] }
  0xf5   :  { %v2955_v5 = vadd.f32 %v2954_v2, %v2860_v6  ;;  %v1694_v28 = vand.u32 2147483647, %v1234_v33  ;;  %v1886_v21 = vand.u32 2147483647, %v1425_v0  ;;  %906 = vrot.lane.b32.xlu1 %v3519_v37, %s3146_s6  ;;  %v1982_v23 = vand.u32 2147483647, %v1426_v10  ;;  %v851_v12 = vpop.permute.xlu1 %850 }
  0xf6   :  { %5391 = vst [vmem:[#allocation14_spill] sm:$0xff] %v3886_v45  ;;  %v2173_v36 = vadd.f32 %v2077_v48, %v1789_v58  ;;  %v1023_v61 = vsel %vm1002_vm0, %v657_v15, %v849_v11  ;;  %v1119_v27 = vsel %vm1002_vm0, %v849_v11, %v657_v15  ;;  %v659_v6 = vpop.permute.xlu0 %658  ;;  %v3902_v48 = vsub.f32 %v172_v16, %v364_v35  ;;  %v175_v11 = vld [vmem:[#allocation2 + $0x438] sm:$0xff]  ;;  %v5394_v35 = vld [vmem:[#allocation52_spill] sm:$0xff] }
  0xf7   :  { %714 = vrot.lane.b32.xlu0 %v3521_v14, %s3146_s6  ;;  %v1790_v54 = vmax.f32.f32 %v1598_v7, %v1694_v28  ;;  %v1235_v2 = vadd.f32 %v1023_v61, %v5392_v46  ;;  %v1236_v59 = vadd.f32 %v1119_v27, %v5393_v40  ;;  %v1427_v1 = vsub.f32 %v5392_v46, %v1023_v61  ;;  %v367_v10 = vld [vmem:[#allocation5 + $0x438] sm:$0xff] }
  0xf8   :  { %v2861_v58 = vsel %vm2747_vm2, %v2173_v36, 0.0  ;;  %v2078_v33 = vmax.f32.f32 %v1886_v21, %v1982_v23  ;;  %v1428_v0 = vsub.f32 %v5393_v40, %v1119_v27  ;;  %v1024_v36 = vsel %vm1002_vm0, %v659_v6, %v851_v12  ;;  %v5395_v23 = vld [vmem:[#allocation51_spill] sm:$0xff] }
  0xf9   :  { %v2956_v15 = vadd.f32 %v2955_v5, %v2861_v58  ;;  %v1599_v7 = vand.u32 2147483647, %v1235_v2  ;;  %v1695_v28 = vand.u32 2147483647, %v1236_v59  ;;  %v1887_v37 = vand.u32 2147483647, %v1427_v1  ;;  %908 = vrot.lane.b32.xlu1 %v3525_v63, %s3146_s6  ;;  %v853_v40 = vpop.permute.xlu1 %852 }
  0xfa   :  { %v2174_v61 = vadd.f32 %v2078_v33, %v1790_v54  ;;  %v1983_v46 = vand.u32 2147483647, %v1428_v0  ;;  %v1120_v21 = vsel %vm1002_vm0, %v851_v12, %v659_v6  ;;  %v1237_v5 = vadd.f32 %v1024_v36, %v5394_v35  ;;  %v661_v58 = vpop.permute.xlu0 %660  ;;  %v174_v12 = vld [vmem:[#allocation2 + $0x430] sm:$0xff] }
  0xfb   :  { %716 = vrot.lane.b32.xlu0 %v3527_v34, %s3146_s6  ;;  %v1791_v16 = vmax.f32.f32 %v1599_v7, %v1695_v28  ;;  %v1238_v27 = vadd.f32 %v1120_v21, %v5395_v23  ;;  %v1429_v2 = vsub.f32 %v5394_v35, %v1024_v36  ;;  %v1430_v1 = vsub.f32 %v5395_v23, %v1120_v21  ;;  %v366_v0 = vld [vmem:[#allocation5 + $0x430] sm:$0xff] }
  0xfc   :  { %v2862_v54 = vsel %vm2747_vm2, %v2174_v61, 0.0  ;;  %v2079_v59 = vmax.f32.f32 %v1887_v37, %v1983_v46  ;;  %v3918_v33 = vsub.f32 %v175_v11, %v367_v10  ;;  %v1600_v7 = vand.u32 2147483647, %v1237_v5  ;;  %v5397_v10 = vld [vmem:[#allocation54_spill] sm:$0xff]  ;;  %v5398_v46 = vld [vmem:[#allocation53_spill] sm:$0xff] }
  0xfd   :  { %v2957_v6 = vadd.f32 %v2956_v15, %v2862_v54  ;;  %v1696_v28 = vand.u32 2147483647, %v1238_v27  ;;  %v1888_v63 = vand.u32 2147483647, %v1429_v2  ;;  %910 = vrot.lane.b32.xlu1 %v3529_v29, %s3146_s6  ;;  %v1984_v35 = vand.u32 2147483647, %v1430_v1  ;;  %v855_v23 = vpop.permute.xlu1 %854 }
  0xfe   :  { %5396 = vst [vmem:[#allocation17_spill] sm:$0xff] %v3918_v33  ;;  %v2175_v36 = vadd.f32 %v2079_v59, %v1791_v16  ;;  %v1025_v61 = vsel %vm1002_vm0, %v661_v58, %v853_v40  ;;  %v1121_v37 = vsel %vm1002_vm0, %v853_v40, %v661_v58  ;;  %v663_v54 = vpop.permute.xlu0 %662  ;;  %v3934_v59 = vsub.f32 %v174_v12, %v366_v0  ;;  %v177_v40 = vld [vmem:[#allocation2 + $0x448] sm:$0xff] }
  0xff   :  { %718 = vrot.lane.b32.xlu0 %v3531_v41, %s3146_s6  ;;  %v1792_v11 = vmax.f32.f32 %v1600_v7, %v1696_v28  ;;  %v1239_v15 = vadd.f32 %v1025_v61, %v5397_v10  ;;  %v1240_v21 = vadd.f32 %v1121_v37, %v5398_v46  ;;  %v1431_v5 = vsub.f32 %v5397_v10, %v1025_v61  ;;  %v369_v1 = vld [vmem:[#allocation5 + $0x448] sm:$0xff] }
 0x100   :  { %v2863_v16 = vsel %vm2747_vm2, %v2175_v36, 0.0  ;;  %v2080_v27 = vmax.f32.f32 %v1888_v63, %v1984_v35  ;;  %v1432_v2 = vsub.f32 %v5398_v46, %v1121_v37  ;;  %v1026_v36 = vsel %vm1002_vm0, %v663_v54, %v855_v23  ;;  %v5399_v0 = vld [vmem:[#allocation56_spill] sm:$0xff]  ;;  %v5400_v35 = vld [vmem:[#allocation55_spill] sm:$0xff] }
 0x101   :  { %v2958_v58 = vadd.f32 %v2957_v6, %v2863_v16  ;;  %v1601_v7 = vand.u32 2147483647, %v1239_v15  ;;  %v1697_v28 = vand.u32 2147483647, %v1240_v21  ;;  %v1889_v29 = vand.u32 2147483647, %v1431_v5  ;;  %912 = vrot.lane.b32.xlu1 %v3535_v22, %s3146_s6  ;;  %v857_v46 = vpop.permute.xlu1 %856 }
 0x102   :  { %v2176_v61 = vadd.f32 %v2080_v27, %v1792_v11  ;;  %v1985_v10 = vand.u32 2147483647, %v1432_v2  ;;  %v1122_v63 = vsel %vm1002_vm0, %v855_v23, %v663_v54  ;;  %v1241_v6 = vadd.f32 %v1026_v36, %v5399_v0  ;;  %v665_v16 = vpop.permute.xlu0 %664  ;;  %v176_v23 = vld [vmem:[#allocation2 + $0x440] sm:$0xff] }
 0x103   :  { %720 = vrot.lane.b32.xlu0 %v3537_v13, %s3146_s6  ;;  %v1793_v12 = vmax.f32.f32 %v1601_v7, %v1697_v28  ;;  %v1242_v37 = vadd.f32 %v1122_v63, %v5400_v35  ;;  %v1433_v15 = vsub.f32 %v5399_v0, %v1026_v36  ;;  %v1434_v5 = vsub.f32 %v5400_v35, %v1122_v63  ;;  %v368_v2 = vld [vmem:[#allocation5 + $0x440] sm:$0xff] }
 0x104   :  { %v2864_v11 = vsel %vm2747_vm2, %v2176_v61, 0.0  ;;  %v2081_v21 = vmax.f32.f32 %v1889_v29, %v1985_v10  ;;  %v3950_v27 = vsub.f32 %v177_v40, %v369_v1  ;;  %v1602_v7 = vand.u32 2147483647, %v1241_v6  ;;  %v5402_v1 = vld [vmem:[#allocation58_spill] sm:$0xff]  ;;  %v5403_v10 = vld [vmem:[#allocation57_spill] sm:$0xff] }
 0x105   :  { %v2959_v54 = vadd.f32 %v2958_v58, %v2864_v11  ;;  %v1698_v28 = vand.u32 2147483647, %v1242_v37  ;;  %v1890_v22 = vand.u32 2147483647, %v1433_v15  ;;  %914 = vrot.lane.b32.xlu1 %v3539_v4, %s3146_s6  ;;  %v1986_v0 = vand.u32 2147483647, %v1434_v5  ;;  %v859_v35 = vpop.permute.xlu1 %858 }
 0x106   :  { %5401 = vst [vmem:[#allocation12_spill] sm:$0xff] %v3950_v27  ;;  %v2177_v36 = vadd.f32 %v2081_v21, %v1793_v12  ;;  %v1027_v61 = vsel %vm1002_vm0, %v665_v16, %v857_v46  ;;  %v1123_v29 = vsel %vm1002_vm0, %v857_v46, %v665_v16  ;;  %v667_v11 = vpop.permute.xlu0 %666  ;;  %v3966_v21 = vsub.f32 %v176_v23, %v368_v2  ;;  %v179_v46 = vld [vmem:[#allocation2 + $0x458] sm:$0xff]  ;;  %v5404_v2 = vld [vmem:[#allocation60_spill] sm:$0xff] }
 0x107   :  { %722 = vrot.lane.b32.xlu0 %v3541_v62, %s3146_s6  ;;  %v1794_v40 = vmax.f32.f32 %v1602_v7, %v1698_v28  ;;  %v1243_v58 = vadd.f32 %v1027_v61, %v5402_v1  ;;  %v1244_v63 = vadd.f32 %v1123_v29, %v5403_v10  ;;  %v1435_v6 = vsub.f32 %v5402_v1, %v1027_v61  ;;  %v371_v5 = vld [vmem:[#allocation5 + $0x458] sm:$0xff] }
 0x108   :  { %v2865_v12 = vsel %vm2747_vm2, %v2177_v36, 0.0  ;;  %v2082_v37 = vmax.f32.f32 %v1890_v22, %v1986_v0  ;;  %v1436_v15 = vsub.f32 %v5403_v10, %v1123_v29  ;;  %v1028_v36 = vsel %vm1002_vm0, %v667_v11, %v859_v35  ;;  %v5405_v0 = vld [vmem:[#allocation59_spill] sm:$0xff] }
 0x109   :  { %v2960_v16 = vadd.f32 %v2959_v54, %v2865_v12  ;;  %v1603_v7 = vand.u32 2147483647, %v1243_v58  ;;  %v1699_v28 = vand.u32 2147483647, %v1244_v63  ;;  %v1891_v4 = vand.u32 2147483647, %v1435_v6  ;;  %916 = vrot.lane.b32.xlu1 %v3545_v55, %s3146_s6  ;;  %v861_v10 = vpop.permute.xlu1 %860 }
 0x10a   :  { %v2178_v61 = vadd.f32 %v2082_v37, %v1794_v40  ;;  %v1987_v1 = vand.u32 2147483647, %v1436_v15  ;;  %v1124_v22 = vsel %vm1002_vm0, %v859_v35, %v667_v11  ;;  %v1245_v54 = vadd.f32 %v1028_v36, %v5404_v2  ;;  %v669_v12 = vpop.permute.xlu0 %668  ;;  %v178_v35 = vld [vmem:[#allocation2 + $0x450] sm:$0xff] }
 0x10b   :  { %724 = vrot.lane.b32.xlu0 %v3547_v49, %s3146_s6  ;;  %v1795_v23 = vmax.f32.f32 %v1603_v7, %v1699_v28  ;;  %v1246_v29 = vadd.f32 %v1124_v22, %v5405_v0  ;;  %v1437_v58 = vsub.f32 %v5404_v2, %v1028_v36  ;;  %v1438_v6 = vsub.f32 %v5405_v0, %v1124_v22  ;;  %v370_v15 = vld [vmem:[#allocation5 + $0x450] sm:$0xff] }
 0x10c   :  { %v2866_v40 = vsel %vm2747_vm2, %v2178_v61, 0.0  ;;  %v2083_v63 = vmax.f32.f32 %v1891_v4, %v1987_v1  ;;  %v3982_v37 = vsub.f32 %v179_v46, %v371_v5  ;;  %v1604_v7 = vand.u32 2147483647, %v1245_v54  ;;  %v5407_v5 = vld [vmem:[#allocation63_spill] sm:$0xff]  ;;  %v5408_v1 = vld [vmem:[#allocation62_spill] sm:$0xff] }
 0x10d   :  { %v2961_v11 = vadd.f32 %v2960_v16, %v2866_v40  ;;  %v1700_v28 = vand.u32 2147483647, %v1246_v29  ;;  %v1892_v55 = vand.u32 2147483647, %v1437_v58  ;;  %918 = vrot.lane.b32.xlu1 %v3549_v31, %s3146_s6  ;;  %v1988_v2 = vand.u32 2147483647, %v1438_v6  ;;  %v863_v0 = vpop.permute.xlu1 %862 }
 0x10e   :  { %5406 = vst [vmem:[#allocation18_spill] sm:$0xff] %v3982_v37  ;;  %v2179_v36 = vadd.f32 %v2083_v63, %v1795_v23  ;;  %v1029_v61 = vsel %vm1002_vm0, %v669_v12, %v861_v10  ;;  %v1125_v4 = vsel %vm1002_vm0, %v861_v10, %v669_v12  ;;  %v671_v40 = vpop.permute.xlu0 %670  ;;  %v3998_v63 = vsub.f32 %v178_v35, %v370_v15  ;;  %v181_v10 = vld [vmem:[#allocation2 + $0x468] sm:$0xff]  ;;  %v5409_v15 = vld [vmem:[#allocation65_spill] sm:$0xff] }
 0x10f   :  { %726 = vrot.lane.b32.xlu0 %v3551_v32, %s3146_s6  ;;  %v1796_v46 = vmax.f32.f32 %v1604_v7, %v1700_v28  ;;  %v1247_v16 = vadd.f32 %v1029_v61, %v5407_v5  ;;  %v1248_v22 = vadd.f32 %v1125_v4, %v5408_v1  ;;  %v1439_v54 = vsub.f32 %v5407_v5, %v1029_v61  ;;  %v373_v6 = vld [vmem:[#allocation5 + $0x468] sm:$0xff] }
 0x110   :  { %v2867_v23 = vsel %vm2747_vm2, %v2179_v36, 0.0  ;;  %v2084_v29 = vmax.f32.f32 %v1892_v55, %v1988_v2  ;;  %v1440_v58 = vsub.f32 %v5408_v1, %v1125_v4  ;;  %v1030_v36 = vsel %vm1002_vm0, %v671_v40, %v863_v0  ;;  %v5410_v2 = vld [vmem:[#allocation64_spill] sm:$0xff] }
 0x111   :  { %v2962_v12 = vadd.f32 %v2961_v11, %v2867_v23  ;;  %v1605_v7 = vand.u32 2147483647, %v1247_v16  ;;  %v1701_v28 = vand.u32 2147483647, %v1248_v22  ;;  %v1893_v31 = vand.u32 2147483647, %v1439_v54  ;;  %920 = vrot.lane.b32.xlu1 %v3553_v39, %s3146_s6  ;;  %v865_v1 = vpop.permute.xlu1 %864 }
 0x112   :  { %v2180_v61 = vadd.f32 %v2084_v29, %v1796_v46  ;;  %v1989_v5 = vand.u32 2147483647, %v1440_v58  ;;  %v1126_v55 = vsel %vm1002_vm0, %v863_v0, %v671_v40  ;;  %v1249_v11 = vadd.f32 %v1030_v36, %v5409_v15  ;;  %v673_v23 = vpop.permute.xlu0 %672  ;;  %v180_v0 = vld [vmem:[#allocation2 + $0x460] sm:$0xff] }
 0x113   :  { %728 = vrot.lane.b32.xlu0 %v3555_v38, %s3146_s6  ;;  %v1797_v35 = vmax.f32.f32 %v1605_v7, %v1701_v28  ;;  %v1250_v4 = vadd.f32 %v1126_v55, %v5410_v2  ;;  %v1441_v16 = vsub.f32 %v5409_v15, %v1030_v36  ;;  %v1442_v54 = vsub.f32 %v5410_v2, %v1126_v55  ;;  %v372_v58 = vld [vmem:[#allocation5 + $0x460] sm:$0xff] }
 0x114   :  { %v2868_v46 = vsel %vm2747_vm2, %v2180_v61, 0.0  ;;  %v2085_v22 = vmax.f32.f32 %v1893_v31, %v1989_v5  ;;  %v4014_v29 = vsub.f32 %v181_v10, %v373_v6  ;;  %v1606_v7 = vand.u32 2147483647, %v1249_v11  ;;  %v5412_v6 = vld [vmem:[#allocation67_spill] sm:$0xff]  ;;  %v5413_v5 = vld [vmem:[#allocation66_spill] sm:$0xff] }
 0x115   :  { %v2963_v40 = vadd.f32 %v2962_v12, %v2868_v46  ;;  %v1702_v28 = vand.u32 2147483647, %v1250_v4  ;;  %v1894_v39 = vand.u32 2147483647, %v1441_v16  ;;  %922 = vrot.lane.b32.xlu1 %v3557_v25, %s3146_s6  ;;  %v1990_v15 = vand.u32 2147483647, %v1442_v54  ;;  %v867_v2 = vpop.permute.xlu1 %866 }
 0x116   :  { %5411 = vst [vmem:[#allocation20_spill] sm:$0xff] %v4014_v29  ;;  %v2181_v36 = vadd.f32 %v2085_v22, %v1797_v35  ;;  %v1031_v61 = vsel %vm1002_vm0, %v673_v23, %v865_v1  ;;  %v1127_v31 = vsel %vm1002_vm0, %v865_v1, %v673_v23  ;;  %v675_v46 = vpop.permute.xlu0 %674  ;;  %v4030_v22 = vsub.f32 %v180_v0, %v372_v58  ;;  %v183_v1 = vld [vmem:[#allocation2 + $0x478] sm:$0xff] }
 0x117   :  { %730 = vrot.lane.b32.xlu0 %v3559_v57, %s3146_s6  ;;  %v1798_v10 = vmax.f32.f32 %v1606_v7, %v1702_v28  ;;  %v1251_v12 = vadd.f32 %v1031_v61, %v5412_v6  ;;  %v1252_v55 = vadd.f32 %v1127_v31, %v5413_v5  ;;  %v1443_v11 = vsub.f32 %v5412_v6, %v1031_v61  ;;  %v375_v54 = vld [vmem:[#allocation5 + $0x478] sm:$0xff] }
 0x118   :  { %v2869_v35 = vsel %vm2747_vm2, %v2181_v36, 0.0  ;;  %v2086_v4 = vmax.f32.f32 %v1894_v39, %v1990_v15  ;;  %v1444_v16 = vsub.f32 %v5413_v5, %v1127_v31  ;;  %v1032_v36 = vsel %vm1002_vm0, %v675_v46, %v867_v2 }
 0x119   :  { %v2964_v23 = vadd.f32 %v2963_v40, %v2869_v35  ;;  %v1607_v7 = vand.u32 2147483647, %v1251_v12  ;;  %v1703_v28 = vand.u32 2147483647, %v1252_v55  ;;  %v1895_v25 = vand.u32 2147483647, %v1443_v11  ;;  %924 = vrot.lane.b32.xlu1 %v3569_v19, %s3146_s6  ;;  %v869_v31 = vpop.permute.xlu1 %868 }
 0x11a   :  { %v2182_v61 = vadd.f32 %v2086_v4, %v1798_v10  ;;  %v1991_v6 = vand.u32 2147483647, %v1444_v16  ;;  %v1128_v39 = vsel %vm1002_vm0, %v867_v2, %v675_v46  ;;  %v1253_v58 = vadd.f32 %v1032_v36, %v3424_v17  ;;  %v182_v2 = vld [vmem:[#allocation2 + $0x470] sm:$0xff] }
 0x11b   :  { %732 = vrot.lane.b32.xlu0 %v3571_v8, %s3146_s6  ;;  %v1799_v0 = vmax.f32.f32 %v1607_v7, %v1703_v28  ;;  %v1254_v40 = vadd.f32 %v1128_v39, %v3422_v53  ;;  %v1445_v15 = vsub.f32 %v3424_v17, %v1032_v36  ;;  %v1446_v5 = vsub.f32 %v3422_v53, %v1128_v39  ;;  %v374_v35 = vld [vmem:[#allocation5 + $0x470] sm:$0xff] }
 0x11c   :  { %v2870_v10 = vsel %vm2747_vm2, %v2182_v61, 0.0  ;;  %v2087_v12 = vmax.f32.f32 %v1895_v25, %v1991_v6  ;;  %v4046_v11 = vsub.f32 %v183_v1, %v375_v54  ;;  %v1608_v16 = vand.u32 2147483647, %v1253_v58 }
 0x11d   :  { %v677_v55 = vpop.permute.xlu0 %676  ;;  %v2965_v4 = vadd.f32 %v2964_v23, %v2870_v10  ;;  %v1704_v46 = vand.u32 2147483647, %v1254_v40  ;;  %v1896_v7 = vand.u32 2147483647, %v1445_v15  ;;  %926 = vrot.lane.b32.xlu1 %v3581_v60, %s3146_s6  ;;  %v1992_v28 = vand.u32 2147483647, %v1446_v5 }
 0x11e   :  { %5414 = vst [vmem:[#allocation19_spill] sm:$0xff] %v4046_v11  ;;  %v2183_v17 = vadd.f32 %v2087_v12, %v1799_v0  ;;  %v1033_v61 = vsel %vm1002_vm0, %v677_v55, %v869_v31  ;;  %v1129_v53 = vsel %vm1002_vm0, %v869_v31, %v677_v55  ;;  %v871_v6 = vpop.permute.xlu1 %870  ;;  %v4062_v40 = vsub.f32 %v182_v2, %v374_v35  ;;  %v185_v15 = vld [vmem:[#allocation2 + $0x488] sm:$0xff] }
 0x11f   :  { %734 = vrot.lane.b32.xlu0 %v3583_v51, %s3146_s6  ;;  %v1800_v25 = vmax.f32.f32 %v1608_v16, %v1704_v46  ;;  %v1255_v1 = vadd.f32 %v1033_v61, %v5311_v26  ;;  %v1256_v54 = vadd.f32 %v1129_v53, %v3428_v9  ;;  %v1447_v23 = vsub.f32 %v5311_v26, %v1033_v61  ;;  %v377_v31 = vld [vmem:[#allocation5 + $0x488] sm:$0xff] }
 0x120   :  { %v2871_v36 = vsel %vm2747_vm2, %v2183_v17, 0.0  ;;  %v2088_v39 = vmax.f32.f32 %v1896_v7, %v1992_v28  ;;  %v1448_v0 = vsub.f32 %v3428_v9, %v1129_v53  ;;  %v5415_v16 = vld [vmem:[#allocation111_spill] sm:$0xff]  ;;  %v5416_v2 = vld [vmem:[#allocation112_spill] sm:$0xff]  ;;  %v5417_v7 = vld [vmem:[#allocation70_spill] sm:$0xff] }
 0x121   :  { %v679_v58 = vpop.permute.xlu0 %678  ;;  %v2966_v10 = vadd.f32 %v2965_v4, %v2871_v36  ;;  %v1609_v12 = vand.u32 2147483647, %v1255_v1  ;;  %v1705_v5 = vand.u32 2147483647, %v1256_v54  ;;  %v1897_v55 = vand.u32 2147483647, %v1447_v23  ;;  %928 = vrot.lane.b32.xlu1 %v5415_v16, %s3146_s6 }
 0x122   :  { %v2184_v26 = vadd.f32 %v2088_v39, %v1800_v25  ;;  %v1993_v46 = vand.u32 2147483647, %v1448_v0  ;;  %v1034_v17 = vsel %vm1002_vm0, %v679_v58, %v871_v6  ;;  %v1130_v9 = vsel %vm1002_vm0, %v871_v6, %v679_v58  ;;  %v5418_v28 = vld [vmem:[#allocation69_spill] sm:$0xff]  ;;  %v873_v1 = vpop.permute.xlu1 %872  ;;  %v184_v6 = vld [vmem:[#allocation2 + $0x480] sm:$0xff] }
 0x123   :  { %736 = vrot.lane.b32.xlu0 %v5416_v2, %s3146_s6  ;;  %v1801_v35 = vmax.f32.f32 %v1609_v12, %v1705_v5  ;;  %v1257_v4 = vadd.f32 %v1034_v17, %v5417_v7  ;;  %v1258_v61 = vadd.f32 %v1130_v9, %v5418_v28  ;;  %v1449_v53 = vsub.f32 %v5417_v7, %v1034_v17  ;;  %v376_v0 = vld [vmem:[#allocation5 + $0x480] sm:$0xff]  ;;  %v5420_v2 = vld [vmem:[#allocation113_spill] sm:$0xff] }
 0x124   :  { %v2872_v25 = vsel %vm2747_vm2, %v2184_v26, 0.0  ;;  %v2089_v54 = vmax.f32.f32 %v1897_v55, %v1993_v46  ;;  %v1450_v23 = vsub.f32 %v5418_v28, %v1130_v9  ;;  %v4078_v39 = vsub.f32 %v185_v15, %v377_v31  ;;  %v5421_v15 = vld [vmem:[#allocation114_spill] sm:$0xff]  ;;  %v5422_v46 = vld [vmem:[#allocation72_spill] sm:$0xff]  ;;  %v5423_v9 = vld [vmem:[#allocation71_spill] sm:$0xff] }
 0x125   :  { %v681_v36 = vpop.permute.xlu0 %680  ;;  %v2967_v58 = vadd.f32 %v2966_v10, %v2872_v25  ;;  %v1610_v12 = vand.u32 2147483647, %v1257_v4  ;;  %v1706_v5 = vand.u32 2147483647, %v1258_v61  ;;  %v1898_v16 = vand.u32 2147483647, %v1449_v53  ;;  %930 = vrot.lane.b32.xlu1 %v5420_v2, %s3146_s6 }
 0x126   :  { %5419 = vst [vmem:[#allocation22_spill] sm:$0xff] %v4078_v39  ;;  %v2185_v17 = vadd.f32 %v2089_v54, %v1801_v35  ;;  %v1994_v7 = vand.u32 2147483647, %v1450_v23  ;;  %v1035_v26 = vsel %vm1002_vm0, %v681_v36, %v873_v1  ;;  %v1131_v55 = vsel %vm1002_vm0, %v873_v1, %v681_v36  ;;  %v187_v1 = vld [vmem:[#allocation2 + $0x498] sm:$0xff]  ;;  %v5424_v60 = vld [vmem:[#allocation11_spill] sm:$0xff] }
 0x127   :  { %738 = vrot.lane.b32.xlu0 %v5421_v15, %s3146_s6  ;;  %v1802_v31 = vmax.f32.f32 %v1610_v12, %v1706_v5  ;;  %v1259_v10 = vadd.f32 %v1035_v26, %v5422_v46  ;;  %v1260_v4 = vadd.f32 %v1131_v55, %v5423_v9  ;;  %v1451_v28 = vsub.f32 %v5422_v46, %v1035_v26  ;;  %v875_v61 = vpop.permute.xlu1 %874  ;;  %v379_v36 = vld [vmem:[#allocation5 + $0x498] sm:$0xff] }
 0x128   :  { %v2873_v35 = vsel %vm2747_vm2, %v2185_v17, 0.0  ;;  %v2090_v53 = vmax.f32.f32 %v1898_v16, %v1994_v7  ;;  %v1452_v25 = vsub.f32 %v5423_v9, %v1131_v55  ;;  %v4094_v23 = vsub.f32 %v184_v6, %v376_v0  ;;  %v5425_v6 = vld [vmem:[#allocation15_spill] sm:$0xff]  ;;  %v5426_v7 = vld [vmem:[#allocation74_spill] sm:$0xff]  ;;  %v5427_v55 = vld [vmem:[#allocation73_spill] sm:$0xff] }
 0x129   :  { %v683_v54 = vpop.permute.xlu0 %682  ;;  %v2968_v2 = vadd.f32 %v2967_v58, %v2873_v35  ;;  %v1611_v12 = vand.u32 2147483647, %v1259_v10  ;;  %v1707_v5 = vand.u32 2147483647, %v1260_v4  ;;  %v1899_v15 = vand.u32 2147483647, %v1451_v28  ;;  %932 = vrot.lane.b32.xlu1 %v5424_v60, %s3146_s6 }
 0x12a   :  { %v2186_v26 = vadd.f32 %v2090_v53, %v1802_v31  ;;  %v1995_v46 = vand.u32 2147483647, %v1452_v25  ;;  %v1036_v17 = vsel %vm1002_vm0, %v683_v54, %v875_v61  ;;  %v1132_v16 = vsel %vm1002_vm0, %v875_v61, %v683_v54  ;;  %v186_v61 = vld [vmem:[#allocation2 + $0x490] sm:$0xff] }
 0x12b   :  { %740 = vrot.lane.b32.xlu0 %v5425_v6, %s3146_s6  ;;  %v1803_v0 = vmax.f32.f32 %v1611_v12, %v1707_v5  ;;  %v1261_v58 = vadd.f32 %v1036_v17, %v5426_v7  ;;  %v1262_v10 = vadd.f32 %v1132_v16, %v5427_v55  ;;  %v1453_v9 = vsub.f32 %v5426_v7, %v1036_v17  ;;  %v877_v4 = vpop.permute.xlu1 %876  ;;  %v378_v54 = vld [vmem:[#allocation5 + $0x490] sm:$0xff] }
 0x12c   :  { %v2874_v31 = vsel %vm2747_vm2, %v2186_v26, 0.0  ;;  %v2091_v28 = vmax.f32.f32 %v1899_v15, %v1995_v46  ;;  %v1454_v35 = vsub.f32 %v5427_v55, %v1132_v16  ;;  %v4110_v25 = vsub.f32 %v187_v1, %v379_v36  ;;  %v5429_v36 = vld [vmem:[#allocation76_spill] sm:$0xff]  ;;  %v5430_v46 = vld [vmem:[#allocation75_spill] sm:$0xff] }
 0x12d   :  { %v685_v53 = vpop.permute.xlu0 %684  ;;  %v2969_v60 = vadd.f32 %v2968_v2, %v2874_v31  ;;  %v1612_v12 = vand.u32 2147483647, %v1261_v58  ;;  %v1708_v5 = vand.u32 2147483647, %v1262_v10  ;;  %v1900_v6 = vand.u32 2147483647, %v1453_v9  ;;  %934 = vrot.lane.b32.xlu1 %v3772_v30, %s3146_s6 }
 0x12e   :  { %5428 = vst [vmem:[#allocation21_spill] sm:$0xff] %v4110_v25  ;;  %v2187_v17 = vadd.f32 %v2091_v28, %v1803_v0  ;;  %v1996_v7 = vand.u32 2147483647, %v1454_v35  ;;  %v1037_v26 = vsel %vm1002_vm0, %v685_v53, %v877_v4  ;;  %v1133_v15 = vsel %vm1002_vm0, %v877_v4, %v685_v53  ;;  %v189_v4 = vld [vmem:[#allocation2 + $0x4a8] sm:$0xff] }
 0x12f   :  { %742 = vrot.lane.b32.xlu0 %v3792_v47, %s3146_s6  ;;  %v1804_v1 = vmax.f32.f32 %v1612_v12, %v1708_v5  ;;  %v1263_v2 = vadd.f32 %v1037_v26, %v5429_v36  ;;  %v1264_v16 = vadd.f32 %v1133_v15, %v5430_v46  ;;  %v1455_v58 = vsub.f32 %v5429_v36, %v1037_v26  ;;  %v879_v55 = vpop.permute.xlu1 %878  ;;  %v381_v35 = vld [vmem:[#allocation5 + $0x4a8] sm:$0xff] }
 0x130   :  { %v2875_v0 = vsel %vm2747_vm2, %v2187_v17, 0.0  ;;  %v2092_v10 = vmax.f32.f32 %v1900_v6, %v1996_v7  ;;  %v1456_v9 = vsub.f32 %v5430_v46, %v1133_v15  ;;  %v4126_v28 = vsub.f32 %v186_v61, %v378_v54  ;;  %v5431_v54 = vld [vmem:[#allocation78_spill] sm:$0xff]  ;;  %v5432_v7 = vld [vmem:[#allocation77_spill] sm:$0xff] }
 0x131   :  { %v687_v31 = vpop.permute.xlu0 %686  ;;  %v2970_v53 = vadd.f32 %v2969_v60, %v2875_v0  ;;  %v1613_v12 = vand.u32 2147483647, %v1263_v2  ;;  %v1709_v5 = vand.u32 2147483647, %v1264_v16  ;;  %v1901_v30 = vand.u32 2147483647, %v1455_v58  ;;  %936 = vrot.lane.b32.xlu1 %v3806_v42, %s3146_s6 }
 0x132   :  { %v2188_v26 = vadd.f32 %v2092_v10, %v1804_v1  ;;  %v1997_v36 = vand.u32 2147483647, %v1456_v9  ;;  %v1038_v17 = vsel %vm1002_vm0, %v687_v31, %v879_v55  ;;  %v1134_v6 = vsel %vm1002_vm0, %v879_v55, %v687_v31  ;;  %v188_v55 = vld [vmem:[#allocation2 + $0x4a0] sm:$0xff] }
 0x133   :  { %744 = vrot.lane.b32.xlu0 %v3838_v3, %s3146_s6  ;;  %v1805_v61 = vmax.f32.f32 %v1613_v12, %v1709_v5  ;;  %v1265_v60 = vadd.f32 %v1038_v17, %v5431_v54  ;;  %v1266_v15 = vadd.f32 %v1134_v6, %v5432_v7  ;;  %v1457_v2 = vsub.f32 %v5431_v54, %v1038_v17  ;;  %v881_v46 = vpop.permute.xlu1 %880  ;;  %v380_v9 = vld [vmem:[#allocation5 + $0x4a0] sm:$0xff] }
 0x134   :  { %v2876_v1 = vsel %vm2747_vm2, %v2188_v26, 0.0  ;;  %v2093_v16 = vmax.f32.f32 %v1901_v30, %v1997_v36  ;;  %v1458_v58 = vsub.f32 %v5432_v7, %v1134_v6  ;;  %v4142_v10 = vsub.f32 %v189_v4, %v381_v35  ;;  %v5434_v35 = vld [vmem:[#allocation80_spill] sm:$0xff]  ;;  %v5435_v36 = vld [vmem:[#allocation79_spill] sm:$0xff] }
 0x135   :  { %v689_v0 = vpop.permute.xlu0 %688  ;;  %v2971_v31 = vadd.f32 %v2970_v53, %v2876_v1  ;;  %v1614_v12 = vand.u32 2147483647, %v1265_v60  ;;  %v1710_v5 = vand.u32 2147483647, %v1266_v15  ;;  %v1902_v42 = vand.u32 2147483647, %v1457_v2  ;;  %938 = vrot.lane.b32.xlu1 %v3854_v50, %s3146_s6 }
 0x136   :  { %5433 = vst [vmem:[#allocation24_spill] sm:$0xff] %v4142_v10  ;;  %v2189_v17 = vadd.f32 %v2093_v16, %v1805_v61  ;;  %v1998_v54 = vand.u32 2147483647, %v1458_v58  ;;  %v1039_v26 = vsel %vm1002_vm0, %v689_v0, %v881_v46  ;;  %v1135_v30 = vsel %vm1002_vm0, %v881_v46, %v689_v0  ;;  %v191_v46 = vld [vmem:[#allocation2 + $0x4b8] sm:$0xff] }
 0x137   :  { %746 = vrot.lane.b32.xlu0 %v3870_v56, %s3146_s6  ;;  %v1806_v4 = vmax.f32.f32 %v1614_v12, %v1710_v5  ;;  %v1267_v53 = vadd.f32 %v1039_v26, %v5434_v35  ;;  %v1268_v6 = vadd.f32 %v1135_v30, %v5435_v36  ;;  %v1459_v60 = vsub.f32 %v5434_v35, %v1039_v26  ;;  %v883_v7 = vpop.permute.xlu1 %882  ;;  %v383_v58 = vld [vmem:[#allocation5 + $0x4b8] sm:$0xff] }
 0x138   :  { %v2877_v61 = vsel %vm2747_vm2, %v2189_v17, 0.0  ;;  %v2094_v15 = vmax.f32.f32 %v1902_v42, %v1998_v54  ;;  %v1460_v2 = vsub.f32 %v5435_v36, %v1135_v30  ;;  %v4158_v16 = vsub.f32 %v188_v55, %v380_v9  ;;  %v5436_v9 = vld [vmem:[#allocation82_spill] sm:$0xff]  ;;  %v5437_v54 = vld [vmem:[#allocation81_spill] sm:$0xff] }
 0x139   :  { %v691_v1 = vpop.permute.xlu0 %690  ;;  %v2972_v0 = vadd.f32 %v2971_v31, %v2877_v61  ;;  %v1615_v12 = vand.u32 2147483647, %v1267_v53  ;;  %v1711_v5 = vand.u32 2147483647, %v1268_v6  ;;  %v1903_v50 = vand.u32 2147483647, %v1459_v60  ;;  %940 = vrot.lane.b32.xlu1 %v3886_v45, %s3146_s6 }
 0x13a   :  { %v2190_v26 = vadd.f32 %v2094_v15, %v1806_v4  ;;  %v1999_v35 = vand.u32 2147483647, %v1460_v2  ;;  %v1040_v17 = vsel %vm1002_vm0, %v691_v1, %v883_v7  ;;  %v1136_v42 = vsel %vm1002_vm0, %v883_v7, %v691_v1  ;;  %v190_v7 = vld [vmem:[#allocation2 + $0x4b0] sm:$0xff] }
 0x13b   :  { %748 = vrot.lane.b32.xlu0 %v3902_v48, %s3146_s6  ;;  %v1807_v55 = vmax.f32.f32 %v1615_v12, %v1711_v5  ;;  %v1269_v31 = vadd.f32 %v1040_v17, %v5436_v9  ;;  %v1270_v30 = vadd.f32 %v1136_v42, %v5437_v54  ;;  %v1461_v53 = vsub.f32 %v5436_v9, %v1040_v17  ;;  %v885_v36 = vpop.permute.xlu1 %884  ;;  %v382_v2 = vld [vmem:[#allocation5 + $0x4b0] sm:$0xff] }
 0x13c   :  { %v2878_v4 = vsel %vm2747_vm2, %v2190_v26, 0.0  ;;  %v2095_v6 = vmax.f32.f32 %v1903_v50, %v1999_v35  ;;  %v1462_v60 = vsub.f32 %v5437_v54, %v1136_v42  ;;  %v4174_v15 = vsub.f32 %v191_v46, %v383_v58  ;;  %v5438_v58 = vld [vmem:[#allocation84_spill] sm:$0xff]  ;;  %v5439_v35 = vld [vmem:[#allocation83_spill] sm:$0xff] }
 0x13d   :  { %v693_v61 = vpop.permute.xlu0 %692  ;;  %v2973_v1 = vadd.f32 %v2972_v0, %v2878_v4  ;;  %v1616_v12 = vand.u32 2147483647, %v1269_v31  ;;  %v1712_v5 = vand.u32 2147483647, %v1270_v30  ;;  %v1904_v45 = vand.u32 2147483647, %v1461_v53  ;;  %942 = vrot.lane.b32.xlu1 %v3918_v33, %s3146_s6 }
 0x13e   :  { %v2191_v17 = vadd.f32 %v2095_v6, %v1807_v55  ;;  %v2000_v9 = vand.u32 2147483647, %v1462_v60  ;;  %v1041_v26 = vsel %vm1002_vm0, %v693_v61, %v885_v36  ;;  %v1137_v50 = vsel %vm1002_vm0, %v885_v36, %v693_v61  ;;  %v193_v36 = vld [vmem:[#allocation2 + $0x4c8] sm:$0xff] }
 0x13f   :  { %750 = vrot.lane.b32.xlu0 %v3934_v59, %s3146_s6  ;;  %v1808_v46 = vmax.f32.f32 %v1616_v12, %v1712_v5  ;;  %v1271_v0 = vadd.f32 %v1041_v26, %v5438_v58  ;;  %v1272_v42 = vadd.f32 %v1137_v50, %v5439_v35  ;;  %v1463_v31 = vsub.f32 %v5438_v58, %v1041_v26  ;;  %v887_v54 = vpop.permute.xlu1 %886  ;;  %v385_v60 = vld [vmem:[#allocation5 + $0x4c8] sm:$0xff] }
 0x140   :  { %v2879_v55 = vsel %vm2747_vm2, %v2191_v17, 0.0  ;;  %v2096_v30 = vmax.f32.f32 %v1904_v45, %v2000_v9  ;;  %v1464_v53 = vsub.f32 %v5439_v35, %v1137_v50  ;;  %v4190_v6 = vsub.f32 %v190_v7, %v382_v2  ;;  %v5440_v2 = vld [vmem:[#allocation86_spill] sm:$0xff]  ;;  %v5441_v9 = vld [vmem:[#allocation85_spill] sm:$0xff] }
 0x141   :  { %v695_v4 = vpop.permute.xlu0 %694  ;;  %v2974_v61 = vadd.f32 %v2973_v1, %v2879_v55  ;;  %v1617_v12 = vand.u32 2147483647, %v1271_v0  ;;  %v1713_v5 = vand.u32 2147483647, %v1272_v42  ;;  %v1905_v33 = vand.u32 2147483647, %v1463_v31  ;;  %944 = vrot.lane.b32.xlu1 %v3950_v27, %s3146_s6 }
 0x142   :  { %v2192_v26 = vadd.f32 %v2096_v30, %v1808_v46  ;;  %v2001_v58 = vand.u32 2147483647, %v1464_v53  ;;  %v1042_v17 = vsel %vm1002_vm0, %v695_v4, %v887_v54  ;;  %v1138_v45 = vsel %vm1002_vm0, %v887_v54, %v695_v4  ;;  %v192_v54 = vld [vmem:[#allocation2 + $0x4c0] sm:$0xff] }
 0x143   :  { %752 = vrot.lane.b32.xlu0 %v3966_v21, %s3146_s6  ;;  %v1809_v7 = vmax.f32.f32 %v1617_v12, %v1713_v5  ;;  %v1273_v1 = vadd.f32 %v1042_v17, %v5440_v2  ;;  %v1274_v50 = vadd.f32 %v1138_v45, %v5441_v9  ;;  %v1465_v0 = vsub.f32 %v5440_v2, %v1042_v17  ;;  %v889_v35 = vpop.permute.xlu1 %888  ;;  %v384_v53 = vld [vmem:[#allocation5 + $0x4c0] sm:$0xff] }
 0x144   :  { %v2880_v46 = vsel %vm2747_vm2, %v2192_v26, 0.0  ;;  %v2097_v42 = vmax.f32.f32 %v1905_v33, %v2001_v58  ;;  %v1466_v31 = vsub.f32 %v5441_v9, %v1138_v45  ;;  %v4206_v30 = vsub.f32 %v193_v36, %v385_v60  ;;  %v5442_v60 = vld [vmem:[#allocation88_spill] sm:$0xff]  ;;  %v5443_v58 = vld [vmem:[#allocation87_spill] sm:$0xff] }
 0x145   :  { %v697_v55 = vpop.permute.xlu0 %696  ;;  %v2975_v4 = vadd.f32 %v2974_v61, %v2880_v46  ;;  %v1618_v12 = vand.u32 2147483647, %v1273_v1  ;;  %v1714_v5 = vand.u32 2147483647, %v1274_v50  ;;  %v1906_v27 = vand.u32 2147483647, %v1465_v0  ;;  %946 = vrot.lane.b32.xlu1 %v3982_v37, %s3146_s6 }
 0x146   :  { %v2193_v17 = vadd.f32 %v2097_v42, %v1809_v7  ;;  %v2002_v2 = vand.u32 2147483647, %v1466_v31  ;;  %v1043_v26 = vsel %vm1002_vm0, %v697_v55, %v889_v35  ;;  %v1139_v33 = vsel %vm1002_vm0, %v889_v35, %v697_v55  ;;  %v195_v35 = vld [vmem:[#allocation2 + $0x4d8] sm:$0xff] }
 0x147   :  { %754 = vrot.lane.b32.xlu0 %v3998_v63, %s3146_s6  ;;  %v1810_v36 = vmax.f32.f32 %v1618_v12, %v1714_v5  ;;  %v1275_v61 = vadd.f32 %v1043_v26, %v5442_v60  ;;  %v1276_v45 = vadd.f32 %v1139_v33, %v5443_v58  ;;  %v1467_v1 = vsub.f32 %v5442_v60, %v1043_v26  ;;  %v891_v9 = vpop.permute.xlu1 %890  ;;  %v387_v31 = vld [vmem:[#allocation5 + $0x4d8] sm:$0xff] }
 0x148   :  { %v2881_v7 = vsel %vm2747_vm2, %v2193_v17, 0.0  ;;  %v2098_v50 = vmax.f32.f32 %v1906_v27, %v2002_v2  ;;  %v1468_v0 = vsub.f32 %v5443_v58, %v1139_v33  ;;  %v4222_v42 = vsub.f32 %v192_v54, %v384_v53  ;;  %v5444_v53 = vld [vmem:[#allocation90_spill] sm:$0xff]  ;;  %v5445_v2 = vld [vmem:[#allocation89_spill] sm:$0xff] }
 0x149   :  { %v699_v46 = vpop.permute.xlu0 %698  ;;  %v2976_v55 = vadd.f32 %v2975_v4, %v2881_v7  ;;  %v1619_v12 = vand.u32 2147483647, %v1275_v61  ;;  %v1715_v5 = vand.u32 2147483647, %v1276_v45  ;;  %v1907_v37 = vand.u32 2147483647, %v1467_v1  ;;  %948 = vrot.lane.b32.xlu1 %v4014_v29, %s3146_s6 }
 0x14a   :  { %v2194_v26 = vadd.f32 %v2098_v50, %v1810_v36  ;;  %v2003_v60 = vand.u32 2147483647, %v1468_v0  ;;  %v1044_v17 = vsel %vm1002_vm0, %v699_v46, %v891_v9  ;;  %v1140_v27 = vsel %vm1002_vm0, %v891_v9, %v699_v46  ;;  %v194_v9 = vld [vmem:[#allocation2 + $0x4d0] sm:$0xff] }
 0x14b   :  { %756 = vrot.lane.b32.xlu0 %v4030_v22, %s3146_s6  ;;  %v1811_v54 = vmax.f32.f32 %v1619_v12, %v1715_v5  ;;  %v1277_v4 = vadd.f32 %v1044_v17, %v5444_v53  ;;  %v1278_v33 = vadd.f32 %v1140_v27, %v5445_v2  ;;  %v1469_v61 = vsub.f32 %v5444_v53, %v1044_v17  ;;  %v893_v58 = vpop.permute.xlu1 %892  ;;  %v386_v0 = vld [vmem:[#allocation5 + $0x4d0] sm:$0xff] }
 0x14c   :  { %v2882_v36 = vsel %vm2747_vm2, %v2194_v26, 0.0  ;;  %v2099_v45 = vmax.f32.f32 %v1907_v37, %v2003_v60  ;;  %v1470_v1 = vsub.f32 %v5445_v2, %v1140_v27  ;;  %v4238_v50 = vsub.f32 %v195_v35, %v387_v31  ;;  %v5446_v31 = vld [vmem:[#allocation92_spill] sm:$0xff]  ;;  %v5447_v60 = vld [vmem:[#allocation91_spill] sm:$0xff] }
 0x14d   :  { %v701_v7 = vpop.permute.xlu0 %700  ;;  %v2977_v46 = vadd.f32 %v2976_v55, %v2882_v36  ;;  %v1620_v12 = vand.u32 2147483647, %v1277_v4  ;;  %v1716_v5 = vand.u32 2147483647, %v1278_v33  ;;  %v1908_v29 = vand.u32 2147483647, %v1469_v61  ;;  %950 = vrot.lane.b32.xlu1 %v4046_v11, %s3146_s6 }
 0x14e   :  { %v2195_v17 = vadd.f32 %v2099_v45, %v1811_v54  ;;  %v2004_v53 = vand.u32 2147483647, %v1470_v1  ;;  %v1045_v26 = vsel %vm1002_vm0, %v701_v7, %v893_v58  ;;  %v1141_v37 = vsel %vm1002_vm0, %v893_v58, %v701_v7  ;;  %v197_v58 = vld [vmem:[#allocation2 + $0x4e8] sm:$0xff] }
 0x14f   :  { %758 = vrot.lane.b32.xlu0 %v4062_v40, %s3146_s6  ;;  %v1812_v35 = vmax.f32.f32 %v1620_v12, %v1716_v5  ;;  %v1279_v55 = vadd.f32 %v1045_v26, %v5446_v31  ;;  %v1280_v27 = vadd.f32 %v1141_v37, %v5447_v60  ;;  %v1471_v4 = vsub.f32 %v5446_v31, %v1045_v26  ;;  %v895_v2 = vpop.permute.xlu1 %894  ;;  %v389_v1 = vld [vmem:[#allocation5 + $0x4e8] sm:$0xff] }
 0x150   :  { %v2883_v54 = vsel %vm2747_vm2, %v2195_v17, 0.0  ;;  %v2100_v33 = vmax.f32.f32 %v1908_v29, %v2004_v53  ;;  %v1472_v61 = vsub.f32 %v5447_v60, %v1141_v37  ;;  %v4254_v45 = vsub.f32 %v194_v9, %v386_v0  ;;  %v5448_v0 = vld [vmem:[#allocation94_spill] sm:$0xff]  ;;  %v5449_v53 = vld [vmem:[#allocation93_spill] sm:$0xff] }
 0x151   :  { %v703_v36 = vpop.permute.xlu0 %702  ;;  %v2978_v7 = vadd.f32 %v2977_v46, %v2883_v54  ;;  %v1621_v12 = vand.u32 2147483647, %v1279_v55  ;;  %v1717_v5 = vand.u32 2147483647, %v1280_v27  ;;  %v1909_v11 = vand.u32 2147483647, %v1471_v4  ;;  %952 = vrot.lane.b32.xlu1 %v4078_v39, %s3146_s6 }
 0x152   :  { %v2196_v26 = vadd.f32 %v2100_v33, %v1812_v35  ;;  %v2005_v31 = vand.u32 2147483647, %v1472_v61  ;;  %v1046_v17 = vsel %vm1002_vm0, %v703_v36, %v895_v2  ;;  %v1142_v29 = vsel %vm1002_vm0, %v895_v2, %v703_v36  ;;  %v196_v2 = vld [vmem:[#allocation2 + $0x4e0] sm:$0xff] }
 0x153   :  { %760 = vrot.lane.b32.xlu0 %v4094_v23, %s3146_s6  ;;  %v1813_v9 = vmax.f32.f32 %v1621_v12, %v1717_v5  ;;  %v1281_v46 = vadd.f32 %v1046_v17, %v5448_v0  ;;  %v1282_v37 = vadd.f32 %v1142_v29, %v5449_v53  ;;  %v1473_v55 = vsub.f32 %v5448_v0, %v1046_v17  ;;  %v897_v60 = vpop.permute.xlu1 %896  ;;  %v388_v61 = vld [vmem:[#allocation5 + $0x4e0] sm:$0xff] }
 0x154   :  { %v2884_v35 = vsel %vm2747_vm2, %v2196_v26, 0.0  ;;  %v2101_v27 = vmax.f32.f32 %v1909_v11, %v2005_v31  ;;  %v1474_v4 = vsub.f32 %v5449_v53, %v1142_v29  ;;  %v4270_v33 = vsub.f32 %v197_v58, %v389_v1  ;;  %v5450_v1 = vld [vmem:[#allocation96_spill] sm:$0xff]  ;;  %v5451_v31 = vld [vmem:[#allocation95_spill] sm:$0xff] }
 0x155   :  { %v705_v54 = vpop.permute.xlu0 %704  ;;  %v2979_v36 = vadd.f32 %v2978_v7, %v2884_v35  ;;  %v1622_v12 = vand.u32 2147483647, %v1281_v46  ;;  %v1718_v5 = vand.u32 2147483647, %v1282_v37  ;;  %v1910_v39 = vand.u32 2147483647, %v1473_v55  ;;  %954 = vrot.lane.b32.xlu1 %v4110_v25, %s3146_s6 }
 0x156   :  { %v2197_v17 = vadd.f32 %v2101_v27, %v1813_v9  ;;  %v2006_v0 = vand.u32 2147483647, %v1474_v4  ;;  %v1047_v26 = vsel %vm1002_vm0, %v705_v54, %v897_v60  ;;  %v1143_v11 = vsel %vm1002_vm0, %v897_v60, %v705_v54  ;;  %v199_v60 = vld [vmem:[#allocation2 + $0x4f8] sm:$0xff] }
 0x157   :  { %762 = vrot.lane.b32.xlu0 %v4126_v28, %s3146_s6  ;;  %v1814_v58 = vmax.f32.f32 %v1622_v12, %v1718_v5  ;;  %v1283_v7 = vadd.f32 %v1047_v26, %v5450_v1  ;;  %v1284_v29 = vadd.f32 %v1143_v11, %v5451_v31  ;;  %v1475_v46 = vsub.f32 %v5450_v1, %v1047_v26  ;;  %v899_v53 = vpop.permute.xlu1 %898  ;;  %v391_v4 = vld [vmem:[#allocation5 + $0x4f8] sm:$0xff] }
 0x158   :  { %v2885_v9 = vsel %vm2747_vm2, %v2197_v17, 0.0  ;;  %v2102_v37 = vmax.f32.f32 %v1910_v39, %v2006_v0  ;;  %v1476_v55 = vsub.f32 %v5451_v31, %v1143_v11  ;;  %v4286_v27 = vsub.f32 %v196_v2, %v388_v61  ;;  %v5452_v61 = vld [vmem:[#allocation98_spill] sm:$0xff]  ;;  %v5453_v0 = vld [vmem:[#allocation97_spill] sm:$0xff] }
 0x159   :  { %v707_v35 = vpop.permute.xlu0 %706  ;;  %v2980_v54 = vadd.f32 %v2979_v36, %v2885_v9  ;;  %v1623_v12 = vand.u32 2147483647, %v1283_v7  ;;  %v1719_v5 = vand.u32 2147483647, %v1284_v29  ;;  %v1911_v25 = vand.u32 2147483647, %v1475_v46  ;;  %956 = vrot.lane.b32.xlu1 %v4142_v10, %s3146_s6 }
 0x15a   :  { %v2198_v26 = vadd.f32 %v2102_v37, %v1814_v58  ;;  %v2007_v1 = vand.u32 2147483647, %v1476_v55  ;;  %v1048_v17 = vsel %vm1002_vm0, %v707_v35, %v899_v53  ;;  %v1144_v39 = vsel %vm1002_vm0, %v899_v53, %v707_v35  ;;  %v198_v53 = vld [vmem:[#allocation2 + $0x4f0] sm:$0xff] }
 0x15b   :  { %764 = vrot.lane.b32.xlu0 %v4158_v16, %s3146_s6  ;;  %v1815_v2 = vmax.f32.f32 %v1623_v12, %v1719_v5  ;;  %v1285_v36 = vadd.f32 %v1048_v17, %v5452_v61  ;;  %v1286_v11 = vadd.f32 %v1144_v39, %v5453_v0  ;;  %v1477_v7 = vsub.f32 %v5452_v61, %v1048_v17  ;;  %v901_v31 = vpop.permute.xlu1 %900  ;;  %v390_v55 = vld [vmem:[#allocation5 + $0x4f0] sm:$0xff] }
 0x15c   :  { %v2886_v58 = vsel %vm2747_vm2, %v2198_v26, 0.0  ;;  %v2103_v29 = vmax.f32.f32 %v1911_v25, %v2007_v1  ;;  %v1478_v46 = vsub.f32 %v5453_v0, %v1144_v39  ;;  %v4302_v37 = vsub.f32 %v199_v60, %v391_v4 }
 0x15d   :  { %v709_v9 = vpop.permute.xlu0 %708  ;;  %v2981_v35 = vadd.f32 %v2980_v54, %v2886_v58  ;;  %v1624_v12 = vand.u32 2147483647, %v1285_v36  ;;  %v1720_v5 = vand.u32 2147483647, %v1286_v11  ;;  %v1912_v10 = vand.u32 2147483647, %v1477_v7  ;;  %958 = vrot.lane.b32.xlu1 %v4174_v15, %s3146_s6 }
 0x15e   :  { %v2199_v17 = vadd.f32 %v2103_v29, %v1815_v2  ;;  %v2008_v61 = vand.u32 2147483647, %v1478_v46  ;;  %v1049_v26 = vsel %vm1002_vm0, %v709_v9, %v901_v31  ;;  %v1145_v25 = vsel %vm1002_vm0, %v901_v31, %v709_v9  ;;  %v201_v31 = vld [vmem:[#allocation2 + $0x508] sm:$0xff] }
 0x15f   :  { %766 = vrot.lane.b32.xlu0 %v4190_v6, %s3146_s6  ;;  %v1816_v60 = vmax.f32.f32 %v1624_v12, %v1720_v5  ;;  %v1287_v4 = vadd.f32 %v1049_v26, %v3507_v52  ;;  %v1288_v54 = vadd.f32 %v1145_v25, %v3505_v44  ;;  %v1479_v1 = vsub.f32 %v3507_v52, %v1049_v26  ;;  %v903_v39 = vpop.permute.xlu1 %902  ;;  %v393_v58 = vld [vmem:[#allocation5 + $0x508] sm:$0xff] }
 0x160   :  { %v2887_v2 = vsel %vm2747_vm2, %v2199_v17, 0.0  ;;  %v2104_v36 = vmax.f32.f32 %v1912_v10, %v2008_v61  ;;  %v1480_v0 = vsub.f32 %v3505_v44, %v1145_v25  ;;  %v4318_v7 = vsub.f32 %v198_v53, %v390_v55  ;;  %v5454_v55 = vld [vmem:[#allocation99_spill] sm:$0xff] }
 0x161   :  { %v711_v11 = vpop.permute.xlu0 %710  ;;  %v2982_v29 = vadd.f32 %v2981_v35, %v2887_v2  ;;  %v1625_v46 = vand.u32 2147483647, %v1287_v4  ;;  %v1721_v9 = vand.u32 2147483647, %v1288_v54  ;;  %v1913_v12 = vand.u32 2147483647, %v1479_v1  ;;  %960 = vrot.lane.b32.xlu1 %v4206_v30, %s3146_s6 }
 0x162   :  { %v2200_v52 = vadd.f32 %v2104_v36, %v1816_v60  ;;  %v2009_v5 = vand.u32 2147483647, %v1480_v0  ;;  %v1050_v17 = vsel %vm1002_vm0, %v711_v11, %v903_v39  ;;  %v1146_v44 = vsel %vm1002_vm0, %v903_v39, %v711_v11  ;;  %v200_v39 = vld [vmem:[#allocation2 + $0x500] sm:$0xff] }
 0x163   :  { %768 = vrot.lane.b32.xlu0 %v4222_v42, %s3146_s6  ;;  %v1817_v10 = vmax.f32.f32 %v1625_v46, %v1721_v9  ;;  %v1289_v53 = vadd.f32 %v1050_v17, %v5386_v43  ;;  %v1290_v35 = vadd.f32 %v1146_v44, %v5454_v55  ;;  %v1481_v61 = vsub.f32 %v5386_v43, %v1050_v17  ;;  %v905_v26 = vpop.permute.xlu1 %904  ;;  %v392_v2 = vld [vmem:[#allocation5 + $0x500] sm:$0xff] }
 0x164   :  { %v2888_v25 = vsel %vm2747_vm2, %v2200_v52, 0.0  ;;  %v2105_v60 = vmax.f32.f32 %v1913_v12, %v2009_v5  ;;  %v1482_v4 = vsub.f32 %v5454_v55, %v1146_v44  ;;  %v4334_v1 = vsub.f32 %v201_v31, %v393_v58 }
 0x165   :  { %v713_v54 = vpop.permute.xlu0 %712  ;;  %v2983_v36 = vadd.f32 %v2982_v29, %v2888_v25  ;;  %v1626_v0 = vand.u32 2147483647, %v1289_v53  ;;  %v1722_v11 = vand.u32 2147483647, %v1290_v35  ;;  %v1914_v46 = vand.u32 2147483647, %v1481_v61  ;;  %962 = vrot.lane.b32.xlu1 %v4238_v50, %s3146_s6 }
 0x166   :  { %v2201_v43 = vadd.f32 %v2105_v60, %v1817_v10  ;;  %v2010_v9 = vand.u32 2147483647, %v1482_v4  ;;  %v1051_v52 = vsel %vm1002_vm0, %v713_v54, %v905_v26  ;;  %v1147_v12 = vsel %vm1002_vm0, %v905_v26, %v713_v54  ;;  %v5455_v29 = vld [vmem:[#allocation101_spill] sm:$0xff] }
 0x167   :  { %770 = vrot.lane.b32.xlu0 %v4254_v45, %s3146_s6  ;;  %v1818_v31 = vmax.f32.f32 %v1626_v0, %v1722_v11  ;;  %v1291_v58 = vadd.f32 %v1051_v52, %v3517_v20  ;;  %v1292_v5 = vadd.f32 %v1147_v12, %v5455_v29  ;;  %v1483_v17 = vsub.f32 %v3517_v20, %v1051_v52  ;;  %v907_v44 = vpop.permute.xlu1 %906  ;;  %v203_v26 = vld [vmem:[#allocation2 + $0x518] sm:$0xff] }
 0x168   :  { %v2889_v10 = vsel %vm2747_vm2, %v2201_v43, 0.0  ;;  %v2106_v53 = vmax.f32.f32 %v1914_v46, %v2010_v9  ;;  %v1484_v55 = vsub.f32 %v5455_v29, %v1147_v12  ;;  %v4350_v61 = vsub.f32 %v200_v39, %v392_v2  ;;  %v395_v25 = vld [vmem:[#allocation5 + $0x518] sm:$0xff] }
 0x169   :  { %v715_v35 = vpop.permute.xlu0 %714  ;;  %v2984_v60 = vadd.f32 %v2983_v36, %v2889_v10  ;;  %v1627_v4 = vand.u32 2147483647, %v1291_v58  ;;  %v1723_v54 = vand.u32 2147483647, %v1292_v5  ;;  %v1915_v0 = vand.u32 2147483647, %v1483_v17  ;;  %964 = vrot.lane.b32.xlu1 %v4270_v33, %s3146_s6 }
 0x16a   :  { %v2202_v20 = vadd.f32 %v2106_v53, %v1818_v31  ;;  %v2011_v11 = vand.u32 2147483647, %v1484_v55  ;;  %v1052_v43 = vsel %vm1002_vm0, %v715_v35, %v907_v44  ;;  %v1148_v46 = vsel %vm1002_vm0, %v907_v44, %v715_v35  ;;  %v5456_v36 = vld [vmem:[#allocation102_spill] sm:$0xff]  ;;  %v202_v44 = vld [vmem:[#allocation2 + $0x510] sm:$0xff] }
 0x16b   :  { %772 = vrot.lane.b32.xlu0 %v4286_v27, %s3146_s6  ;;  %v1819_v39 = vmax.f32.f32 %v1627_v4, %v1723_v54  ;;  %v1293_v2 = vadd.f32 %v1052_v43, %v3521_v14  ;;  %v1294_v9 = vadd.f32 %v1148_v46, %v5456_v36  ;;  %v1485_v52 = vsub.f32 %v3521_v14, %v1052_v43  ;;  %v909_v12 = vpop.permute.xlu1 %908  ;;  %v394_v10 = vld [vmem:[#allocation5 + $0x510] sm:$0xff] }
 0x16c   :  { %v2890_v31 = vsel %vm2747_vm2, %v2202_v20, 0.0  ;;  %v2107_v58 = vmax.f32.f32 %v1915_v0, %v2011_v11  ;;  %v1486_v29 = vsub.f32 %v5456_v36, %v1148_v46  ;;  %v4366_v17 = vsub.f32 %v203_v26, %v395_v25 }
 0x16d   :  { %v717_v5 = vpop.permute.xlu0 %716  ;;  %v2985_v53 = vadd.f32 %v2984_v60, %v2890_v31  ;;  %v1628_v55 = vand.u32 2147483647, %v1293_v2  ;;  %v1724_v35 = vand.u32 2147483647, %v1294_v9  ;;  %v1916_v4 = vand.u32 2147483647, %v1485_v52  ;;  %966 = vrot.lane.b32.xlu1 %v4302_v37, %s3146_s6 }
 0x16e   :  { %v2203_v14 = vadd.f32 %v2107_v58, %v1819_v39  ;;  %v2012_v54 = vand.u32 2147483647, %v1486_v29  ;;  %v1053_v20 = vsel %vm1002_vm0, %v717_v5, %v909_v12  ;;  %v1149_v0 = vsel %vm1002_vm0, %v909_v12, %v717_v5  ;;  %v5457_v60 = vld [vmem:[#allocation103_spill] sm:$0xff] }
 0x16f   :  { %774 = vrot.lane.b32.xlu0 %v4318_v7, %s3146_s6  ;;  %v1820_v26 = vmax.f32.f32 %v1628_v55, %v1724_v35  ;;  %v1295_v25 = vadd.f32 %v1053_v20, %v3527_v34  ;;  %v1296_v11 = vadd.f32 %v1149_v0, %v5457_v60  ;;  %v1487_v43 = vsub.f32 %v3527_v34, %v1053_v20  ;;  %v911_v46 = vpop.permute.xlu1 %910  ;;  %v205_v12 = vld [vmem:[#allocation2 + $0x528] sm:$0xff] }
 0x170   :  { %v2891_v39 = vsel %vm2747_vm2, %v2203_v14, 0.0  ;;  %v2108_v2 = vmax.f32.f32 %v1916_v4, %v2012_v54  ;;  %v1488_v36 = vsub.f32 %v5457_v60, %v1149_v0  ;;  %v4382_v52 = vsub.f32 %v202_v44, %v394_v10  ;;  %v397_v31 = vld [vmem:[#allocation5 + $0x528] sm:$0xff] }
 0x171   :  { %v719_v9 = vpop.permute.xlu0 %718  ;;  %v2986_v58 = vadd.f32 %v2985_v53, %v2891_v39  ;;  %v1629_v29 = vand.u32 2147483647, %v1295_v25  ;;  %v1725_v5 = vand.u32 2147483647, %v1296_v11  ;;  %v1917_v55 = vand.u32 2147483647, %v1487_v43  ;;  %968 = vrot.lane.b32.xlu1 %v4334_v1, %s3146_s6 }
 0x172   :  { %v2204_v34 = vadd.f32 %v2108_v2, %v1820_v26  ;;  %v2013_v35 = vand.u32 2147483647, %v1488_v36  ;;  %v1054_v14 = vsel %vm1002_vm0, %v719_v9, %v911_v46  ;;  %v1150_v4 = vsel %vm1002_vm0, %v911_v46, %v719_v9  ;;  %v5458_v53 = vld [vmem:[#allocation104_spill] sm:$0xff]  ;;  %v204_v46 = vld [vmem:[#allocation2 + $0x520] sm:$0xff] }
 0x173   :  { %776 = vrot.lane.b32.xlu0 %v4350_v61, %s3146_s6  ;;  %v1821_v44 = vmax.f32.f32 %v1629_v29, %v1725_v5  ;;  %v1297_v10 = vadd.f32 %v1054_v14, %v3531_v41  ;;  %v1298_v54 = vadd.f32 %v1150_v4, %v5458_v53  ;;  %v1489_v20 = vsub.f32 %v3531_v41, %v1054_v14  ;;  %v913_v0 = vpop.permute.xlu1 %912  ;;  %v396_v39 = vld [vmem:[#allocation5 + $0x520] sm:$0xff] }
 0x174   :  { %v2892_v26 = vsel %vm2747_vm2, %v2204_v34, 0.0  ;;  %v2109_v25 = vmax.f32.f32 %v1917_v55, %v2013_v35  ;;  %v1490_v60 = vsub.f32 %v5458_v53, %v1150_v4  ;;  %v4398_v43 = vsub.f32 %v205_v12, %v397_v31 }
 0x175   :  { %v721_v11 = vpop.permute.xlu0 %720  ;;  %v2987_v2 = vadd.f32 %v2986_v58, %v2892_v26  ;;  %v1630_v36 = vand.u32 2147483647, %v1297_v10  ;;  %v1726_v9 = vand.u32 2147483647, %v1298_v54  ;;  %v1918_v29 = vand.u32 2147483647, %v1489_v20  ;;  %970 = vrot.lane.b32.xlu1 %v4366_v17, %s3146_s6 }
 0x176   :  { %5459 = vst [vmem:[#allocation23_spill] sm:$0xff] %v4398_v43  ;;  %v2205_v41 = vadd.f32 %v2109_v25, %v1821_v44  ;;  %v2014_v5 = vand.u32 2147483647, %v1490_v60  ;;  %v1055_v34 = vsel %vm1002_vm0, %v721_v11, %v913_v0  ;;  %v1151_v55 = vsel %vm1002_vm0, %v913_v0, %v721_v11  ;;  %v5460_v58 = vld [vmem:[#allocation105_spill] sm:$0xff] }
 0x177   :  { %778 = vrot.lane.b32.xlu0 %v4382_v52, %s3146_s6  ;;  %v1822_v12 = vmax.f32.f32 %v1630_v36, %v1726_v9  ;;  %v1299_v31 = vadd.f32 %v1055_v34, %v3537_v13  ;;  %v1300_v35 = vadd.f32 %v1151_v55, %v5460_v58  ;;  %v1491_v14 = vsub.f32 %v3537_v13, %v1055_v34  ;;  %v915_v4 = vpop.permute.xlu1 %914  ;;  %v207_v0 = vld [vmem:[#allocation2 + $0x538] sm:$0xff] }
 0x178   :  { %v2893_v44 = vsel %vm2747_vm2, %v2205_v41, 0.0  ;;  %v2110_v10 = vmax.f32.f32 %v1918_v29, %v2014_v5  ;;  %v1492_v53 = vsub.f32 %v5460_v58, %v1151_v55  ;;  %v4414_v20 = vsub.f32 %v204_v46, %v396_v39  ;;  %v399_v26 = vld [vmem:[#allocation5 + $0x538] sm:$0xff] }
 0x179   :  { %v723_v54 = vpop.permute.xlu0 %722  ;;  %v2988_v25 = vadd.f32 %v2987_v2, %v2893_v44  ;;  %v1631_v60 = vand.u32 2147483647, %v1299_v31  ;;  %v1727_v11 = vand.u32 2147483647, %v1300_v35  ;;  %v1919_v36 = vand.u32 2147483647, %v1491_v14  ;;  %972 = vrot.lane.b32.xlu1 %v4398_v43, %s3146_s6 }
 0x17a   :  { %v2206_v13 = vadd.f32 %v2110_v10, %v1822_v12  ;;  %v2015_v9 = vand.u32 2147483647, %v1492_v53  ;;  %v1056_v41 = vsel %vm1002_vm0, %v723_v54, %v915_v4  ;;  %v1152_v29 = vsel %vm1002_vm0, %v915_v4, %v723_v54  ;;  %v5461_v2 = vld [vmem:[#allocation106_spill] sm:$0xff]  ;;  %v206_v4 = vld [vmem:[#allocation2 + $0x530] sm:$0xff] }
 0x17b   :  { %780 = vrot.lane.b32.xlu0 %v4414_v20, %s3146_s6  ;;  %v1823_v46 = vmax.f32.f32 %v1631_v60, %v1727_v11  ;;  %v1301_v39 = vadd.f32 %v1056_v41, %v3541_v62  ;;  %v1302_v5 = vadd.f32 %v1152_v29, %v5461_v2  ;;  %v1493_v34 = vsub.f32 %v3541_v62, %v1056_v41  ;;  %v917_v55 = vpop.permute.xlu1 %916  ;;  %v398_v44 = vld [vmem:[#allocation5 + $0x530] sm:$0xff] }
 0x17c   :  { %v2894_v12 = vsel %vm2747_vm2, %v2206_v13, 0.0  ;;  %v2111_v31 = vmax.f32.f32 %v1919_v36, %v2015_v9  ;;  %v1494_v58 = vsub.f32 %v5461_v2, %v1152_v29  ;;  %v4430_v14 = vsub.f32 %v207_v0, %v399_v26  ;;  %v5463_v26 = vld [vmem:[#allocation107_spill] sm:$0xff] }
 0x17d   :  { %v725_v35 = vpop.permute.xlu0 %724  ;;  %v2989_v10 = vadd.f32 %v2988_v25, %v2894_v12  ;;  %v1632_v53 = vand.u32 2147483647, %v1301_v39  ;;  %v1728_v54 = vand.u32 2147483647, %v1302_v5  ;;  %v1920_v60 = vand.u32 2147483647, %v1493_v34 }
 0x17e   :  { %5462 = vst [vmem:[#allocation26_spill] sm:$0xff] %v4430_v14  ;;  %v2207_v11 = vadd.f32 %v2111_v31, %v1823_v46  ;;  %v2016_v43 = vand.u32 2147483647, %v1494_v58  ;;  %v1057_v62 = vsel %vm1002_vm0, %v725_v35, %v917_v55  ;;  %v1153_v13 = vsel %vm1002_vm0, %v917_v55, %v725_v35  ;;  %974 = vrot.lane.b32.xlu1 %v4430_v14, %s3146_s6  ;;  %v209_v34 = vld [vmem:[#allocation2 + $0x548] sm:$0xff] }
 0x17f   :  { %v1824_v36 = vmax.f32.f32 %v1632_v53, %v1728_v54  ;;  %v1303_v0 = vadd.f32 %v1057_v62, %v3547_v49  ;;  %v1304_v9 = vadd.f32 %v1153_v13, %v5463_v26  ;;  %v1495_v25 = vsub.f32 %v3547_v49, %v1057_v62  ;;  %v919_v41 = vpop.permute.xlu1 %918  ;;  %v401_v55 = vld [vmem:[#allocation5 + $0x548] sm:$0xff]  ;;  %v208_v62 = vld [vmem:[#allocation2 + $0x540] sm:$0xff] }
 0x180   :  { %v2895_v29 = vsel %vm2747_vm2, %v2207_v11, 0.0  ;;  %v2112_v46 = vmax.f32.f32 %v1920_v60, %v2016_v43  ;;  %v1496_v39 = vsub.f32 %v5463_v26, %v1153_v13  ;;  %v4444_v2 = vsub.f32 %v206_v4, %v398_v44  ;;  %v5464_v60 = vld [vmem:[#allocation108_spill] sm:$0xff]  ;;  %v400_v13 = vld [vmem:[#allocation5 + $0x540] sm:$0xff] }
 0x181   :  { %v727_v5 = vpop.permute.xlu0 %726  ;;  %v2990_v12 = vadd.f32 %v2989_v10, %v2895_v29  ;;  %v1633_v31 = vand.u32 2147483647, %v1303_v0  ;;  %v1729_v58 = vand.u32 2147483647, %v1304_v9  ;;  %v1921_v35 = vand.u32 2147483647, %v1495_v25 }
 0x182   :  { %v2208_v53 = vadd.f32 %v2112_v46, %v1824_v36  ;;  %v2017_v54 = vand.u32 2147483647, %v1496_v39  ;;  %782 = vrot.lane.b32.xlu0 %v4444_v2, %s3146_s6  ;;  %v1058_v49 = vsel %vm1002_vm0, %v727_v5, %v919_v41  ;;  %v1154_v43 = vsel %vm1002_vm0, %v919_v41, %v727_v5 }
 0x183   :  { %v1825_v4 = vmax.f32.f32 %v1633_v31, %v1729_v58  ;;  %v1305_v44 = vadd.f32 %v1058_v49, %v3551_v32  ;;  %v1306_v11 = vadd.f32 %v1154_v43, %v5464_v60  ;;  %v1497_v10 = vsub.f32 %v3551_v32, %v1058_v49  ;;  %v921_v36 = vpop.permute.xlu1 %920 }
 0x184   :  { %v2896_v0 = vsel %vm2747_vm2, %v2208_v53, 0.0  ;;  %v2113_v26 = vmax.f32.f32 %v1921_v35, %v2017_v54  ;;  %v1498_v9 = vsub.f32 %v5464_v60, %v1154_v43  ;;  %v4458_v25 = vsub.f32 %v209_v34, %v401_v55  ;;  %v211_v35 = vld [vmem:[#allocation2 + $0x558] sm:$0xff]  ;;  %v210_v43 = vld [vmem:[#allocation2 + $0x550] sm:$0xff]  ;;  %v213_v60 = vld [vmem:[#allocation2 + $0x568] sm:$0xff] }
 0x185   :  { %v729_v29 = vpop.permute.xlu0 %728  ;;  %v2991_v41 = vadd.f32 %v2990_v12, %v2896_v0  ;;  %v1634_v46 = vand.u32 2147483647, %v1305_v44  ;;  %v1730_v39 = vand.u32 2147483647, %v1306_v11  ;;  %v1922_v5 = vand.u32 2147483647, %v1497_v10 }
 0x186   :  { %5465 = vst [vmem:[#allocation25_spill] sm:$0xff] %v4458_v25  ;;  %v2209_v31 = vadd.f32 %v2113_v26, %v1825_v4  ;;  %v2018_v58 = vand.u32 2147483647, %v1498_v9  ;;  %976 = vrot.lane.b32.xlu1 %v4458_v25, %s3146_s6  ;;  %v4462_v32 = vsub.f32 %v208_v62, %v400_v13  ;;  %v1059_v53 = vsel %vm1002_vm0, %v729_v29, %v921_v36  ;;  %v403_v54 = vld [vmem:[#allocation5 + $0x558] sm:$0xff]  ;;  %v402_v4 = vld [vmem:[#allocation5 + $0x550] sm:$0xff]  ;;  %v405_v26 = vld [vmem:[#allocation5 + $0x568] sm:$0xff] }
 0x187   :  { %v1826_v49 = vmax.f32.f32 %v1634_v46, %v1730_v39  ;;  %v1155_v34 = vsel %vm1002_vm0, %v921_v36, %v729_v29  ;;  %v1307_v55 = vadd.f32 %v1059_v53, %v3555_v38  ;;  %v1499_v12 = vsub.f32 %v3555_v38, %v1059_v53  ;;  %v923_v44 = vpop.permute.xlu1 %922  ;;  %v5466_v62 = vld [vmem:[#allocation109_spill] sm:$0xff]  ;;  %v212_v9 = vld [vmem:[#allocation2 + $0x560] sm:$0xff] }
 0x188   :  { %v2897_v11 = vsel %vm2747_vm2, %v2209_v31, 0.0  ;;  %v2114_v10 = vmax.f32.f32 %v1922_v5, %v2018_v58  ;;  %784 = vrot.lane.b32.xlu0 %v4462_v32, %s3146_s6  ;;  %v1308_v13 = vadd.f32 %v1155_v34, %v5466_v62  ;;  %v1500_v0 = vsub.f32 %v5466_v62, %v1155_v34  ;;  %v404_v29 = vld [vmem:[#allocation5 + $0x560] sm:$0xff] }
 0x189   :  { %v731_v36 = vpop.permute.xlu0 %730  ;;  %v2992_v38 = vadd.f32 %v2991_v41, %v2897_v11  ;;  %v1635_v46 = vand.u32 2147483647, %v1307_v55  ;;  %v1923_v39 = vand.u32 2147483647, %v1499_v12  ;;  %v4476_v53 = vsub.f32 %v211_v35, %v403_v54  ;;  %v5471_v11 = vld [vmem:[#allocation110_spill] sm:$0xff] }
 0x18a   :  { %v2210_v25 = vadd.f32 %v2114_v10, %v1826_v49  ;;  %v1731_v14 = vand.u32 2147483647, %v1308_v13  ;;  %v2019_v31 = vand.u32 2147483647, %v1500_v0  ;;  %v4478_v5 = vsub.f32 %v210_v43, %v402_v4 }
 0x18b   :  { %5467 = vst [vmem:[#allocation28_spill] sm:$0xff] %v4476_v53  ;;  %978 = vrot.lane.b32.xlu1 %v4476_v53, %s3146_s6  ;;  %v1060_v58 = vsel %vm1002_vm0, %v731_v36, %v923_v44  ;;  %v1156_v34 = vsel %vm1002_vm0, %v923_v44, %v731_v36  ;;  %v4486_v62 = vsub.f32 %v213_v60, %v405_v26  ;;  %v925_v35 = vpop.permute.xlu1 %924  ;;  %v215_v36 = vld [vmem:[#allocation2 + $0x578] sm:$0xff] }
 0x18c   :  { %5468 = vst [vmem:[#allocation27_spill] sm:$0xff] %v4478_v5  ;;  %v4488_v41 = vsub.f32 %v212_v9, %v404_v29  ;;  %v2898_v54 = vsel %vm2747_vm2, %v2210_v25, 0.0  ;;  %v1827_v49 = vmax.f32.f32 %v1635_v46, %v1731_v14  ;;  %v2115_v55 = vmax.f32.f32 %v1923_v39, %v2019_v31  ;;  %786 = vrot.lane.b32.xlu0 %v4478_v5, %s3146_s6  ;;  %v407_v26 = vld [vmem:[#allocation5 + $0x578] sm:$0xff] }
 0x18d   :  { %5469 = vst [vmem:[#allocation30_spill] sm:$0xff] %v4486_v62  ;;  %v1309_v12 = vadd.f32 %v1060_v58, %v3559_v57  ;;  %v733_v43 = vpop.permute.xlu0 %732  ;;  %v2993_v4 = vadd.f32 %v2992_v38, %v2898_v54  ;;  %v1310_v10 = vadd.f32 %v1156_v34, %v5471_v11  ;;  %v1501_v44 = vsub.f32 %v3559_v57, %v1060_v58  ;;  %v406_v54 = vld [vmem:[#allocation5 + $0x570] sm:$0xff] }
 0x18e   :  { %5470 = vst [vmem:[#allocation29_spill] sm:$0xff] %v4488_v41  ;;  %v1502_v60 = vsub.f32 %v5471_v11, %v1156_v34  ;;  %v2211_v13 = vadd.f32 %v2115_v55, %v1827_v49  ;;  %v1061_v25 = vsel %vm1002_vm0, %v733_v43, %v925_v35  ;;  %v1157_v14 = vsel %vm1002_vm0, %v925_v35, %v733_v43  ;;  %v214_v35 = vld [vmem:[#allocation2 + $0x570] sm:$0xff] }
 0x18f   :  { %v1636_v0 = vand.u32 2147483647, %v1309_v12  ;;  %v1732_v9 = vand.u32 2147483647, %v1310_v10  ;;  %v1924_v29 = vand.u32 2147483647, %v1501_v44  ;;  %980 = vrot.lane.b32.xlu1 %v4486_v62, %s3146_s6  ;;  %v1311_v57 = vadd.f32 %v1061_v25, %v3571_v8  ;;  %v927_v38 = vpop.permute.xlu1 %926 }
 0x190   :  { %v2020_v46 = vand.u32 2147483647, %v1502_v60  ;;  %v2899_v39 = vsel %vm2747_vm2, %v2211_v13, 0.0  ;;  %788 = vrot.lane.b32.xlu0 %v4488_v41, %s3146_s6  ;;  %v1312_v31 = vadd.f32 %v1157_v14, %v3569_v19  ;;  %v1503_v58 = vsub.f32 %v3571_v8, %v1061_v25  ;;  %v217_v10 = vld [vmem:[#allocation2 + $0x588] sm:$0xff] }
 0x191   :  { %v1504_v34 = vsub.f32 %v3569_v19, %v1157_v14  ;;  %v735_v49 = vpop.permute.xlu0 %734  ;;  %v2994_v55 = vadd.f32 %v2993_v4, %v2899_v39  ;;  %v1828_v12 = vmax.f32.f32 %v1636_v0, %v1732_v9  ;;  %v1637_v11 = vand.u32 2147483647, %v1311_v57  ;;  %v409_v44 = vld [vmem:[#allocation5 + $0x588] sm:$0xff] }
 0x192   :  { %v2116_v43 = vmax.f32.f32 %v1924_v29, %v2020_v46  ;;  %v1733_v60 = vand.u32 2147483647, %v1312_v31  ;;  %v1925_v13 = vand.u32 2147483647, %v1503_v58  ;;  %v4512_v53 = vsub.f32 %v215_v36, %v407_v26  ;;  %v5472_v9 = vld [vmem:[#allocation68_spill] sm:$0xff]  ;;  %v216_v26 = vld [vmem:[#allocation2 + $0x580] sm:$0xff] }
 0x193   :  { %v2021_v62 = vand.u32 2147483647, %v1504_v34  ;;  %v4514_v5 = vsub.f32 %v214_v35, %v406_v54  ;;  %v1062_v19 = vsel %vm1002_vm0, %v735_v49, %v927_v38  ;;  %v1158_v8 = vsel %vm1002_vm0, %v927_v38, %v735_v49  ;;  %v929_v4 = vpop.permute.xlu1 %928  ;;  %v408_v29 = vld [vmem:[#allocation5 + $0x580] sm:$0xff]  ;;  %v219_v54 = vld [vmem:[#allocation2 + $0x598] sm:$0xff] }
 0x194   :  { %v2212_v41 = vadd.f32 %v2116_v43, %v1828_v12  ;;  %v1829_v0 = vmax.f32.f32 %v1637_v11, %v1733_v60  ;;  %982 = vrot.lane.b32.xlu1 %v4512_v53, %s3146_s6  ;;  %v1313_v14 = vadd.f32 %v1062_v19, %v3583_v51  ;;  %v1314_v36 = vadd.f32 %v1158_v8, %v5472_v9  ;;  %v411_v49 = vld [vmem:[#allocation5 + $0x598] sm:$0xff]  ;;  %v218_v60 = vld [vmem:[#allocation2 + $0x590] sm:$0xff] }
 0x195   :  { %v2117_v25 = vmax.f32.f32 %v1925_v13, %v2021_v62  ;;  %v737_v46 = vpop.permute.xlu0 %736  ;;  %790 = vrot.lane.b32.xlu0 %v4514_v5, %s3146_s6  ;;  %v1505_v38 = vsub.f32 %v3583_v51, %v1062_v19  ;;  %v1506_v62 = vsub.f32 %v5472_v9, %v1158_v8  ;;  %v4530_v39 = vsub.f32 %v217_v10, %v409_v44  ;;  %v410_v13 = vld [vmem:[#allocation5 + $0x590] sm:$0xff]  ;;  %v5476_v9 = vld [vmem:[#allocation111_spill] sm:$0xff] }
 0x196   :  { %v2900_v57 = vsel %vm2747_vm2, %v2212_v41, 0.0  ;;  %v1638_v34 = vand.u32 2147483647, %v1313_v14  ;;  %v1734_v35 = vand.u32 2147483647, %v1314_v36  ;;  %v4532_v11 = vsub.f32 %v216_v26, %v408_v29  ;;  %v5475_v19 = vld [vmem:[#allocation112_spill] sm:$0xff] }
 0x197   :  { %5473 = vst [vmem:[#allocation32_spill] sm:$0xff] %v4530_v39  ;;  %v2995_v31 = vadd.f32 %v2994_v55, %v2900_v57  ;;  %v2213_v58 = vadd.f32 %v2117_v25, %v1829_v0  ;;  %v1926_v12 = vand.u32 2147483647, %v1505_v38  ;;  %v2022_v43 = vand.u32 2147483647, %v1506_v62  ;;  %v931_v51 = vpop.permute.xlu1 %930 }
 0x198   :  { %5474 = vst [vmem:[#allocation31_spill] sm:$0xff] %v4532_v11  ;;  %v1063_v41 = vsel %vm1002_vm0, %v737_v46, %v929_v4  ;;  %v1830_v44 = vmax.f32.f32 %v1638_v34, %v1734_v35  ;;  %984 = vrot.lane.b32.xlu1 %v4530_v39, %s3146_s6  ;;  %v1159_v55 = vsel %vm1002_vm0, %v929_v4, %v737_v46  ;;  %v221_v34 = vld [vmem:[#allocation2 + $0x5a8] sm:$0xff] }
 0x199   :  { %v2901_v10 = vsel %vm2747_vm2, %v2213_v58, 0.0  ;;  %v1315_v8 = vadd.f32 %v1063_v41, %v5475_v19  ;;  %v739_v0 = vpop.permute.xlu0 %738  ;;  %v2118_v14 = vmax.f32.f32 %v1926_v12, %v2022_v43  ;;  %792 = vrot.lane.b32.xlu0 %v4532_v11, %s3146_s6  ;;  %v1316_v36 = vadd.f32 %v1159_v55, %v5476_v9 }
 0x19a   :  { %v2996_v25 = vadd.f32 %v2995_v31, %v2901_v10  ;;  %v1507_v26 = vsub.f32 %v5475_v19, %v1063_v41  ;;  %v1508_v29 = vsub.f32 %v5476_v9, %v1159_v55  ;;  %v4548_v38 = vsub.f32 %v219_v54, %v411_v49  ;;  %v5478_v41 = vld [vmem:[#allocation114_spill] sm:$0xff] }
 0x19b   :  { %v1639_v57 = vand.u32 2147483647, %v1315_v8  ;;  %v4550_v62 = vsub.f32 %v218_v60, %v410_v13  ;;  %v2214_v4 = vadd.f32 %v2118_v14, %v1830_v44  ;;  %v1735_v46 = vand.u32 2147483647, %v1316_v36  ;;  %v933_v35 = vpop.permute.xlu1 %932  ;;  %v413_v60 = vld [vmem:[#allocation5 + $0x5a8] sm:$0xff]  ;;  %v220_v13 = vld [vmem:[#allocation2 + $0x5a0] sm:$0xff] }
 0x19c   :  { %5477 = vst [vmem:[#allocation34_spill] sm:$0xff] %v4548_v38  ;;  %v1927_v58 = vand.u32 2147483647, %v1507_v26  ;;  %v1064_v31 = vsel %vm1002_vm0, %v739_v0, %v931_v51  ;;  %v2023_v12 = vand.u32 2147483647, %v1508_v29  ;;  %986 = vrot.lane.b32.xlu1 %v4548_v38, %s3146_s6  ;;  %v1160_v43 = vsel %vm1002_vm0, %v931_v51, %v739_v0  ;;  %v412_v10 = vld [vmem:[#allocation5 + $0x5a0] sm:$0xff] }
 0x19d   :  { %v1317_v54 = vadd.f32 %v1064_v31, %v5478_v41  ;;  %v1509_v49 = vsub.f32 %v5478_v41, %v1064_v31  ;;  %v741_v44 = vpop.permute.xlu0 %740  ;;  %v2902_v55 = vsel %vm2747_vm2, %v2214_v4, 0.0  ;;  %v1831_v19 = vmax.f32.f32 %v1639_v57, %v1735_v46  ;;  %794 = vrot.lane.b32.xlu0 %v4550_v62, %s3146_s6  ;;  %v5479_v8 = vld [vmem:[#allocation113_spill] sm:$0xff] }
 0x19e   :  { %v1318_v14 = vadd.f32 %v1160_v43, %v5479_v8  ;;  %v1510_v9 = vsub.f32 %v5479_v8, %v1160_v43  ;;  %v223_v51 = vld [vmem:[#allocation2 + $0x5b8] sm:$0xff]  ;;  %v2997_v36 = vadd.f32 %v2996_v25, %v2902_v55  ;;  %v2119_v26 = vmax.f32.f32 %v1927_v58, %v2023_v12  ;;  %v222_v25 = vld [vmem:[#allocation2 + $0x5b0] sm:$0xff] }
 0x19f   :  { %v415_v0 = vld [vmem:[#allocation5 + $0x5b8] sm:$0xff]  ;;  %v1640_v29 = vand.u32 2147483647, %v1317_v54  ;;  %v1928_v31 = vand.u32 2147483647, %v1509_v49  ;;  %v4566_v39 = vsub.f32 %v221_v34, %v413_v60  ;;  %v4568_v11 = vsub.f32 %v220_v13, %v412_v10  ;;  %v935_v57 = vpop.permute.xlu1 %934  ;;  %v414_v58 = vld [vmem:[#allocation5 + $0x5b0] sm:$0xff] }
 0x1a0   :  { %v1736_v41 = vand.u32 2147483647, %v1318_v14  ;;  %v2024_v38 = vand.u32 2147483647, %v1510_v9  ;;  %v2215_v4 = vadd.f32 %v2119_v26, %v1831_v19  ;;  %v1065_v46 = vsel %vm1002_vm0, %v741_v44, %v933_v35  ;;  %v5482_v34 = vld [vmem:[#allocation15_spill] sm:$0xff] }
 0x1a1   :  { %5480 = vst [vmem:[#allocation33_spill] sm:$0xff] %v4566_v39  ;;  %v1161_v43 = vsel %vm1002_vm0, %v933_v35, %v741_v44  ;;  %v4574_v8 = vsub.f32 %v223_v51, %v415_v0  ;;  %v743_v12 = vpop.permute.xlu0 %742  ;;  %988 = vrot.lane.b32.xlu1 %v4566_v39, %s3146_s6  ;;  %796 = vrot.lane.b32.xlu0 %v4568_v11, %s3146_s6  ;;  %v5483_v10 = vld [vmem:[#allocation11_spill] sm:$0xff] }
 0x1a2   :  { %v1832_v54 = vmax.f32.f32 %v1640_v29, %v1736_v41  ;;  %v2120_v49 = vmax.f32.f32 %v1928_v31, %v2024_v38  ;;  %v1319_v60 = vadd.f32 %v1065_v46, %v5482_v34  ;;  %v2903_v13 = vsel %vm2747_vm2, %v2215_v4, 0.0  ;;  %v225_v51 = vld [vmem:[#allocation2 + $0x5c8] sm:$0xff] }
 0x1a3   :  { %5481 = vst [vmem:[#allocation36_spill] sm:$0xff] %v4574_v8  ;;  %v1320_v35 = vadd.f32 %v1161_v43, %v5483_v10  ;;  %v1511_v44 = vsub.f32 %v5482_v34, %v1065_v46  ;;  %v1512_v55 = vsub.f32 %v5483_v10, %v1161_v43  ;;  %v2998_v19 = vadd.f32 %v2997_v36, %v2903_v13  ;;  %v417_v0 = vld [vmem:[#allocation5 + $0x5c8] sm:$0xff]  ;;  %v937_v26 = vpop.permute.xlu1 %936  ;;  %v5485_v13 = vld [vmem:[#allocation13_spill] sm:$0xff] }
 0x1a4   :  { %v2216_v14 = vadd.f32 %v2120_v49, %v1832_v54  ;;  %v1641_v38 = vand.u32 2147483647, %v1319_v60  ;;  %v4586_v9 = vsub.f32 %v222_v25, %v414_v58  ;;  %v1066_v4 = vsel %vm1002_vm0, %v743_v12, %v935_v57  ;;  %v224_v58 = vld [vmem:[#allocation2 + $0x5c0] sm:$0xff] }
 0x1a5   :  { %v1737_v29 = vand.u32 2147483647, %v1320_v35  ;;  %v1929_v31 = vand.u32 2147483647, %v1511_v44  ;;  %v2025_v41 = vand.u32 2147483647, %v1512_v55  ;;  %v745_v39 = vpop.permute.xlu0 %744  ;;  %990 = vrot.lane.b32.xlu1 %v4574_v8, %s3146_s6  ;;  %v1162_v36 = vsel %vm1002_vm0, %v935_v57, %v743_v12 }
 0x1a6   :  { %5484 = vst [vmem:[#allocation35_spill] sm:$0xff] %v4586_v9  ;;  %v2904_v46 = vsel %vm2747_vm2, %v2216_v14, 0.0  ;;  %798 = vrot.lane.b32.xlu0 %v4586_v9, %s3146_s6  ;;  %v1321_v43 = vadd.f32 %v1066_v4, %v3792_v47  ;;  %v1513_v25 = vsub.f32 %v3792_v47, %v1066_v4  ;;  %v416_v54 = vld [vmem:[#allocation5 + $0x5c0] sm:$0xff]  ;;  %v1322_v10 = vadd.f32 %v1162_v36, %v5485_v13  ;;  %v227_v4 = vld [vmem:[#allocation2 + $0x5d8] sm:$0xff] }
 0x1a7   :  { %v2999_v49 = vadd.f32 %v2998_v19, %v2904_v46  ;;  %v1833_v34 = vmax.f32.f32 %v1641_v38, %v1737_v29  ;;  %v2121_v60 = vmax.f32.f32 %v1929_v31, %v2025_v41  ;;  %v1514_v35 = vsub.f32 %v5485_v13, %v1162_v36  ;;  %v939_v8 = vpop.permute.xlu1 %938  ;;  %v419_v31 = vld [vmem:[#allocation5 + $0x5d8] sm:$0xff]  ;;  %v226_v41 = vld [vmem:[#allocation2 + $0x5d0] sm:$0xff] }
 0x1a8   :  { %v1642_v44 = vand.u32 2147483647, %v1321_v43  ;;  %v1930_v55 = vand.u32 2147483647, %v1513_v25  ;;  %v4602_v14 = vsub.f32 %v225_v51, %v417_v0  ;;  %v1738_v57 = vand.u32 2147483647, %v1322_v10 }
 0x1a9   :  { %v2217_v9 = vadd.f32 %v2121_v60, %v1833_v34  ;;  %v4604_v12 = vsub.f32 %v224_v58, %v416_v54  ;;  %v1067_v47 = vsel %vm1002_vm0, %v745_v39, %v937_v26  ;;  %v747_v19 = vpop.permute.xlu0 %746  ;;  %v2026_v38 = vand.u32 2147483647, %v1514_v35  ;;  %v418_v46 = vld [vmem:[#allocation5 + $0x5d0] sm:$0xff]  ;;  %v229_v34 = vld [vmem:[#allocation2 + $0x5e8] sm:$0xff] }
 0x1aa   :  { %5486 = vst [vmem:[#allocation38_spill] sm:$0xff] %v4602_v14  ;;  %992 = vrot.lane.b32.xlu1 %v4602_v14, %s3146_s6  ;;  %v1163_v29 = vsel %vm1002_vm0, %v937_v26, %v745_v39  ;;  %v1323_v51 = vadd.f32 %v1067_v47, %v3838_v3  ;;  %v1515_v0 = vsub.f32 %v3838_v3, %v1067_v47  ;;  %v5488_v25 = vld [vmem:[#allocation16_spill] sm:$0xff] }
 0x1ab   :  { %5487 = vst [vmem:[#allocation37_spill] sm:$0xff] %v4604_v12  ;;  %v2905_v36 = vsel %vm2747_vm2, %v2217_v9, 0.0  ;;  %v1834_v43 = vmax.f32.f32 %v1642_v44, %v1738_v57  ;;  %800 = vrot.lane.b32.xlu0 %v4604_v12, %s3146_s6  ;;  %v1324_v58 = vadd.f32 %v1163_v29, %v5488_v25  ;;  %v1516_v54 = vsub.f32 %v5488_v25, %v1163_v29  ;;  %v421_v39 = vld [vmem:[#allocation5 + $0x5e8] sm:$0xff]  ;;  %v941_v10 = vpop.permute.xlu1 %940 }
 0x1ac   :  { %v3000_v26 = vadd.f32 %v2999_v49, %v2905_v36  ;;  %v2122_v60 = vmax.f32.f32 %v1930_v55, %v2026_v38  ;;  %v1643_v13 = vand.u32 2147483647, %v1323_v51  ;;  %v1931_v3 = vand.u32 2147483647, %v1515_v0  ;;  %v228_v49 = vld [vmem:[#allocation2 + $0x5e0] sm:$0xff] }
 0x1ad   :  { %v1739_v35 = vand.u32 2147483647, %v1324_v58  ;;  %v2027_v47 = vand.u32 2147483647, %v1516_v54  ;;  %v4620_v14 = vsub.f32 %v227_v4, %v419_v31  ;;  %v4622_v9 = vsub.f32 %v226_v41, %v418_v46  ;;  %v749_v44 = vpop.permute.xlu0 %748  ;;  %v420_v55 = vld [vmem:[#allocation5 + $0x5e0] sm:$0xff]  ;;  %v5490_v31 = vld [vmem:[#allocation61_spill] sm:$0xff] }
 0x1ae   :  { %v2218_v57 = vadd.f32 %v2122_v60, %v1834_v43  ;;  %v1068_v12 = vsel %vm1002_vm0, %v747_v19, %v939_v8  ;;  %v1164_v29 = vsel %vm1002_vm0, %v939_v8, %v747_v19  ;;  %v4628_v25 = vsub.f32 %v229_v34, %v421_v39  ;;  %v231_v54 = vld [vmem:[#allocation2 + $0x5f8] sm:$0xff] }
 0x1af   :  { %v1835_v38 = vmax.f32.f32 %v1643_v13, %v1739_v35  ;;  %v2123_v51 = vmax.f32.f32 %v1931_v3, %v2027_v47  ;;  %994 = vrot.lane.b32.xlu1 %v4620_v14, %s3146_s6  ;;  %802 = vrot.lane.b32.xlu0 %v4622_v9, %s3146_s6  ;;  %v1325_v4 = vadd.f32 %v1068_v12, %v3870_v56  ;;  %v943_v46 = vpop.permute.xlu1 %942  ;;  %v423_v34 = vld [vmem:[#allocation5 + $0x5f8] sm:$0xff]  ;;  %v230_v47 = vld [vmem:[#allocation2 + $0x5f0] sm:$0xff] }
 0x1b0   :  { %5489 = vst [vmem:[#allocation40_spill] sm:$0xff] %v4628_v25  ;;  %v2906_v0 = vsel %vm2747_vm2, %v2218_v57, 0.0  ;;  %v1326_v41 = vadd.f32 %v1164_v29, %v5490_v31  ;;  %v1517_v8 = vsub.f32 %v3870_v56, %v1068_v12  ;;  %v1518_v19 = vsub.f32 %v5490_v31, %v1164_v29  ;;  %v422_v57 = vld [vmem:[#allocation5 + $0x5f0] sm:$0xff] }
 0x1b1   :  { %v3001_v36 = vadd.f32 %v3000_v26, %v2906_v0  ;;  %v1644_v43 = vand.u32 2147483647, %v1325_v4  ;;  %v4640_v58 = vsub.f32 %v228_v49, %v420_v55  ;;  %v751_v39 = vpop.permute.xlu0 %750  ;;  %v1069_v35 = vsel %vm1002_vm0, %v749_v44, %v941_v10  ;;  %v5492_v55 = vld [vmem:[#allocation14_spill] sm:$0xff] }
 0x1b2   :  { %v1740_v60 = vand.u32 2147483647, %v1326_v41  ;;  %v1932_v13 = vand.u32 2147483647, %v1517_v8  ;;  %v2028_v3 = vand.u32 2147483647, %v1518_v19  ;;  %v1165_v56 = vsel %vm1002_vm0, %v941_v10, %v749_v44 }
 0x1b3   :  { %5491 = vst [vmem:[#allocation39_spill] sm:$0xff] %v4640_v58  ;;  %996 = vrot.lane.b32.xlu1 %v4628_v25, %s3146_s6  ;;  %804 = vrot.lane.b32.xlu0 %v4640_v58, %s3146_s6  ;;  %v1327_v12 = vadd.f32 %v1069_v35, %v3902_v48  ;;  %v1519_v26 = vsub.f32 %v3902_v48, %v1069_v35  ;;  %v945_v0 = vpop.permute.xlu1 %944 }
 0x1b4   :  { %v2219_v29 = vadd.f32 %v2123_v51, %v1835_v38  ;;  %v1836_v49 = vmax.f32.f32 %v1644_v43, %v1740_v60  ;;  %v1328_v4 = vadd.f32 %v1165_v56, %v5492_v55  ;;  %v2124_v31 = vmax.f32.f32 %v1932_v13, %v2028_v3 }
 0x1b5   :  { %v1520_v41 = vsub.f32 %v5492_v55, %v1165_v56  ;;  %v1645_v8 = vand.u32 2147483647, %v1327_v12  ;;  %v4654_v19 = vsub.f32 %v231_v54, %v423_v34  ;;  %v753_v25 = vpop.permute.xlu0 %752  ;;  %v1933_v10 = vand.u32 2147483647, %v1519_v26  ;;  %v5493_v34 = vld [vmem:[#allocation17_spill] sm:$0xff] }
 0x1b6   :  { %v1741_v58 = vand.u32 2147483647, %v1328_v4  ;;  %v4656_v44 = vsub.f32 %v230_v47, %v422_v57  ;;  %v1070_v48 = vsel %vm1002_vm0, %v751_v39, %v943_v46  ;;  %v1166_v38 = vsel %vm1002_vm0, %v943_v46, %v751_v39 }
 0x1b7   :  { %v2029_v35 = vand.u32 2147483647, %v1520_v41  ;;  %998 = vrot.lane.b32.xlu1 %v4654_v19, %s3146_s6  ;;  %v1329_v51 = vadd.f32 %v1070_v48, %v3934_v59  ;;  %v1521_v43 = vsub.f32 %v3934_v59, %v1070_v48  ;;  %v2907_v54 = vsel %vm2747_vm2, %v2219_v29, 0.0  ;;  %v947_v3 = vpop.permute.xlu1 %946  ;;  %v5494_v41 = vld [vmem:[#allocation12_spill] sm:$0xff] }
 0x1b8   :  { %806 = vrot.lane.b32.xlu0 %v4656_v44, %s3146_s6  ;;  %v1330_v60 = vadd.f32 %v1166_v38, %v5493_v34  ;;  %v1522_v13 = vsub.f32 %v5493_v34, %v1166_v38  ;;  %v2220_v56 = vadd.f32 %v2124_v31, %v1836_v49  ;;  %v1837_v12 = vmax.f32.f32 %v1645_v8, %v1741_v58 }
 0x1b9   :  { %v1646_v26 = vand.u32 2147483647, %v1329_v51  ;;  %v1934_v47 = vand.u32 2147483647, %v1521_v43  ;;  %v755_v46 = vpop.permute.xlu0 %754  ;;  %v1071_v59 = vsel %vm1002_vm0, %v753_v25, %v945_v0  ;;  %v1167_v29 = vsel %vm1002_vm0, %v945_v0, %v753_v25 }
 0x1ba   :  { %v1742_v39 = vand.u32 2147483647, %v1330_v60  ;;  %v2030_v57 = vand.u32 2147483647, %v1522_v13  ;;  %v2125_v55 = vmax.f32.f32 %v1933_v10, %v2029_v35  ;;  %v1331_v4 = vadd.f32 %v1071_v59, %v3966_v21 }
 0x1bb   :  { %v1332_v48 = vadd.f32 %v1167_v29, %v5494_v41  ;;  %v1523_v38 = vsub.f32 %v3966_v21, %v1071_v59  ;;  %v1524_v31 = vsub.f32 %v5494_v41, %v1167_v29  ;;  %v1072_v8 = vsel %vm1002_vm0, %v755_v46, %v947_v3  ;;  %v949_v51 = vpop.permute.xlu1 %948 }
 0x1bc   :  { %v1838_v49 = vmax.f32.f32 %v1646_v26, %v1742_v39  ;;  %v2126_v58 = vmax.f32.f32 %v1934_v47, %v2030_v57  ;;  %v1647_v43 = vand.u32 2147483647, %v1331_v4  ;;  %v1168_v25 = vsel %vm1002_vm0, %v947_v3, %v755_v46  ;;  %v5495_v26 = vld [vmem:[#allocation18_spill] sm:$0xff] }
 0x1bd   :  { %v1743_v34 = vand.u32 2147483647, %v1332_v48  ;;  %v757_v0 = vpop.permute.xlu0 %756  ;;  %v3002_v10 = vadd.f32 %v3001_v36, %v2907_v54  ;;  %v1935_v35 = vand.u32 2147483647, %v1523_v38  ;;  %v2031_v60 = vand.u32 2147483647, %v1524_v31 }
 0x1be   :  { %v2908_v21 = vsel %vm2747_vm2, %v2220_v56, 0.0  ;;  %v1333_v13 = vadd.f32 %v1072_v8, %v3998_v63  ;;  %v1334_v47 = vadd.f32 %v1168_v25, %v5495_v26  ;;  %v1525_v39 = vsub.f32 %v3998_v63, %v1072_v8 }
 0x1bf   :  { %v2221_v57 = vadd.f32 %v2125_v55, %v1837_v12  ;;  %v2222_v59 = vadd.f32 %v2126_v58, %v1838_v49  ;;  %v1526_v29 = vsub.f32 %v5495_v26, %v1168_v25  ;;  %v1073_v3 = vsel %vm1002_vm0, %v757_v0, %v949_v51  ;;  %v951_v46 = vpop.permute.xlu1 %950  ;;  %v5496_v55 = vld [vmem:[#allocation20_spill] sm:$0xff] }
 0x1c0   :  { %v1839_v36 = vmax.f32.f32 %v1647_v43, %v1743_v34  ;;  %v1648_v54 = vand.u32 2147483647, %v1333_v13  ;;  %v1744_v4 = vand.u32 2147483647, %v1334_v47  ;;  %v1936_v41 = vand.u32 2147483647, %v1525_v39 }
 0x1c1   :  { %v759_v48 = vpop.permute.xlu0 %758  ;;  %v2127_v56 = vmax.f32.f32 %v1935_v35, %v2031_v60  ;;  %v2032_v38 = vand.u32 2147483647, %v1526_v29  ;;  %v1169_v31 = vsel %vm1002_vm0, %v949_v51, %v757_v0  ;;  %v1335_v63 = vadd.f32 %v1073_v3, %v4030_v22 }
 0x1c2   :  { %v1840_v12 = vmax.f32.f32 %v1648_v54, %v1744_v4  ;;  %v1336_v49 = vadd.f32 %v1169_v31, %v5496_v55  ;;  %v1527_v58 = vsub.f32 %v4030_v22, %v1073_v3  ;;  %v1528_v8 = vsub.f32 %v5496_v55, %v1169_v31  ;;  %v5497_v4 = vld [vmem:[#allocation19_spill] sm:$0xff] }
 0x1c3   :  { %v2909_v43 = vsel %vm2747_vm2, %v2221_v57, 0.0  ;;  %v2128_v34 = vmax.f32.f32 %v1936_v41, %v2032_v38  ;;  %v1649_v25 = vand.u32 2147483647, %v1335_v63  ;;  %v1074_v35 = vsel %vm1002_vm0, %v759_v48, %v951_v46  ;;  %v953_v60 = vpop.permute.xlu1 %952 }
 0x1c4   :  { %v3003_v13 = vadd.f32 %v3002_v10, %v2908_v21  ;;  %v1745_v51 = vand.u32 2147483647, %v1336_v49  ;;  %v1937_v0 = vand.u32 2147483647, %v1527_v58  ;;  %v2033_v26 = vand.u32 2147483647, %v1528_v8 }
 0x1c5   :  { %v761_v47 = vpop.permute.xlu0 %760  ;;  %v2910_v39 = vsel %vm2747_vm2, %v2222_v59, 0.0  ;;  %v1170_v22 = vsel %vm1002_vm0, %v951_v46, %v759_v48  ;;  %v1337_v29 = vadd.f32 %v1074_v35, %v4062_v40  ;;  %v1529_v57 = vsub.f32 %v4062_v40, %v1074_v35  ;;  %v5498_v8 = vld [vmem:[#allocation22_spill] sm:$0xff] }
 0x1c6   :  { %v2223_v3 = vadd.f32 %v2127_v56, %v1839_v36  ;;  %v2224_v54 = vadd.f32 %v2128_v34, %v1840_v12  ;;  %v1338_v41 = vadd.f32 %v1170_v22, %v5497_v4  ;;  %v1530_v10 = vsub.f32 %v5497_v4, %v1170_v22 }
 0x1c7   :  { %v1841_v21 = vmax.f32.f32 %v1649_v25, %v1745_v51  ;;  %v2129_v38 = vmax.f32.f32 %v1937_v0, %v2033_v26  ;;  %v1650_v31 = vand.u32 2147483647, %v1337_v29  ;;  %v1075_v63 = vsel %vm1002_vm0, %v761_v47, %v953_v60  ;;  %v955_v59 = vpop.permute.xlu1 %954 }
 0x1c8   :  { %v3004_v55 = vadd.f32 %v3003_v13, %v2909_v43  ;;  %v1746_v49 = vand.u32 2147483647, %v1338_v41  ;;  %v1938_v46 = vand.u32 2147483647, %v1529_v57  ;;  %v2034_v48 = vand.u32 2147483647, %v1530_v10 }
 0x1c9   :  { %v763_v58 = vpop.permute.xlu0 %762  ;;  %v1171_v40 = vsel %vm1002_vm0, %v953_v60, %v761_v47  ;;  %v1339_v36 = vadd.f32 %v1075_v63, %v4094_v23  ;;  %v1531_v56 = vsub.f32 %v4094_v23, %v1075_v63  ;;  %v2911_v43 = vsel %vm2747_vm2, %v2223_v3, 0.0  ;;  %v5499_v41 = vld [vmem:[#allocation21_spill] sm:$0xff] }
 0x1ca   :  { %v3005_v12 = vadd.f32 %v3004_v55, %v2910_v39  ;;  %v1340_v34 = vadd.f32 %v1171_v40, %v5498_v8  ;;  %v1076_v25 = vsel %vm1002_vm0, %v763_v58, %v955_v59  ;;  %v2912_v35 = vsel %vm2747_vm2, %v2224_v54, 0.0 }
 0x1cb   :  { %v2225_v13 = vadd.f32 %v2129_v38, %v1841_v21  ;;  %v1532_v51 = vsub.f32 %v5498_v8, %v1171_v40  ;;  %v957_v60 = vpop.permute.xlu1 %956  ;;  %v1842_v0 = vmax.f32.f32 %v1650_v31, %v1746_v49  ;;  %v2130_v26 = vmax.f32.f32 %v1938_v46, %v2034_v48 }
 0x1cc   :  { %v1651_v47 = vand.u32 2147483647, %v1339_v36  ;;  %v1172_v23 = vsel %vm1002_vm0, %v955_v59, %v763_v58  ;;  %v1747_v22 = vand.u32 2147483647, %v1340_v34  ;;  %v1939_v29 = vand.u32 2147483647, %v1531_v56 }
 0x1cd   :  { %v765_v39 = vpop.permute.xlu0 %764  ;;  %v2035_v57 = vand.u32 2147483647, %v1532_v51  ;;  %v1341_v4 = vadd.f32 %v1076_v25, %v4126_v28  ;;  %v3006_v3 = vadd.f32 %v3005_v12, %v2911_v43  ;;  %v1342_v10 = vadd.f32 %v1172_v23, %v5499_v41  ;;  %v5500_v34 = vld [vmem:[#allocation24_spill] sm:$0xff] }
 0x1ce   :  { %v1533_v54 = vsub.f32 %v4126_v28, %v1076_v25  ;;  %v1534_v21 = vsub.f32 %v5499_v41, %v1172_v23  ;;  %v2913_v63 = vsel %vm2747_vm2, %v2225_v13, 0.0  ;;  %v1077_v59 = vsel %vm1002_vm0, %v765_v39, %v957_v60 }
 0x1cf   :  { %v959_v38 = vpop.permute.xlu1 %958  ;;  %v3007_v31 = vadd.f32 %v3006_v3, %v2912_v35  ;;  %v1173_v55 = vsel %vm1002_vm0, %v957_v60, %v765_v39  ;;  %v2226_v46 = vadd.f32 %v2130_v26, %v1842_v0  ;;  %v1843_v48 = vmax.f32.f32 %v1651_v47, %v1747_v22 }
 0x1d0   :  { %v2131_v58 = vmax.f32.f32 %v1939_v29, %v2035_v57  ;;  %v1652_v40 = vand.u32 2147483647, %v1341_v4  ;;  %v1748_v36 = vand.u32 2147483647, %v1342_v10  ;;  %v1940_v28 = vand.u32 2147483647, %v1533_v54 }
 0x1d1   :  { %v767_v49 = vpop.permute.xlu0 %766  ;;  %v2036_v56 = vand.u32 2147483647, %v1534_v21  ;;  %v1343_v8 = vadd.f32 %v1077_v59, %v4158_v16  ;;  %v1344_v25 = vadd.f32 %v1173_v55, %v5500_v34  ;;  %v1535_v43 = vsub.f32 %v4158_v16, %v1077_v59 }
 0x1d2   :  { %v1078_v12 = vsel %vm1002_vm0, %v767_v49, %v959_v38  ;;  %v1174_v35 = vsel %vm1002_vm0, %v959_v38, %v767_v49  ;;  %v1536_v51 = vsub.f32 %v5500_v34, %v1173_v55  ;;  %v3008_v47 = vadd.f32 %v3007_v31, %v2913_v63 }
 0x1d3   :  { %v961_v13 = vpop.permute.xlu1 %960  ;;  %v1345_v60 = vadd.f32 %v1078_v12, %v4190_v6  ;;  %v1346_v0 = vadd.f32 %v1174_v35, %v4174_v15  ;;  %v1537_v23 = vsub.f32 %v4190_v6, %v1078_v12  ;;  %v1538_v39 = vsub.f32 %v4174_v15, %v1174_v35 }
 0x1d4   :  { %v2914_v22 = vsel %vm2747_vm2, %v2226_v46, 0.0  ;;  %v2227_v16 = vadd.f32 %v2131_v58, %v1843_v48  ;;  %v1844_v29 = vmax.f32.f32 %v1652_v40, %v1748_v36  ;;  %v2132_v4 = vmax.f32.f32 %v1940_v28, %v2036_v56 }
 0x1d5   :  { %v769_v26 = vpop.permute.xlu0 %768  ;;  %v1653_v3 = vand.u32 2147483647, %v1343_v8  ;;  %v1749_v41 = vand.u32 2147483647, %v1344_v25  ;;  %v1941_v10 = vand.u32 2147483647, %v1535_v43  ;;  %v3009_v58 = vadd.f32 %v3008_v47, %v2914_v22 }
 0x1d6   :  { %v1079_v57 = vsel %vm1002_vm0, %v769_v26, %v961_v13  ;;  %v2037_v21 = vand.u32 2147483647, %v1536_v51  ;;  %v1654_v38 = vand.u32 2147483647, %v1345_v60  ;;  %v1750_v31 = vand.u32 2147483647, %v1346_v0 }
 0x1d7   :  { %v963_v54 = vpop.permute.xlu1 %962  ;;  %v1175_v6 = vsel %vm1002_vm0, %v961_v13, %v769_v26  ;;  %v1942_v63 = vand.u32 2147483647, %v1537_v23  ;;  %v2038_v59 = vand.u32 2147483647, %v1538_v39  ;;  %v1347_v55 = vadd.f32 %v1079_v57, %v4222_v42 }
 0x1d8   :  { %v1539_v49 = vsub.f32 %v4222_v42, %v1079_v57  ;;  %v1348_v46 = vadd.f32 %v1175_v6, %v4206_v30  ;;  %v1540_v48 = vsub.f32 %v4206_v30, %v1175_v6  ;;  %v2915_v56 = vsel %vm2747_vm2, %v2227_v16, 0.0 }
 0x1d9   :  { %v771_v15 = vpop.permute.xlu0 %770  ;;  %v2228_v12 = vadd.f32 %v2132_v4, %v1844_v29  ;;  %v1845_v8 = vmax.f32.f32 %v1653_v3, %v1749_v41  ;;  %v2133_v34 = vmax.f32.f32 %v1941_v10, %v2037_v21  ;;  %v1846_v42 = vmax.f32.f32 %v1654_v38, %v1750_v31 }
 0x1da   :  { %v1080_v40 = vsel %vm1002_vm0, %v771_v15, %v963_v54  ;;  %v1176_v36 = vsel %vm1002_vm0, %v963_v54, %v771_v15  ;;  %v2134_v43 = vmax.f32.f32 %v1942_v63, %v2038_v59  ;;  %v1655_v35 = vand.u32 2147483647, %v1347_v55 }
 0x1db   :  { %v965_v28 = vpop.permute.xlu1 %964  ;;  %v1943_v13 = vand.u32 2147483647, %v1539_v49  ;;  %v1751_v30 = vand.u32 2147483647, %v1348_v46  ;;  %v2039_v51 = vand.u32 2147483647, %v1540_v48  ;;  %v1349_v60 = vadd.f32 %v1080_v40, %v4254_v45 }
 0x1dc   :  { %v1350_v0 = vadd.f32 %v1176_v36, %v4238_v50  ;;  %v1541_v26 = vsub.f32 %v4254_v45, %v1080_v40  ;;  %v3010_v23 = vadd.f32 %v3009_v58, %v2915_v56  ;;  %v1542_v39 = vsub.f32 %v4238_v50, %v1176_v36 }
 0x1dd   :  { %v773_v25 = vpop.permute.xlu0 %772  ;;  %v2916_v57 = vsel %vm2747_vm2, %v2228_v12, 0.0  ;;  %v2229_v4 = vadd.f32 %v2133_v34, %v1845_v8  ;;  %v2230_v3 = vadd.f32 %v2134_v43, %v1846_v42  ;;  %v1847_v45 = vmax.f32.f32 %v1655_v35, %v1751_v30 }
 0x1de   :  { %v1081_v22 = vsel %vm1002_vm0, %v773_v25, %v965_v28  ;;  %v1177_v16 = vsel %vm1002_vm0, %v965_v28, %v773_v25  ;;  %v2135_v10 = vmax.f32.f32 %v1943_v13, %v2039_v51  ;;  %v1656_v54 = vand.u32 2147483647, %v1349_v60 }
 0x1df   :  { %v967_v47 = vpop.permute.xlu1 %966  ;;  %v1752_v21 = vand.u32 2147483647, %v1350_v0  ;;  %v1944_v50 = vand.u32 2147483647, %v1541_v26  ;;  %v1351_v38 = vadd.f32 %v1081_v22, %v4286_v27  ;;  %v1352_v31 = vadd.f32 %v1177_v16, %v4270_v33 }
 0x1e0   :  { %v2040_v63 = vand.u32 2147483647, %v1542_v39  ;;  %v1543_v59 = vsub.f32 %v4286_v27, %v1081_v22  ;;  %v1544_v55 = vsub.f32 %v4270_v33, %v1177_v16  ;;  %v3011_v48 = vadd.f32 %v3010_v23, %v2916_v57 }
 0x1e1   :  { %v775_v29 = vpop.permute.xlu0 %774  ;;  %v2917_v28 = vsel %vm2747_vm2, %v2229_v4, 0.0  ;;  %v2918_v56 = vsel %vm2747_vm2, %v2230_v3, 0.0  ;;  %v2231_v12 = vadd.f32 %v2135_v10, %v1847_v45  ;;  %v1848_v27 = vmax.f32.f32 %v1656_v54, %v1752_v21 }
 0x1e2   :  { %v1082_v41 = vsel %vm1002_vm0, %v775_v29, %v967_v47  ;;  %v1178_v6 = vsel %vm1002_vm0, %v967_v47, %v775_v29  ;;  %v1657_v8 = vand.u32 2147483647, %v1351_v38  ;;  %v1753_v33 = vand.u32 2147483647, %v1352_v31 }
 0x1e3   :  { %v969_v15 = vpop.permute.xlu1 %968  ;;  %v1353_v49 = vadd.f32 %v1082_v41, %v4318_v7  ;;  %v1354_v58 = vadd.f32 %v1178_v6, %v4302_v37  ;;  %v1545_v40 = vsub.f32 %v4318_v7, %v1082_v41  ;;  %v1546_v36 = vsub.f32 %v4302_v37, %v1178_v6 }
 0x1e4   :  { %v2136_v7 = vmax.f32.f32 %v1944_v50, %v2040_v63  ;;  %v1945_v43 = vand.u32 2147483647, %v1543_v59  ;;  %v2041_v37 = vand.u32 2147483647, %v1544_v55  ;;  %v3012_v0 = vadd.f32 %v3011_v48, %v2917_v28 }
 0x1e5   :  { %v777_v46 = vpop.permute.xlu0 %776  ;;  %v1658_v35 = vand.u32 2147483647, %v1353_v49  ;;  %v1754_v30 = vand.u32 2147483647, %v1354_v58  ;;  %v1946_v51 = vand.u32 2147483647, %v1545_v40  ;;  %v1849_v41 = vmax.f32.f32 %v1657_v8, %v1753_v33 }
 0x1e6   :  { %v1083_v34 = vsel %vm1002_vm0, %v777_v46, %v969_v15  ;;  %v1179_v25 = vsel %vm1002_vm0, %v969_v15, %v777_v46  ;;  %v2042_v60 = vand.u32 2147483647, %v1546_v36  ;;  %v3013_v16 = vadd.f32 %v3012_v0, %v2918_v56 }
 0x1e7   :  { %v971_v42 = vpop.permute.xlu1 %970  ;;  %v1355_v26 = vadd.f32 %v1083_v34, %v4350_v61  ;;  %v1356_v47 = vadd.f32 %v1179_v25, %v4334_v1  ;;  %v1547_v23 = vsub.f32 %v4350_v61, %v1083_v34  ;;  %v1548_v39 = vsub.f32 %v4334_v1, %v1179_v25  ;;  %v5501_v25 = vld [vmem:[#allocation23_spill] sm:$0xff] }
 0x1e8   :  { %v2919_v29 = vsel %vm2747_vm2, %v2231_v12, 0.0  ;;  %v2232_v57 = vadd.f32 %v2136_v7, %v1848_v27  ;;  %v2137_v45 = vmax.f32.f32 %v1945_v43, %v2041_v37  ;;  %v1850_v10 = vmax.f32.f32 %v1658_v35, %v1754_v30 }
 0x1e9   :  { %v779_v13 = vpop.permute.xlu0 %778  ;;  %v2138_v54 = vmax.f32.f32 %v1946_v51, %v2042_v60  ;;  %v1659_v21 = vand.u32 2147483647, %v1355_v26  ;;  %v1755_v61 = vand.u32 2147483647, %v1356_v47  ;;  %v1947_v50 = vand.u32 2147483647, %v1547_v23 }
 0x1ea   :  { %v1084_v22 = vsel %vm1002_vm0, %v779_v13, %v971_v42  ;;  %v1180_v4 = vsel %vm1002_vm0, %v971_v42, %v779_v13  ;;  %v2043_v31 = vand.u32 2147483647, %v1548_v39  ;;  %v3014_v59 = vadd.f32 %v3013_v16, %v2919_v29  ;;  %v5502_v39 = vld [vmem:[#allocation26_spill] sm:$0xff] }
 0x1eb   :  { %v973_v3 = vpop.permute.xlu1 %972  ;;  %v1357_v1 = vadd.f32 %v1084_v22, %v4382_v52  ;;  %v1358_v6 = vadd.f32 %v1180_v4, %v4366_v17  ;;  %v1549_v15 = vsub.f32 %v4382_v52, %v1084_v22  ;;  %v1550_v63 = vsub.f32 %v4366_v17, %v1180_v4 }
 0x1ec   :  { %v2920_v55 = vsel %vm2747_vm2, %v2232_v57, 0.0  ;;  %v2233_v49 = vadd.f32 %v2137_v45, %v1849_v41  ;;  %v2234_v48 = vadd.f32 %v2138_v54, %v1850_v10  ;;  %v1851_v58 = vmax.f32.f32 %v1659_v21, %v1755_v61 }
 0x1ed   :  { %v781_v38 = vpop.permute.xlu0 %780  ;;  %v1660_v40 = vand.u32 2147483647, %v1357_v1  ;;  %v2139_v56 = vmax.f32.f32 %v1947_v50, %v2043_v31  ;;  %v1756_v12 = vand.u32 2147483647, %v1358_v6  ;;  %v1948_v52 = vand.u32 2147483647, %v1549_v15 }
 0x1ee   :  { %v1085_v46 = vsel %vm1002_vm0, %v781_v38, %v973_v3  ;;  %v1181_v36 = vsel %vm1002_vm0, %v973_v3, %v781_v38  ;;  %v2044_v27 = vand.u32 2147483647, %v1550_v63  ;;  %v3015_v33 = vadd.f32 %v3014_v59, %v2920_v55  ;;  %v5503_v50 = vld [vmem:[#allocation25_spill] sm:$0xff] }
 0x1ef   :  { %v1359_v17 = vadd.f32 %v1085_v46, %v4414_v20  ;;  %v2921_v34 = vsel %vm2747_vm2, %v2233_v49, 0.0  ;;  %v1360_v42 = vadd.f32 %v1181_v36, %v5501_v25  ;;  %v1551_v7 = vsub.f32 %v4414_v20, %v1085_v46 }
 0x1f0   :  { %v975_v28 = vpop.permute.xlu1 %974  ;;  %v1552_v43 = vsub.f32 %v5501_v25, %v1181_v36  ;;  %v2922_v13 = vsel %vm2747_vm2, %v2234_v48, 0.0  ;;  %v2235_v30 = vadd.f32 %v2139_v56, %v1851_v58  ;;  %v1852_v51 = vmax.f32.f32 %v1660_v40, %v1756_v12  ;;  %v5504_v56 = vld [vmem:[#allocation27_spill] sm:$0xff] }
 0x1f1   :  { %v2140_v60 = vmax.f32.f32 %v1948_v52, %v2044_v27  ;;  %v3016_v0 = vadd.f32 %v3015_v33, %v2921_v34  ;;  %v1661_v26 = vand.u32 2147483647, %v1359_v17  ;;  %v1757_v23 = vand.u32 2147483647, %v1360_v42  ;;  %v5505_v52 = vld [vmem:[#allocation28_spill] sm:$0xff] }
 0x1f2   :  { %v1949_v57 = vand.u32 2147483647, %v1551_v7  ;;  %v2045_v4 = vand.u32 2147483647, %v1552_v43  ;;  %v2923_v45 = vsel %vm2747_vm2, %v2235_v30, 0.0 }
 0x1f3   :  { %v3017_v29 = vadd.f32 %v3016_v0, %v2922_v13  ;;  %v2236_v10 = vadd.f32 %v2140_v60, %v1852_v51  ;;  %v1853_v31 = vmax.f32.f32 %v1661_v26, %v1757_v23  ;;  %v5506_v23 = vld [vmem:[#allocation29_spill] sm:$0xff] }
 0x1f4   :  { %v783_v8 = vpop.permute.xlu0 %782  ;;  %v2141_v55 = vmax.f32.f32 %v1949_v57, %v2045_v4 }
 0x1f5   :  { %v1086_v37 = vsel %vm1002_vm0, %v783_v8, %v975_v28  ;;  %v1182_v35 = vsel %vm1002_vm0, %v975_v28, %v783_v8  ;;  %v3018_v17 = vadd.f32 %v3017_v29, %v2923_v45  ;;  %v2924_v8 = vsel %vm2747_vm2, %v2236_v10, 0.0 }
 0x1f6   :  { %v1361_v20 = vadd.f32 %v1086_v37, %v4444_v2  ;;  %v1362_v22 = vadd.f32 %v1182_v35, %v5502_v39  ;;  %v1553_v16 = vsub.f32 %v4444_v2, %v1086_v37  ;;  %v1554_v3 = vsub.f32 %v5502_v39, %v1182_v35  ;;  %v5507_v39 = vld [vmem:[#allocation30_spill] sm:$0xff] }
 0x1f7   :  { %v2237_v42 = vadd.f32 %v2141_v55, %v1853_v31  ;;  %v3019_v57 = vadd.f32 %v3018_v17, %v2924_v8 }
 0x1f8   :  { %v977_v47 = vpop.permute.xlu1 %976  ;;  %v1662_v6 = vand.u32 2147483647, %v1361_v20  ;;  %v1758_v15 = vand.u32 2147483647, %v1362_v22  ;;  %v1950_v63 = vand.u32 2147483647, %v1553_v16 }
 0x1f9   :  { %v2046_v49 = vand.u32 2147483647, %v1554_v3  ;;  %v2925_v3 = vsel %vm2747_vm2, %v2237_v42, 0.0  ;;  %v5509_v42 = vld [vmem:[#allocation32_spill] sm:$0xff] }
 0x1fa   :  { %v785_v41 = vpop.permute.xlu0 %784  ;;  %v1854_v7 = vmax.f32.f32 %v1662_v6, %v1758_v15 }
 0x1fb   :  { %v1087_v54 = vsel %vm1002_vm0, %v785_v41, %v977_v47  ;;  %v1183_v21 = vsel %vm1002_vm0, %v977_v47, %v785_v41  ;;  %v2142_v43 = vmax.f32.f32 %v1950_v63, %v2046_v49  ;;  %v3020_v49 = vadd.f32 %v3019_v57, %v2925_v3 }
 0x1fc   :  { %v1363_v61 = vadd.f32 %v1087_v54, %v4462_v32  ;;  %v1364_v2 = vadd.f32 %v1183_v21, %v5503_v50  ;;  %v1555_v1 = vsub.f32 %v4462_v32, %v1087_v54  ;;  %v1556_v38 = vsub.f32 %v5503_v50, %v1183_v21 }
 0x1fd   :  { %v979_v59 = vpop.permute.xlu1 %978  ;;  %v2238_v41 = vadd.f32 %v2142_v43, %v1854_v7 }
 0x1fe   :  { %v1663_v46 = vand.u32 2147483647, %v1363_v61  ;;  %v1759_v48 = vand.u32 2147483647, %v1364_v2  ;;  %v787_v58 = vpop.permute.xlu0 %786  ;;  %v1951_v40 = vand.u32 2147483647, %v1555_v1 }
 0x1ff   :  { %v2047_v36 = vand.u32 2147483647, %v1556_v38  ;;  %v1088_v28 = vsel %vm1002_vm0, %v787_v58, %v979_v59  ;;  %v1184_v32 = vsel %vm1002_vm0, %v979_v59, %v787_v58 }
 0x200   :  { %v1365_v12 = vadd.f32 %v1088_v28, %v5504_v56  ;;  %v1366_v27 = vadd.f32 %v1184_v32, %v5505_v52  ;;  %v1557_v33 = vsub.f32 %v5504_v56, %v1088_v28  ;;  %v1558_v34 = vsub.f32 %v5505_v52, %v1184_v32 }
 0x201   :  { %v981_v25 = vpop.permute.xlu1 %980  ;;  %v1855_v37 = vmax.f32.f32 %v1663_v46, %v1759_v48  ;;  %v2143_v13 = vmax.f32.f32 %v1951_v40, %v2047_v36  ;;  %v2926_v48 = vsel %vm2747_vm2, %v2238_v41, 0.0 }
 0x202   :  { %v789_v35 = vpop.permute.xlu0 %788  ;;  %v1664_v30 = vand.u32 2147483647, %v1365_v12  ;;  %v1760_v51 = vand.u32 2147483647, %v1366_v27  ;;  %v1952_v0 = vand.u32 2147483647, %v1557_v33  ;;  %v3021_v33 = vadd.f32 %v3020_v49, %v2926_v48 }
 0x203   :  { %v1089_v60 = vsel %vm1002_vm0, %v789_v35, %v981_v25  ;;  %v2048_v26 = vand.u32 2147483647, %v1558_v34  ;;  %v1185_v47 = vsel %vm1002_vm0, %v981_v25, %v789_v35  ;;  %v2239_v45 = vadd.f32 %v2143_v13, %v1855_v37  ;;  %v5508_v27 = vld [vmem:[#allocation31_spill] sm:$0xff] }
 0x204   :  { %v1367_v20 = vadd.f32 %v1089_v60, %v5506_v23  ;;  %v1368_v22 = vadd.f32 %v1185_v47, %v5507_v39  ;;  %v1559_v16 = vsub.f32 %v5506_v23, %v1089_v60  ;;  %v1560_v29 = vsub.f32 %v5507_v39, %v1185_v47 }
 0x205   :  { %v1856_v10 = vmax.f32.f32 %v1664_v30, %v1760_v51  ;;  %v2144_v21 = vmax.f32.f32 %v1952_v0, %v2048_v26  ;;  %v2927_v58 = vsel %vm2747_vm2, %v2239_v45, 0.0 }
 0x206   :  { %v983_v4 = vpop.permute.xlu1 %982  ;;  %v1665_v61 = vand.u32 2147483647, %v1367_v20  ;;  %v1761_v1 = vand.u32 2147483647, %v1368_v22  ;;  %v1953_v38 = vand.u32 2147483647, %v1559_v16  ;;  %v3022_v13 = vadd.f32 %v3021_v33, %v2927_v58 }
 0x207   :  { %v791_v54 = vpop.permute.xlu0 %790  ;;  %v2049_v31 = vand.u32 2147483647, %v1560_v29  ;;  %v2240_v40 = vadd.f32 %v2144_v21, %v1856_v10  ;;  %v5510_v20 = vld [vmem:[#allocation34_spill] sm:$0xff]  ;;  %v5511_v21 = vld [vmem:[#allocation33_spill] sm:$0xff] }
 0x208   :  { %v1090_v50 = vsel %vm1002_vm0, %v791_v54, %v983_v4  ;;  %v1186_v2 = vsel %vm1002_vm0, %v983_v4, %v791_v54  ;;  %v1857_v28 = vmax.f32.f32 %v1665_v61, %v1761_v1 }
 0x209   :  { %v1369_v6 = vadd.f32 %v1090_v50, %v4514_v5  ;;  %v1370_v15 = vadd.f32 %v1186_v2, %v4512_v53  ;;  %v1561_v63 = vsub.f32 %v4514_v5, %v1090_v50  ;;  %v1562_v59 = vsub.f32 %v4512_v53, %v1186_v2 }
 0x20a   :  { %v985_v55 = vpop.permute.xlu1 %984  ;;  %v2145_v32 = vmax.f32.f32 %v1953_v38, %v2049_v31  ;;  %v2928_v30 = vsel %vm2747_vm2, %v2240_v40, 0.0 }
 0x20b   :  { %v793_v46 = vpop.permute.xlu0 %792  ;;  %v1666_v56 = vand.u32 2147483647, %v1369_v6  ;;  %v1762_v53 = vand.u32 2147483647, %v1370_v15  ;;  %v1954_v12 = vand.u32 2147483647, %v1561_v63 }
 0x20c   :  { %v1091_v36 = vsel %vm1002_vm0, %v793_v46, %v985_v55  ;;  %v1187_v5 = vsel %vm1002_vm0, %v985_v55, %v793_v46  ;;  %v2050_v52 = vand.u32 2147483647, %v1562_v59  ;;  %v2241_v51 = vadd.f32 %v2145_v32, %v1857_v28  ;;  %v5512_v32 = vld [vmem:[#allocation35_spill] sm:$0xff] }
 0x20d   :  { %v1371_v17 = vadd.f32 %v1091_v36, %v5508_v27  ;;  %v1563_v34 = vsub.f32 %v5508_v27, %v1091_v36  ;;  %v1372_v7 = vadd.f32 %v1187_v5, %v5509_v42  ;;  %v1564_v43 = vsub.f32 %v5509_v42, %v1187_v5  ;;  %v5513_v5 = vld [vmem:[#allocation36_spill] sm:$0xff] }
 0x20e   :  { %v987_v8 = vpop.permute.xlu1 %986  ;;  %v1858_v60 = vmax.f32.f32 %v1666_v56, %v1762_v53  ;;  %v2146_v0 = vmax.f32.f32 %v1954_v12, %v2050_v52  ;;  %v2929_v10 = vsel %vm2747_vm2, %v2241_v51, 0.0 }
 0x20f   :  { %v795_v25 = vpop.permute.xlu0 %794  ;;  %v1667_v26 = vand.u32 2147483647, %v1371_v17  ;;  %v1955_v23 = vand.u32 2147483647, %v1563_v34  ;;  %v1763_v4 = vand.u32 2147483647, %v1372_v7 }
 0x210   :  { %v1092_v37 = vsel %vm1002_vm0, %v795_v25, %v987_v8  ;;  %v1188_v35 = vsel %vm1002_vm0, %v987_v8, %v795_v25  ;;  %v2051_v3 = vand.u32 2147483647, %v1564_v43  ;;  %v2242_v55 = vadd.f32 %v2146_v0, %v1858_v60  ;;  %v5514_v60 = vld [vmem:[#allocation37_spill] sm:$0xff] }
 0x211   :  { %v1373_v47 = vadd.f32 %v1092_v37, %v4550_v62  ;;  %v1374_v39 = vadd.f32 %v1188_v35, %v5510_v20  ;;  %v1565_v22 = vsub.f32 %v4550_v62, %v1092_v37  ;;  %v1566_v16 = vsub.f32 %v5510_v20, %v1188_v35 }
 0x212   :  { %v3023_v62 = vadd.f32 %v3022_v13, %v2928_v30  ;;  %v1859_v49 = vmax.f32.f32 %v1667_v26, %v1763_v4  ;;  %v2147_v46 = vmax.f32.f32 %v1955_v23, %v2051_v3  ;;  %v2930_v33 = vsel %vm2747_vm2, %v2242_v55, 0.0  ;;  %v5515_v26 = vld [vmem:[#allocation38_spill] sm:$0xff] }
 0x213   :  { %v989_v29 = vpop.permute.xlu1 %988  ;;  %v797_v57 = vpop.permute.xlu0 %796  ;;  %v1668_v50 = vand.u32 2147483647, %v1373_v47  ;;  %v1764_v38 = vand.u32 2147483647, %v1374_v39  ;;  %v1956_v31 = vand.u32 2147483647, %v1565_v22 }
 0x214   :  { %v1093_v41 = vsel %vm1002_vm0, %v797_v57, %v989_v29  ;;  %v1189_v45 = vsel %vm1002_vm0, %v989_v29, %v797_v57  ;;  %v2052_v6 = vand.u32 2147483647, %v1566_v16  ;;  %v3024_v59 = vadd.f32 %v3023_v62, %v2929_v10 }
 0x215   :  { %v1375_v54 = vadd.f32 %v1093_v41, %v4568_v11  ;;  %v1376_v61 = vadd.f32 %v1189_v45, %v5511_v21  ;;  %v1567_v2 = vsub.f32 %v4568_v11, %v1093_v41  ;;  %v1568_v1 = vsub.f32 %v5511_v21, %v1189_v45 }
 0x216   :  { %v1860_v12 = vmax.f32.f32 %v1668_v50, %v1764_v38  ;;  %v2148_v52 = vmax.f32.f32 %v1956_v31, %v2052_v6  ;;  %v2243_v34 = vadd.f32 %v2147_v46, %v1859_v49  ;;  %v3025_v23 = vadd.f32 %v3024_v59, %v2930_v33 }
 0x217   :  { %v991_v15 = vpop.permute.xlu1 %990  ;;  %v1669_v48 = vand.u32 2147483647, %v1375_v54  ;;  %v1765_v58 = vand.u32 2147483647, %v1376_v61  ;;  %v1957_v11 = vand.u32 2147483647, %v1567_v2 }
 0x218   :  { %v799_v63 = vpop.permute.xlu0 %798  ;;  %v2053_v28 = vand.u32 2147483647, %v1568_v1  ;;  %v2244_v20 = vadd.f32 %v2148_v52, %v1860_v12  ;;  %v2931_v16 = vsel %vm2747_vm2, %v2243_v34, 0.0  ;;  %v5517_v12 = vld [vmem:[#allocation40_spill] sm:$0xff] }
 0x219   :  { %v1094_v40 = vsel %vm1002_vm0, %v799_v63, %v991_v15  ;;  %v1190_v36 = vsel %vm1002_vm0, %v991_v15, %v799_v63  ;;  %v1861_v30 = vmax.f32.f32 %v1669_v48, %v1765_v58  ;;  %v3026_v1 = vadd.f32 %v3025_v23, %v2931_v16 }
 0x21a   :  { %v1377_v56 = vadd.f32 %v1094_v40, %v5512_v32  ;;  %v1378_v53 = vadd.f32 %v1190_v36, %v5513_v5  ;;  %v1569_v27 = vsub.f32 %v5512_v32, %v1094_v40  ;;  %v1570_v17 = vsub.f32 %v5513_v5, %v1190_v36 }
 0x21b   :  { %v2149_v51 = vmax.f32.f32 %v1957_v11, %v2053_v28  ;;  %v2932_v38 = vsel %vm2747_vm2, %v2244_v20, 0.0  ;;  %v5516_v28 = vld [vmem:[#allocation39_spill] sm:$0xff] }
 0x21c   :  { %v993_v8 = vpop.permute.xlu1 %992  ;;  %v1670_v25 = vand.u32 2147483647, %v1377_v56  ;;  %v1766_v42 = vand.u32 2147483647, %v1378_v53  ;;  %v1958_v43 = vand.u32 2147483647, %v1569_v27  ;;  %v3027_v56 = vadd.f32 %v3026_v1, %v2932_v38 }
 0x21d   :  { %v801_v7 = vpop.permute.xlu0 %800  ;;  %v2054_v37 = vand.u32 2147483647, %v1570_v17  ;;  %v2245_v61 = vadd.f32 %v2149_v51, %v1861_v30 }
 0x21e   :  { %v1095_v35 = vsel %vm1002_vm0, %v801_v7, %v993_v8  ;;  %v1191_v13 = vsel %vm1002_vm0, %v993_v8, %v801_v7  ;;  %v1862_v29 = vmax.f32.f32 %v1670_v25, %v1766_v42 }
 0x21f   :  { %v1379_v0 = vadd.f32 %v1095_v35, %v5514_v60  ;;  %v1380_v47 = vadd.f32 %v1191_v13, %v5515_v26  ;;  %v1571_v39 = vsub.f32 %v5514_v60, %v1095_v35  ;;  %v1572_v22 = vsub.f32 %v5515_v26, %v1191_v13 }
 0x220   :  { %v2150_v45 = vmax.f32.f32 %v1958_v43, %v2054_v37  ;;  %v2933_v36 = vsel %vm2747_vm2, %v2245_v61, 0.0 }
 0x221   :  { %v1671_v57 = vand.u32 2147483647, %v1379_v0  ;;  %v1767_v4 = vand.u32 2147483647, %v1380_v47  ;;  %v995_v3 = vpop.permute.xlu1 %994  ;;  %v803_v41 = vpop.permute.xlu0 %802  ;;  %v1959_v10 = vand.u32 2147483647, %v1571_v39  ;;  %v3028_v25 = vadd.f32 %v3027_v56, %v2933_v36 }
 0x222   :  { %v2055_v54 = vand.u32 2147483647, %v1572_v22  ;;  %v1096_v21 = vsel %vm1002_vm0, %v803_v41, %v995_v3  ;;  %v1192_v62 = vsel %vm1002_vm0, %v995_v3, %v803_v41  ;;  %v2246_v48 = vadd.f32 %v2150_v45, %v1862_v29 }
 0x223   :  { %v1381_v50 = vadd.f32 %v1096_v21, %v4622_v9  ;;  %v1573_v2 = vsub.f32 %v4622_v9, %v1096_v21  ;;  %v1382_v31 = vadd.f32 %v1192_v62, %v4620_v14  ;;  %v1574_v6 = vsub.f32 %v4620_v14, %v1192_v62 }
 0x224   :  { %v1863_v15 = vmax.f32.f32 %v1671_v57, %v1767_v4  ;;  %v2151_v63 = vmax.f32.f32 %v1959_v10, %v2055_v54  ;;  %v2934_v42 = vsel %vm2747_vm2, %v2246_v48, 0.0 }
 0x225   :  { %v1672_v59 = vand.u32 2147483647, %v1381_v50  ;;  %v1960_v55 = vand.u32 2147483647, %v1573_v2  ;;  %v997_v49 = vpop.permute.xlu1 %996  ;;  %v805_v46 = vpop.permute.xlu0 %804  ;;  %v1768_v58 = vand.u32 2147483647, %v1382_v31  ;;  %v3029_v39 = vadd.f32 %v3028_v25, %v2934_v42 }
 0x226   :  { %v2056_v40 = vand.u32 2147483647, %v1574_v6  ;;  %v1097_v9 = vsel %vm1002_vm0, %v805_v46, %v997_v49  ;;  %v1193_v11 = vsel %vm1002_vm0, %v997_v49, %v805_v46  ;;  %v2247_v27 = vadd.f32 %v2151_v63, %v1863_v15 }
 0x227   :  { %v1383_v14 = vadd.f32 %v1097_v9, %v5516_v28  ;;  %v1575_v32 = vsub.f32 %v5516_v28, %v1097_v9  ;;  %v1864_v5 = vmax.f32.f32 %v1672_v59, %v1768_v58  ;;  %v1384_v52 = vadd.f32 %v1193_v11, %v5517_v12 }
 0x228   :  { %v2152_v53 = vmax.f32.f32 %v1960_v55, %v2056_v40  ;;  %v1576_v17 = vsub.f32 %v5517_v12, %v1193_v11  ;;  %v2935_v47 = vsel %vm2747_vm2, %v2247_v27, 0.0 }
 0x229   :  { %v1673_v8 = vand.u32 2147483647, %v1383_v14  ;;  %v1961_v33 = vand.u32 2147483647, %v1575_v32  ;;  %v999_v34 = vpop.permute.xlu1 %998  ;;  %v1769_v7 = vand.u32 2147483647, %v1384_v52  ;;  %v3030_v41 = vadd.f32 %v3029_v39, %v2935_v47 }
 0x22a   :  { %v807_v43 = vpop.permute.xlu0 %806  ;;  %v2248_v37 = vadd.f32 %v2152_v53, %v1864_v5  ;;  %v2057_v35 = vand.u32 2147483647, %v1576_v17 }
 0x22b   :  { %v1098_v13 = vsel %vm1002_vm0, %v807_v43, %v999_v34  ;;  %v1194_v30 = vsel %vm1002_vm0, %v999_v34, %v807_v43  ;;  %v1865_v51 = vmax.f32.f32 %v1673_v8, %v1769_v7 }
 0x22c   :  { %v1385_v60 = vadd.f32 %v1098_v13, %v4656_v44  ;;  %v1386_v0 = vadd.f32 %v1194_v30, %v4654_v19  ;;  %v1577_v26 = vsub.f32 %v4656_v44, %v1098_v13  ;;  %v2153_v23 = vmax.f32.f32 %v1961_v33, %v2057_v35 }
 0x22d   :  { %v1578_v20 = vsub.f32 %v4654_v19, %v1194_v30  ;;  %v2936_v4 = vsel %vm2747_vm2, %v2248_v37, 0.0 }
 0x22e   :  { %v1674_v22 = vand.u32 2147483647, %v1385_v60  ;;  %v1770_v16 = vand.u32 2147483647, %v1386_v0  ;;  %v1962_v29 = vand.u32 2147483647, %v1577_v26  ;;  %v2249_v57 = vadd.f32 %v2153_v23, %v1865_v51 }
 0x22f   :  { %v2058_v24 = vand.u32 2147483647, %v1578_v20  ;;  %v3031_v10 = vadd.f32 %v3030_v41, %v2936_v4 }
 0x230   :  { %v1866_v3 = vmax.f32.f32 %v1674_v22, %v1770_v16  ;;  %v2937_v44 = vsel %vm2747_vm2, %v2249_v57, 0.0 }
 0x231   :  { %v2154_v45 = vmax.f32.f32 %v1962_v29, %v2058_v24  ;;  %v3032_v21 = vadd.f32 %v3031_v10, %v2937_v44 }
 0x233   :  { %v2250_v54 = vadd.f32 %v2154_v45, %v1866_v3 }
 0x235   :  { %v2938_v19 = vsel %vm2747_vm2, %v2250_v54, 0.0 }
 0x236   :  { %v3033_v61 = vadd.f32 %v3032_v21, %v2938_v19 }
 0x238   :  { %3034 = vadd.xlane.f32.xlu0 %v3033_v61 }
 0x2c5   :  { %v3035_v62 = vpop.xlane.xlu0 %3034 }
 0x2c6   :  { %v3036_v50 = vrot.slane %v3035_v62, 4 }
 0x2c8   :  { %v3037_v2 = vadd.f32 %v3036_v50, %v3035_v62 }
 0x2ca   :  { %v3038_v1 = vrot.slane %v3037_v2, 2 }
 0x2cc   :  { %v3039_v38 = vadd.f32 %v3038_v1, %v3037_v2 }
 0x2ce   :  { %v3040_v31 = vrot.slane %v3039_v38, 1 }
 0x2d0   :  { %v3041_v6 = vadd.f32 %v3040_v31, %v3039_v38 }
 0x2d2   :  { %3061 = vpush %v3041_v6 }
 0x303   :  { %s3062_s8 = spop %3061 }
 0x304   :  { %v3043_v15 = vstv %s3062_s8 }
 0x305   :  { %3044 = vst [vmem:[#allocation7] sm:$0x1] %v3043_v15 }
 0x306   :  { %3125 = shalt.err (!%p3122_p6)
}
 0x307   :  { %s3126_s13 = scalar_lea.hbm %s4972_s2, 16 }
 0x308   :  { %p3127_p7 = scmp.ne.s32.totalorder %s4972_s2, %s3126_s13  ;;  %p3130_p8 = scmp.lt.u32.totalorder %s3126_s13, %s4972_s2 }
 0x30a   :  { %p3132_p9 = pnand %p3130_p8, %p3127_p7 }
 0x30c   :  { %3135 = shalt.err (!%p3132_p9)
}
 0x30d   :  { %3054 = dma.vmem_to_hbm [thread:$0]  %s3052_s7, 16, %s4972_s2, [#allocation4]  }
 0x30e   :  { %3140 = dma.done.wait [#allocation4], 16  }
 0x30f   :  { %3141 = vsyncadd [#allocation4], 4294967280 }
 0x310   :  { %3058 = vsyncpa [#allocation3], 1 }
 0x311   :  { %3059 = vsyncpa [#allocation6], 1 }
 0x312   :  { %3060 = vsyncpa [#allocation4], 1 }

</bundles_post_ra>
